<compile_context>
chip_gen: v5e
topology: v5e:2x2
jax: 0.10.0
libtpu: 0.0.40
codegen_flags: <defaults>
</compile_context>

<pallas_src>
import functools

import jax
import jax.numpy as jnp
from jax.experimental import pallas as pl
from jax.experimental.pallas import tpu as pltpu

EPS = 1e-10


def _iamil_tile_kernel(attn_d, n_cls,
                       h_ref, wfc_ref, bfc_ref, wp_ref, bp_ref, wc_ref, bc_ref,
                       out_ref):
    """One grid step: one (TN, F) tile of instances -> one (8, TN) output block.

    Rows 0..C-1 of the output block hold per-instance cls_score (softmax over
    classes), rows C..2C-1 hold det_logit; the cross-instance det softmax is
    deferred to the wrapper (it needs all N instances).
    """
    # ---- det_net fc: Linear(F, H) + ReLU (f32 MXU accumulate) --------------
    h1 = jnp.dot(h_ref[...], wfc_ref[...],
                 preferred_element_type=jnp.float32) + bfc_ref[...]   # (TN, H)
    h1 = jnp.maximum(h1, 0.0)

    # ---- fused projections: [attention_a | attention_b | cls_net] ----------
    # Transposed-RHS contraction -> lane-dense (P, TN) result without
    # materialising / transposing a wide (TN, 128) intermediate.
    proj = jax.lax.dot_general(
        wp_ref[...], h1,
        dimension_numbers=(((1,), (1,)), ((), ())),
        preferred_element_type=jnp.float32) + bp_ref[...]             # (P, TN)

    a_t = jnp.tanh(proj[0:attn_d, :])                                 # (A, TN)
    b_t = jax.nn.sigmoid(proj[attn_d:2 * attn_d, :])                  # (A, TN)
    cls_logit = proj[2 * attn_d:2 * attn_d + n_cls, :]                # (C, TN)

    # ---- attention_c on the VPU (A, C are tiny -> skip the MXU) ------------
    gated = a_t * b_t                                                 # (A, TN)
    det_logit = jnp.zeros_like(cls_logit)                             # (C, TN)
    for ai in range(attn_d):                                          # static unroll
        det_logit = det_logit + wc_ref[:, ai:ai + 1] * gated[ai:ai + 1, :]
    det_logit = det_logit + bc_ref[...]

    # ---- class softmax over the C rows (cheap sublane reduce) --------------
    cls_max = jnp.max(cls_logit, axis=0, keepdims=True)
    cls_e = jnp.exp(cls_logit - cls_max)
    cls_score = cls_e * pl.reciprocal(
        jnp.sum(cls_e, axis=0, keepdims=True), approx=True)           # (C, TN)

    # ---- single unmasked 8-sublane store of [cls_score ; det_logit ; pad] --
    tile_cols = out_ref.shape[1]
    pad_rows = out_ref.shape[0] - 2 * n_cls
    parts = [cls_score, det_logit]
    if pad_rows > 0:
        parts.append(jnp.zeros((pad_rows, tile_cols), jnp.float32))
    out_ref[...] = jnp.concatenate(parts, axis=0)


def iamil_forward(h, params, *, tile_n=1024):
    """IAMIL forward (return_features=False, instance_eval=False).

    Returns (final_score (N, C) f32, Y_prob (C,) f32, Y_hat (1,) int32)."""
    n, fea = h.shape
    hid = params["wfc"].shape[1]
    attn_d = params["wa"].shape[1]
    n_cls = params["wcls"].shape[1]

    n_tiles = pl.cdiv(n, tile_n)
    n_padded = n_tiles * tile_n
    pack_rows = max(8, ((2 * n_cls + 7) // 8) * 8)   # 8-sublane-padded slab

    # --- tiny one-time weight re-layouts (trace-time plumbing only) ---------
    wfc = params["wfc"]                                               # (F, H)
    bfc = params["bfc"].reshape(1, hid)                               # (1, H)
    wp = jnp.concatenate([params["wa"], params["wb"], params["wcls"]],
                         axis=1).T                                    # (2A+C, H)
    bp = jnp.concatenate([params["ba"], params["bb"], params["bcls"]],
                         axis=1).reshape(2 * attn_d + n_cls, 1)       # (2A+C, 1)
    wc = params["wc"].T                                               # (C, A)
    bc = params["bc"].reshape(n_cls, 1)                               # (C, 1)

    kernel = functools.partial(_iamil_tile_kernel, attn_d, n_cls)
    resident = lambda i: (0, 0)   # same block every step -> fetched once

    grid_spec = pltpu.PrefetchScalarGridSpec(
        num_scalar_prefetch=0,
        grid=(n_tiles,),
        in_specs=[
            pl.BlockSpec((tile_n, fea), lambda i: (i, 0)),            # streamed h
            pl.BlockSpec((fea, hid), resident),                       # wfc
            pl.BlockSpec((1, hid), resident),                         # bfc row
            pl.BlockSpec((2 * attn_d + n_cls, hid), resident),        # [wa|wb|wcls]^T
            pl.BlockSpec((2 * attn_d + n_cls, 1), resident),          # fused bias col
            pl.BlockSpec((n_cls, attn_d), resident),                  # wc^T
            pl.BlockSpec((n_cls, 1), resident),                       # bc col
        ],
        out_specs=pl.BlockSpec((pack_rows, tile_n), lambda i: (0, i)),
    )

    # VMEM budget: double-buffered h tile + double-buffered output block +
    # resident weights (tiny) + headroom.  Clamped to the smallest physical
    # VMEM across generations (64 MiB on v7x).
    vmem_bytes = (2 * tile_n * fea * 4 + 2 * pack_rows * tile_n * 4
                  + (4 << 20))
    vmem_limit = int(min(64 * 1024 * 1024, max(vmem_bytes, 32 * 1024 * 1024)))

    packed = pl.pallas_call(
        kernel,
        out_shape=jax.ShapeDtypeStruct((pack_rows, n_padded), jnp.float32),
        grid_spec=grid_spec,
        compiler_params=pltpu.CompilerParams(
            dimension_semantics=("parallel",),
            vmem_limit_bytes=vmem_limit),
    )(h, wfc, bfc, wp, bp, wc, bc)

    # --- tiny O(C*N) finalize in plain XLA (keeps the streaming pass parallel)
    cls_score = packed[0:n_cls, 0:n]                                  # (C, N)
    det_logit = packed[n_cls:2 * n_cls, 0:n]                          # (C, N)
    det_score = jax.nn.softmax(det_logit, axis=1)                     # over instances
    final_t = cls_score * det_score                                   # (C, N)
    final_score = final_t.T                                           # (N, C)
    y_prob = jnp.clip(jnp.sum(final_t, axis=1), EPS, 1.0 - EPS)       # (C,)
    y_hat = jnp.argmax(y_prob).astype(jnp.int32)[None]                # topk(.,1)[1]
    return final_score, y_prob, y_hat


def init_params(key, fea_dim, hidden, attn_d, n_classes):
    ks = jax.random.split(key, 10)
    s = 0.1
    return {
        "wfc":  s * jax.random.normal(ks[0], (fea_dim, hidden), jnp.float32),
        "bfc":  0.05 * jax.random.normal(ks[1], (1, hidden), jnp.float32),
        "wa":   s * jax.random.normal(ks[2], (hidden, attn_d), jnp.float32),
        "ba":   0.05 * jax.random.normal(ks[3], (1, attn_d), jnp.float32),
        "wb":   s * jax.random.normal(ks[4], (hidden, attn_d), jnp.float32),
        "bb":   0.05 * jax.random.normal(ks[5], (1, attn_d), jnp.float32),
        "wc":   s * jax.random.normal(ks[6], (attn_d, n_classes), jnp.float32),
        "bc":   0.05 * jax.random.normal(ks[7], (1, n_classes), jnp.float32),
        "wcls": s * jax.random.normal(ks[8], (hidden, n_classes), jnp.float32),
        "bcls": 0.05 * jax.random.normal(ks[9], (1, n_classes), jnp.float32),
    }


def iamil_reference(h, p):
    """Pure-JAX f32 reference mirroring the PyTorch forward()."""
    h1 = jnp.maximum(h @ p["wfc"] + p["bfc"], 0.0)
    a = jnp.tanh(h1 @ p["wa"] + p["ba"])
    b = jax.nn.sigmoid(h1 @ p["wb"] + p["bb"])
    det_logit = (a * b) @ p["wc"] + p["bc"]
    cls_logit = h1 @ p["wcls"] + p["bcls"]
    cls_score = jax.nn.softmax(cls_logit, axis=1)
    det_score = jax.nn.softmax(det_logit, axis=0)
    final = cls_score * det_score
    yprob = jnp.clip(jnp.sum(final, axis=0), EPS, 1.0 - EPS)
    yhat = jnp.argmax(yprob).astype(jnp.int32)[None]
    return final, yprob, yhat


if __name__ == "__main__":
    # size_arg='small' -> size = [fea_dim, 8, 4], n_classes=2 (fea_dim shrunk
    # for the demo).  N=2500 with tile_n=1024 exercises multi-tile streaming
    # plus the ragged last tile (452 valid rows).
    N, FEA_DIM, HIDDEN, ATTN_D, N_CLASSES = 2500, 256, 8, 4, 2
    key = jax.random.PRNGKey(0)
    k_h, k_p = jax.random.split(key)
    h = jax.random.normal(k_h, (N, FEA_DIM), jnp.float32)
    params = init_params(k_p, FEA_DIM, HIDDEN, ATTN_D, N_CLASSES)
    # TODO(synk): instance_eval / find_candidate (top-k instance mining), the
    # ref_net heads, dropout and the return_features dict are not part of the
    # default inference forward path and are not implemented.

    fwd = jax.jit(functools.partial(iamil_forward, tile_n=1024))
    final_score, y_prob, y_hat = fwd(h, params)
    jax.block_until_ready((final_score, y_prob, y_hat))

    ref_final, ref_prob, ref_hat = iamil_reference(h, params)
    assert final_score.shape == (N, N_CLASSES)
    assert y_prob.shape == (N_CLASSES,)
    # Tolerance covers MXU accumulation-order differences and the approximate
    # (EUP) reciprocal in the per-tile class softmax.
    assert jnp.allclose(final_score, ref_final, rtol=5e-3, atol=1e-5), \
        "final_score mismatch"
    assert jnp.allclose(y_prob, ref_prob, rtol=5e-3, atol=1e-5), "Y_prob mismatch"
    # argmax is only asserted when the class probabilities are not near-tied
    # (tie-breaking under tiny numeric differences is benign).
    if float(jnp.abs(ref_prob[0] - ref_prob[1])) > 1e-3:
        assert int(y_hat[0]) == int(ref_hat[0]), "Y_hat mismatch"

    print("KERNEL_OK")
</pallas_src>

<mosaic_0001>
module attributes {stable_mosaic.version = 11 : i64} {
  func.func @_iamil_tile_kernel(%arg0: i32, %arg1: memref<1024x256xf32, #tpu.memory_space<vmem>>, %arg2: memref<256x8xf32, #tpu.memory_space<vmem>>, %arg3: memref<1x8xf32, #tpu.memory_space<vmem>>, %arg4: memref<10x8xf32, #tpu.memory_space<vmem>>, %arg5: memref<10x1xf32, #tpu.memory_space<vmem>>, %arg6: memref<2x4xf32, #tpu.memory_space<vmem>>, %arg7: memref<2x1xf32, #tpu.memory_space<vmem>>, %arg8: memref<8x1024xf32, #tpu.memory_space<vmem>>) attributes {dimension_semantics = [#tpu.dimension_semantics<parallel>], iteration_bounds = array<i64: 3>, scalar_prefetch = 0 : i64, scratch_operands = 0 : i64, tpu.core_type = #tpu.core_type<tc>, window_params = [{transform_indices = @transform_0, window_bounds = array<i64: 1024, 256>}, {pipeline_mode = #tpu.pipeline_mode<synchronous>, transform_indices = @transform_1, window_bounds = array<i64: 256, 8>}, {pipeline_mode = #tpu.pipeline_mode<synchronous>, transform_indices = @transform_2, window_bounds = array<i64: 1, 8>}, {pipeline_mode = #tpu.pipeline_mode<synchronous>, transform_indices = @transform_3, window_bounds = array<i64: 10, 8>}, {pipeline_mode = #tpu.pipeline_mode<synchronous>, transform_indices = @transform_4, window_bounds = array<i64: 10, 1>}, {pipeline_mode = #tpu.pipeline_mode<synchronous>, transform_indices = @transform_5, window_bounds = array<i64: 2, 4>}, {pipeline_mode = #tpu.pipeline_mode<synchronous>, transform_indices = @transform_6, window_bounds = array<i64: 2, 1>}, {transform_indices = @transform_7, window_bounds = array<i64: 8, 1024>}]} {
    %c0 = arith.constant 0 : index
    %c0_0 = arith.constant 0 : index
    %0 = vector.load %arg1[%c0, %c0_0] : memref<1024x256xf32, #tpu.memory_space<vmem>>, vector<1024x256xf32>
    %c0_1 = arith.constant 0 : index
    %c0_2 = arith.constant 0 : index
    %1 = vector.load %arg2[%c0_1, %c0_2] : memref<256x8xf32, #tpu.memory_space<vmem>>, vector<256x8xf32>
    %cst = arith.constant dense<0.000000e+00> : vector<1024x8xf32>
    %2 = tpu.matmul %0, %1, %cst {dimension_numbers = #tpu.dot_dimension_numbers<[1], [0], [0], [1], [0, 0, 1, 1], [], []>} : vector<1024x256xf32>, vector<256x8xf32>, vector<1024x8xf32> -> vector<1024x8xf32>
    %c0_3 = arith.constant 0 : index
    %c0_4 = arith.constant 0 : index
    %3 = vector.load %arg3[%c0_3, %c0_4] : memref<1x8xf32, #tpu.memory_space<vmem>>, vector<1x8xf32>
    %4 = vector.broadcast %3 : vector<1x8xf32> to vector<1024x8xf32>
    %5 = arith.addf %2, %4 : vector<1024x8xf32>
    %cst_5 = arith.constant 0.000000e+00 : f32
    %6 = vector.broadcast %cst_5 : f32 to vector<1024x8xf32>
    %7 = arith.maximumf %5, %6 : vector<1024x8xf32>
    %c0_6 = arith.constant 0 : index
    %c0_7 = arith.constant 0 : index
    %8 = vector.load %arg4[%c0_6, %c0_7] : memref<10x8xf32, #tpu.memory_space<vmem>>, vector<10x8xf32>
    %cst_8 = arith.constant dense<0.000000e+00> : vector<10x1024xf32>
    %9 = tpu.matmul %8, %7, %cst_8 {dimension_numbers = #tpu.dot_dimension_numbers<[1], [1], [0], [0], [0, 0, 1, 0], [], []>} : vector<10x8xf32>, vector<1024x8xf32>, vector<10x1024xf32> -> vector<10x1024xf32>
    %c0_9 = arith.constant 0 : index
    %c0_10 = arith.constant 0 : index
    %10 = vector.load %arg5[%c0_9, %c0_10] : memref<10x1xf32, #tpu.memory_space<vmem>>, vector<10x1xf32>
    %11 = vector.broadcast %10 : vector<10x1xf32> to vector<10x1024xf32>
    %12 = arith.addf %9, %11 : vector<10x1024xf32>
    %13 = vector.extract_strided_slice %12 {offsets = [0, 0], sizes = [4, 1024], strides = [1, 1]} : vector<10x1024xf32> to vector<4x1024xf32>
    %14 = math.tanh %13 : vector<4x1024xf32>
    %15 = vector.extract_strided_slice %12 {offsets = [4, 0], sizes = [4, 1024], strides = [1, 1]} : vector<10x1024xf32> to vector<4x1024xf32>
    %16 = arith.negf %15 : vector<4x1024xf32>
    %17 = math.exp %16 : vector<4x1024xf32>
    %cst_11 = arith.constant 1.000000e+00 : f32
    %18 = vector.broadcast %cst_11 : f32 to vector<4x1024xf32>
    %19 = arith.addf %18, %17 : vector<4x1024xf32>
    %20 = arith.divf %18, %19 : vector<4x1024xf32>
    %21 = vector.extract_strided_slice %12 {offsets = [8, 0], sizes = [2, 1024], strides = [1, 1]} : vector<10x1024xf32> to vector<2x1024xf32>
    %22 = arith.mulf %14, %20 : vector<4x1024xf32>
    %cst_12 = arith.constant 0.000000e+00 : f32
    %23 = vector.broadcast %cst_12 : f32 to vector<2x1024xf32>
    %c0_13 = arith.constant 0 : index
    %c0_14 = arith.constant 0 : index
    %24 = vector.load %arg6[%c0_13, %c0_14] : memref<2x4xf32, #tpu.memory_space<vmem>>, vector<2x1xf32>
    %25 = vector.extract_strided_slice %22 {offsets = [0, 0], sizes = [1, 1024], strides = [1, 1]} : vector<4x1024xf32> to vector<1x1024xf32>
    %26 = vector.broadcast %24 : vector<2x1xf32> to vector<2x1024xf32>
    %27 = vector.broadcast %25 : vector<1x1024xf32> to vector<2x1024xf32>
    %28 = arith.mulf %26, %27 : vector<2x1024xf32>
    %29 = arith.addf %23, %28 : vector<2x1024xf32>
    %c0_15 = arith.constant 0 : index
    %c1 = arith.constant 1 : index
    %30 = vector.load %arg6[%c0_15, %c1] : memref<2x4xf32, #tpu.memory_space<vmem>>, vector<2x1xf32>
    %31 = vector.extract_strided_slice %22 {offsets = [1, 0], sizes = [1, 1024], strides = [1, 1]} : vector<4x1024xf32> to vector<1x1024xf32>
    %32 = vector.broadcast %30 : vector<2x1xf32> to vector<2x1024xf32>
    %33 = vector.broadcast %31 : vector<1x1024xf32> to vector<2x1024xf32>
    %34 = arith.mulf %32, %33 : vector<2x1024xf32>
    %35 = arith.addf %29, %34 : vector<2x1024xf32>
    %c0_16 = arith.constant 0 : index
    %c2 = arith.constant 2 : index
    %36 = vector.load %arg6[%c0_16, %c2] : memref<2x4xf32, #tpu.memory_space<vmem>>, vector<2x1xf32>
    %37 = vector.extract_strided_slice %22 {offsets = [2, 0], sizes = [1, 1024], strides = [1, 1]} : vector<4x1024xf32> to vector<1x1024xf32>
    %38 = vector.broadcast %36 : vector<2x1xf32> to vector<2x1024xf32>
    %39 = vector.broadcast %37 : vector<1x1024xf32> to vector<2x1024xf32>
    %40 = arith.mulf %38, %39 : vector<2x1024xf32>
    %41 = arith.addf %35, %40 : vector<2x1024xf32>
    %c0_17 = arith.constant 0 : index
    %c3 = arith.constant 3 : index
    %42 = vector.load %arg6[%c0_17, %c3] : memref<2x4xf32, #tpu.memory_space<vmem>>, vector<2x1xf32>
    %43 = vector.extract_strided_slice %22 {offsets = [3, 0], sizes = [1, 1024], strides = [1, 1]} : vector<4x1024xf32> to vector<1x1024xf32>
    %44 = vector.broadcast %42 : vector<2x1xf32> to vector<2x1024xf32>
    %45 = vector.broadcast %43 : vector<1x1024xf32> to vector<2x1024xf32>
    %46 = arith.mulf %44, %45 : vector<2x1024xf32>
    %47 = arith.addf %41, %46 : vector<2x1024xf32>
    %c0_18 = arith.constant 0 : index
    %c0_19 = arith.constant 0 : index
    %48 = vector.load %arg7[%c0_18, %c0_19] : memref<2x1xf32, #tpu.memory_space<vmem>>, vector<2x1xf32>
    %49 = vector.broadcast %48 : vector<2x1xf32> to vector<2x1024xf32>
    %50 = arith.addf %47, %49 : vector<2x1024xf32>
    %cst_20 = arith.constant dense<0xFF800000> : vector<1024xf32>
    %51 = vector.multi_reduction <maximumf>, %21, %cst_20 [0] : vector<2x1024xf32> to vector<1024xf32>
    %52 = vector.shape_cast %51 : vector<1024xf32> to vector<1x1024xf32>
    %53 = vector.broadcast %52 : vector<1x1024xf32> to vector<2x1024xf32>
    %54 = arith.subf %21, %53 : vector<2x1024xf32>
    %55 = math.exp %54 : vector<2x1024xf32>
    %cst_21 = arith.constant dense<0.000000e+00> : vector<1024xf32>
    %56 = vector.multi_reduction <add>, %55, %cst_21 [0] : vector<2x1024xf32> to vector<1024xf32>
    %57 = vector.shape_cast %56 : vector<1024xf32> to vector<1x1024xf32>
    %58 = tpu.reciprocal %57 {approx = true} : vector<1x1024xf32> -> vector<1x1024xf32>
    %59 = vector.broadcast %58 : vector<1x1024xf32> to vector<2x1024xf32>
    %60 = arith.mulf %55, %59 : vector<2x1024xf32>
    %cst_22 = arith.constant 0.000000e+00 : f32
    %61 = vector.broadcast %cst_22 : f32 to vector<4x1024xf32>
    %62 = tpu.concatenate %60, %50, %61 in 0 : vector<2x1024xf32>, vector<2x1024xf32>, vector<4x1024xf32> -> vector<8x1024xf32>
    %c0_23 = arith.constant 0 : index
    %c0_24 = arith.constant 0 : index
    %63 = vector.load %arg8[%c0_23, %c0_24] : memref<8x1024xf32, #tpu.memory_space<vmem>>, vector<8x1024xf32>
    tpu.vector_store %arg8[%c0_23, %c0_24], %62 {strides = array<i32>} : memref<8x1024xf32, #tpu.memory_space<vmem>>, vector<8x1024xf32>,
    return
  }
  func.func @transform_0(%arg0: i32) -> (i32, i32) {
    %c0_i32 = arith.constant 0 : i32
    %c0_i32_0 = arith.constant 0 : i32
    return %arg0, %c0_i32 : i32, i32
  }
  func.func @transform_1(%arg0: i32) -> (i32, i32) {
    %c0_i32 = arith.constant 0 : i32
    %c0_i32_0 = arith.constant 0 : i32
    %c0_i32_1 = arith.constant 0 : i32
    return %c0_i32, %c0_i32_0 : i32, i32
  }
  func.func @transform_2(%arg0: i32) -> (i32, i32) {
    %c0_i32 = arith.constant 0 : i32
    %c0_i32_0 = arith.constant 0 : i32
    %c0_i32_1 = arith.constant 0 : i32
    return %c0_i32, %c0_i32_0 : i32, i32
  }
  func.func @transform_3(%arg0: i32) -> (i32, i32) {
    %c0_i32 = arith.constant 0 : i32
    %c0_i32_0 = arith.constant 0 : i32
    %c0_i32_1 = arith.constant 0 : i32
    return %c0_i32, %c0_i32_0 : i32, i32
  }
  func.func @transform_4(%arg0: i32) -> (i32, i32) {
    %c0_i32 = arith.constant 0 : i32
    %c0_i32_0 = arith.constant 0 : i32
    %c0_i32_1 = arith.constant 0 : i32
    return %c0_i32, %c0_i32_0 : i32, i32
  }
  func.func @transform_5(%arg0: i32) -> (i32, i32) {
    %c0_i32 = arith.constant 0 : i32
    %c0_i32_0 = arith.constant 0 : i32
    %c0_i32_1 = arith.constant 0 : i32
    return %c0_i32, %c0_i32_0 : i32, i32
  }
  func.func @transform_6(%arg0: i32) -> (i32, i32) {
    %c0_i32 = arith.constant 0 : i32
    %c0_i32_0 = arith.constant 0 : i32
    %c0_i32_1 = arith.constant 0 : i32
    return %c0_i32, %c0_i32_0 : i32, i32
  }
  func.func @transform_7(%arg0: i32) -> (i32, i32) {
    %c0_i32 = arith.constant 0 : i32
    %c0_i32_0 = arith.constant 0 : i32
    return %c0_i32, %arg0 : i32, i32
  }
}

</mosaic_0001>

<bundles_post_ra>
// kernel: iamil_forward.1
= control target key start
LH: loop header
LB: loop body
LE: loop exit
PB: predicated region body
PF: predicated region fallthrough
CT: control target
= control target key end

     0   :  { %12 = vsyncpa [#allocation3], 0  ;;  %s4761_s0 = inlined_call_operand.hbm [shape: f32[2500,256], index: 0, kind: input, shape index: {}]   ;;  %s4762_s1 = inlined_call_operand.vmem [shape: f32[256,8], index: 1, kind: input, shape index: {}]   ;;  %s4763_s2 = inlined_call_operand.hbm [shape: f32[1,8], index: 2, kind: input, shape index: {}]   ;;  %s4764_s3 = inlined_call_operand.vmem [shape: f32[10,8], index: 3, kind: input, shape index: {}]   ;;  %s4765_s4 = inlined_call_operand.vmem [shape: f32[10,1], index: 4, kind: input, shape index: {}]   ;;  %s4766_s5 = inlined_call_operand.hbm [shape: f32[2,4], index: 5, kind: input, shape index: {}]   ;;  %s4767_s6 = inlined_call_operand.vmem [shape: f32[2,1], index: 6, kind: input, shape index: {}]   ;;  %s4768_s7 = inlined_call_operand.vmem [shape: f32[8,3072], index: 7, kind: output, shape index: {}]  }
   0x1   :  { %14 = vsyncpa [#allocation3 + $0x1], 0 }
   0x2   :  { %15 = vsyncpa [#allocation5], 0  ;;  %s3312_s24 = smov 0   ;;  %s3314_s25 = smov 0  }
   0x3   :  { %s3316_s26 = smov 0   ;;  %s3318_s27 = smov 0  }
   0x4 LB: > { %s4769_s28 = sadd.s32 4294967295, %s3261_s27   ;;  %s3332_s29 = sadd.s32 1, %s3261_s27   ;;  %s3261_s27 = sphi %s3318_s27, %s4833_s27   ;;  %s3257_s26 = sphi %s3316_s26, %s4832_s26   ;;  %s3253_s25 = sphi %s3314_s25, %s4831_s25   ;;  %s3249_s24 = sphi %s3312_s24, %s4830_s24  }
   0x5   : > { %s25_s30 = ssub.s32 %s3261_s27, %s3332_s29  ;;  %s28_s8 = sadd.s32 1, %s3257_s26 }
   0x6   : > { %p26_p0 = scmp.eq.s32.totalorder %s25_s30, 0  ;;  %p35_p1 = scmp.ne.s32.totalorder %s3257_s26, %s3253_s25 }
   0x7   : > { %p36_p2 = scmp.eq.s32.totalorder %s3261_s27, 0  ;;  %p41_p3 = scmp.ne.s32.totalorder %s3253_s25, %s3249_s24 }
   0x8   : > { %s3342_s9 = scalar_select %p26_p0, %s3257_s26, %s28_s8  }
   0x9   : > { %p3344_p4 = por %p36_p2, %p35_p1  ;;  %p3350_p5 = scmp.eq.s32.totalorder %s4769_s28, 0 }
   0xa   : > { %p2767_p6 = scmp.ge.s32.totalorder %s3261_s27, 1  ;;  %p204_p7 = scmp.lt.s32.totalorder %s3261_s27, 4 }
   0xb   : > { %p3358_p8 = por %p3350_p5, %p41_p3  ;;  %s219_s16 = sshll.u32 %s4763_s2, 4  ;;  %s220_s16 = int_to_ptr.hbm [resolvable:$true] %s219_s16 }
   0xc   : > { %p3362_p9 = pnand %p2767_p6, %p204_p7  ;;  %s3263_s17 = smov [#allocation4]  }
   0xd   : > { %s221_s18 = sshll.u32 %s3263_s17, 4  ;;  %s237_s21 = sshll.u32 %s4766_s5, 4  ;;  %s222_s18 = int_to_ptr.vmem [resolvable:$true] %s221_s18  ;;  %s238_s21 = int_to_ptr.hbm [resolvable:$true] %s237_s21 }
   0xe   : > { %p2984_p10 = pneg %p3362_p9  ;;  %s3264_s22 = smov [#allocation6]  }
   0xf   : > { %s239_s23 = sshll.u32 %s3264_s22, 4  ;;  %p2770_p12 = scmp.ge.s32.totalorder %s3261_s27, 3  ;;  %s240_s23 = int_to_ptr.vmem [resolvable:$true] %s239_s23 }
  0x10   : > { %p2985_p11 = pnand %p2984_p10, %p3350_p5 }
  0x11   : > { %249 = sbr.rel (%p2770_p12) target bundleno = 59 (0x3b), region = 40 }
  0x12   : > { %2987 = dma.hbm_to_vmem [thread:$0]  (!%p2985_p11), %s220_s16, 16, %s222_s18, [#allocation5]  }
  0x13   : > { %2990 = dma.hbm_to_vmem [thread:$0]  (!%p2985_p11), %s238_s21, 32, %s240_s23, [#allocation5]  }
  0x16   : > { %252 = sbr.rel (!%p3344_p4) target bundleno = 59 (0x3b), region = 44  ;;  %s253_s24 = sand.u32 (%p3344_p4), 1, %s3257_s26  }
  0x17   : > { %s2772_s30 = sshll.u32 (%p3344_p4), %s3261_s27, 7  ;;  %s2771_s8 = sshll.u32 (%p3344_p4), %s253_s24, 11 }
  0x18   : > { %s259_s14 = ssub.s32 (%p3344_p4), 313, %s2772_s30  ;;  %s3384_s18 = scalar_lea.sflag (%p3344_p4), [#allocation3], %s253_s24 }
  0x19   : > { %p260_p13 = scmp.lt.s32.totalorder (%p3344_p4), %s259_s14, 128  ;;  %s257_s19 = scalar_lea.vmem (%p3344_p4), [#allocation2], %s2771_s8 }
  0x1b   : > { %s4835_s14 = smov (!%p260_p13, %s259_s14), 128 }
  0x1c   : > { %s2940_s15 = sshll.u32 %s4835_s14, 4 }
  0x1d   : > { %s264_s16 = ssub.s32 2048, %s2940_s15 }
  0x1e   : > { %s265_s17 = sshll.u32 %s264_s16, 4 }
  0x1f   : > { %266 = vsyncadd %s3384_s18, %s265_s17  ;;  %p3387_p0 = scmp.ne.s32.totalorder %s2940_s15, 0  ;;  %s2942_s20 = sshll.u32 %s3261_s27, 11 }
  0x20   : > { %s270_s23 = scalar_lea.hbm %s4761_s0, %s2942_s20  ;;  %s3395_s30 = sshll.u32 %s257_s19, 4  ;;  %s275_s30 = int_to_ptr.vmem [resolvable:$true] %s3395_s30 }
  0x21   : > { %s272_s24 = sshll.u32 %s270_s23, 4  ;;  %s4770_s8 = sshll.u32 %s4835_s14, 8  ;;  %s3398_s24 = int_to_ptr.hbm [resolvable:$true] %s272_s24 }
  0x22   : > { %s3184_s16 = sshra.s32 %s3398_s24, 4  ;;  %s3186_s15 = sshrl.u32 %s4770_s8, 4  ;;  %s3185_s16 = int_to_ptr.hbm [resolvable:$true] %s3184_s16 }
  0x23   : > { %s3191_s17 = scalar_lea.hbm %s3185_s16, %s3186_s15  ;;  %s3195_s19 = scalar_lea.hbm %s4761_s0, 5008 }
  0x24   : > { %p3192_p1 = scmp.ne.s32.totalorder %s3185_s16, %s3191_s17  ;;  %p3196_p4 = scmp.lt.s32.totalorder %s3185_s16, %s4761_s0 }
  0x25   : > { %p3197_p6 = scmp.lt.s32.totalorder %s3195_s19, %s3191_s17 }
  0x26   : > { %p3193_p2 = pnand %p3192_p1, %p3387_p0 }
  0x27   : > { %p3198_p7 = por %p3197_p6, %p3196_p4 }
  0x28   : > { %p3194_p3 = pneg %p3193_p2 }
  0x2a   : > { %p3199_p10 = pnand %p3198_p7, %p3194_p3 }
  0x2c   : > { %3202 = shalt.err (!%p3199_p10)
}
  0x2d   : > { %s3203_s28 = sshra.s32 %s275_s30, 4  ;;  %s3265_s21 = smov [#allocation2]   ;;  %s3204_s28 = int_to_ptr.vmem [resolvable:$true] %s3203_s28 }
  0x2e   : > { %s3210_s8 = scalar_lea.vmem %s3204_s28, %s3186_s15  ;;  %s3214_s20 = scalar_lea.vmem %s3265_s21, 4096 }
  0x2f   : > { %p3211_p11 = scmp.ne.s32.totalorder %s3204_s28, %s3210_s8  ;;  %p3216_p1 = scmp.lt.s32.totalorder %s3214_s20, %s3210_s8 }
  0x31   : > { %p3212_p12 = pnand %p3211_p11, %p3387_p0 }
  0x33   : > { %p3213_p13 = pneg %p3212_p12 }
  0x35   : > { %p3218_p2 = pnand %p3216_p1, %p3213_p13 }
  0x37   : > { %3221 = shalt.err (!%p3218_p2)
}
  0x38   : > { %s3266_s16 = smov 256   ;;  %s3267_s17 = smov 16  }
  0x39   : > { %s4776_s19 = sshll.u32 %s4835_s14, 8 }
  0x3a   : > { %280 = dma.hbm_to_vmem [thread:$0]  (%p3387_p0), %s3398_s24, %s4776_s19, %s275_s30, %s3384_s18, %s3266_s16, %s3266_s16, %s3267_s17  }
  0x3b PF: > { %286 = sbr.rel (%p3362_p9) target bundleno = 1160 (0x488), region = 48 }
  0x40   : > { %s288_s28 = sand.u32 1, %s3253_s25  }
  0x41   : > { %s2781_s8 = sshll.u32 %s288_s28, 11  ;;  %s289_s15 = scalar_lea.sflag [#allocation3], %s288_s28 }
  0x42   : > { %s3427_s22 = scalar_lea.vmem [#allocation2], %s2781_s8 }
  0x43   : > { %3240 = dma.done.wait (%p3358_p8), %s289_s15, 32768  }
  0x44   : > { %3242 = vsyncadd (%p3358_p8), %s289_s15, 4294934528 }
  0x45   : > { %3244 = dma.done.wait (%p3350_p5), [#allocation5], 48  }
  0x46   : > { %3246 = vsyncadd (%p3350_p5), [#allocation5], 4294967248  ;;  %v617_v0 = vld [vmem:[%s4762_s1 + $0x78] sm:$0xff]  ;;  %v616_v1 = vld [vmem:[%s4762_s1 + $0x70] sm:$0xff]  ;;  %vm1582_vm0 = vcmask 64512   ;;  %vm2477_vm1 = vcmask 1041408  }
  0x47   : > { %v633_v2 = vld [vmem:[%s4762_s1 + $0xf8] sm:$0xff]  ;;  %638 = vmatpush.msra.mxu0 %v617_v0  ;;  %v632_v3 = vld [vmem:[%s4762_s1 + $0xf0] sm:$0xff]  ;;  %v615_v4 = vld [vmem:[%s4762_s1 + $0x68] sm:$0xff]  ;;  %2943 = vmatpush.msra.mxu2 %v617_v0  ;;  %s4826_s24 = sadd.s32 4294967295, %s3261_s27   ;;  %vm2662_vm10 = vcmask 1043456  }
  0x48   : > { %1039 = vmatpush.msra.mxu1 %v633_v2  ;;  %v631_v5 = vld [vmem:[%s4762_s1 + $0xe8] sm:$0xff]  ;;  %2959 = vmatpush.msra.mxu3 %v633_v2  ;;  %v614_v6 = vld [vmem:[%s4762_s1 + $0x60] sm:$0xff]  ;;  %v613_v8 = vld [vmem:[%s4762_s1 + $0x58] sm:$0xff]  ;;  %s2784_s12 = sshll.u32 %s4826_s24, 3 }
  0x49   : > { %639 = vmatpush.msra.mxu0 %v616_v1  ;;  %v630_v7 = vld [vmem:[%s4762_s1 + $0xe0] sm:$0xff]  ;;  %2944 = vmatpush.msra.mxu2 %v616_v1  ;;  %v629_v9 = vld [vmem:[%s4762_s1 + $0xd8] sm:$0xff]  ;;  %v612_v10 = vld [vmem:[%s4762_s1 + $0x50] sm:$0xff]  ;;  %p341_p5 = scmp.lt.s32.totalorder %s2784_s12, 23 }
  0x4a   : > { %1040 = vmatpush.msra.mxu1 %v632_v3  ;;  %2960 = vmatpush.msra.mxu3 %v632_v3  ;;  %v628_v11 = vld [vmem:[%s4762_s1 + $0xd0] sm:$0xff]  ;;  %v611_v12 = vld [vmem:[%s4762_s1 + $0x48] sm:$0xff]  ;;  %v610_v14 = vld [vmem:[%s4762_s1 + $0x40] sm:$0xff] }
  0x4b   : > { %640 = vmatpush.msra.mxu0 %v615_v4  ;;  %2945 = vmatpush.msra.mxu2 %v615_v4  ;;  %v627_v13 = vld [vmem:[%s4762_s1 + $0xc8] sm:$0xff]  ;;  %v626_v15 = vld [vmem:[%s4762_s1 + $0xc0] sm:$0xff]  ;;  %v609_v16 = vld [vmem:[%s4762_s1 + $0x38] sm:$0xff]  ;;  %s4837_s12 = smov (!%p341_p5, %s2784_s12), 23 }
  0x4c   : > { %1041 = vmatpush.msra.mxu1 %v631_v5  ;;  %2961 = vmatpush.msra.mxu3 %v631_v5  ;;  %v625_v17 = vld [vmem:[%s4762_s1 + $0xb8] sm:$0xff]  ;;  %v608_v18 = vld [vmem:[%s4762_s1 + $0x30] sm:$0xff]  ;;  %v607_v20 = vld [vmem:[%s4762_s1 + $0x28] sm:$0xff]  ;;  %s2785_s27 = sshll.u32 %s4837_s12, 3 }
  0x4d   : > { %641 = vmatpush.msra.mxu0 %v614_v6  ;;  %2946 = vmatpush.msra.mxu2 %v614_v6  ;;  %v624_v19 = vld [vmem:[%s4762_s1 + $0xb0] sm:$0xff]  ;;  %v623_v21 = vld [vmem:[%s4762_s1 + $0xa8] sm:$0xff]  ;;  %v606_v22 = vld [vmem:[%s4762_s1 + $0x20] sm:$0xff]  ;;  %s4662_s21 = scalar_lea.vmem %s4768_s7, %s2785_s27 }
  0x4e   : > { %1042 = vmatpush.msra.mxu1 %v630_v7  ;;  %2962 = vmatpush.msra.mxu3 %v630_v7  ;;  %v622_v23 = vld [vmem:[%s4762_s1 + $0xa0] sm:$0xff]  ;;  %v605_v24 = vld [vmem:[%s4762_s1 + $0x18] sm:$0xff]  ;;  %v604_v26 = vld [vmem:[%s4762_s1 + $0x10] sm:$0xff] }
  0x4f   : > { %642 = vmatpush.msra.mxu0 %v613_v8  ;;  %2947 = vmatpush.msra.mxu2 %v613_v8  ;;  %v621_v25 = vld [vmem:[%s4762_s1 + $0x98] sm:$0xff]  ;;  %v620_v27 = vld [vmem:[%s4762_s1 + $0x90] sm:$0xff]  ;;  %v603_v28 = vld [vmem:[%s4762_s1 + $0x8] sm:$0xff] }
  0x50   : > { %1043 = vmatpush.msra.mxu1 %v629_v9  ;;  %2963 = vmatpush.msra.mxu3 %v629_v9  ;;  %v619_v29 = vld [vmem:[%s4762_s1 + $0x88] sm:$0xff]  ;;  %v602_v30 = vld [vmem:[%s4762_s1] sm:$0xff]  ;;  %v348_v34 = vld [vmem:[%s3427_s22 + $0x10] sm:$0xff] }
  0x51   : > { %643 = vmatpush.msra.mxu0 %v612_v10  ;;  %2948 = vmatpush.msra.mxu2 %v612_v10  ;;  %v618_v31 = vld [vmem:[%s4762_s1 + $0x80] sm:$0xff]  ;;  %v347_v33 = vld [vmem:[%s3427_s22 + $0x8] sm:$0xff]  ;;  %v349_v35 = vld [vmem:[%s3427_s22 + $0x18] sm:$0xff] }
  0x52   : > { %1044 = vmatpush.msra.mxu1 %v628_v11  ;;  %2964 = vmatpush.msra.mxu3 %v628_v11  ;;  %v346_v32 = vld [vmem:[%s3427_s22] sm:$0xff]  ;;  %v351_v37 = vld [vmem:[%s3427_s22 + $0x28] sm:$0xff]  ;;  %v352_v38 = vld [vmem:[%s3427_s22 + $0x30] sm:$0xff] }
  0x53   : > { %644 = vmatpush.msra.mxu0 %v611_v12  ;;  %2949 = vmatpush.msra.mxu2 %v611_v12  ;;  %v350_v36 = vld [vmem:[%s3427_s22 + $0x20] sm:$0xff]  ;;  %v353_v39 = vld [vmem:[%s3427_s22 + $0x38] sm:$0xff]  ;;  %v355_v41 = vld [vmem:[%s3427_s22 + $0x48] sm:$0xff] }
  0x54   : > { %1045 = vmatpush.msra.mxu1 %v627_v13  ;;  %2965 = vmatpush.msra.mxu3 %v627_v13  ;;  %v354_v40 = vld [vmem:[%s3427_s22 + $0x40] sm:$0xff]  ;;  %v356_v42 = vld [vmem:[%s3427_s22 + $0x50] sm:$0xff]  ;;  %v357_v43 = vld [vmem:[%s3427_s22 + $0x58] sm:$0xff] }
  0x55   : > { %645 = vmatpush.msra.mxu0 %v610_v14  ;;  %2950 = vmatpush.msra.mxu2 %v610_v14  ;;  %v358_v44 = vld [vmem:[%s3427_s22 + $0x60] sm:$0xff]  ;;  %v359_v45 = vld [vmem:[%s3427_s22 + $0x68] sm:$0xff]  ;;  %v360_v46 = vld [vmem:[%s3427_s22 + $0x70] sm:$0xff] }
  0x56   : > { %1046 = vmatpush.msra.mxu1 %v626_v15  ;;  %2966 = vmatpush.msra.mxu3 %v626_v15  ;;  %v361_v47 = vld [vmem:[%s3427_s22 + $0x78] sm:$0xff]  ;;  %v362_v48 = vld [vmem:[%s3427_s22 + $0x80] sm:$0xff]  ;;  %v363_v49 = vld [vmem:[%s3427_s22 + $0x88] sm:$0xff] }
  0x57   : > { %646 = vmatpush.msra.mxu0 %v609_v16  ;;  %2951 = vmatpush.msra.mxu2 %v609_v16  ;;  %v364_v50 = vld [vmem:[%s3427_s22 + $0x90] sm:$0xff]  ;;  %v365_v51 = vld [vmem:[%s3427_s22 + $0x98] sm:$0xff]  ;;  %v366_v52 = vld [vmem:[%s3427_s22 + $0xa0] sm:$0xff] }
  0x58   : > { %1047 = vmatpush.msra.mxu1 %v625_v17  ;;  %2967 = vmatpush.msra.mxu3 %v625_v17  ;;  %v367_v53 = vld [vmem:[%s3427_s22 + $0xa8] sm:$0xff]  ;;  %v368_v54 = vld [vmem:[%s3427_s22 + $0xb0] sm:$0xff]  ;;  %v369_v55 = vld [vmem:[%s3427_s22 + $0xb8] sm:$0xff] }
  0x59   : > { %647 = vmatpush.msra.mxu0 %v608_v18  ;;  %2952 = vmatpush.msra.mxu2 %v608_v18  ;;  %v370_v56 = vld [vmem:[%s3427_s22 + $0xc0] sm:$0xff]  ;;  %v371_v57 = vld [vmem:[%s3427_s22 + $0xc8] sm:$0xff]  ;;  %v372_v58 = vld [vmem:[%s3427_s22 + $0xd0] sm:$0xff] }
  0x5a   : > { %1048 = vmatpush.msra.mxu1 %v624_v19  ;;  %2968 = vmatpush.msra.mxu3 %v624_v19  ;;  %v373_v59 = vld [vmem:[%s3427_s22 + $0xd8] sm:$0xff]  ;;  %v374_v60 = vld [vmem:[%s3427_s22 + $0xe0] sm:$0xff]  ;;  %v375_v61 = vld [vmem:[%s3427_s22 + $0xe8] sm:$0xff] }
  0x5b   : > { %648 = vmatpush.msra.mxu0 %v607_v20  ;;  %2953 = vmatpush.msra.mxu2 %v607_v20  ;;  %v376_v62 = vld [vmem:[%s3427_s22 + $0xf0] sm:$0xff]  ;;  %v377_v63 = vld [vmem:[%s3427_s22 + $0xf8] sm:$0xff]  ;;  %v378_v2 = vld [vmem:[%s3427_s22 + $0x100] sm:$0xff] }
  0x5c   : > { %1049 = vmatpush.msra.mxu1 %v623_v21  ;;  %2969 = vmatpush.msra.mxu3 %v623_v21  ;;  %v379_v3 = vld [vmem:[%s3427_s22 + $0x108] sm:$0xff]  ;;  %v380_v6 = vld [vmem:[%s3427_s22 + $0x110] sm:$0xff]  ;;  %v381_v7 = vld [vmem:[%s3427_s22 + $0x118] sm:$0xff] }
  0x5d   : > { %649 = vmatpush.msra.mxu0 %v606_v22  ;;  %2954 = vmatpush.msra.mxu2 %v606_v22  ;;  %v502_v8 = vld [vmem:[%s3427_s22 + $0x4e0] sm:$0xff]  ;;  %v383_v12 = vld [vmem:[%s3427_s22 + $0x128] sm:$0xff]  ;;  %v504_v13 = vld [vmem:[%s3427_s22 + $0x4f0] sm:$0xff] }
  0x5e   : > { %1050 = vmatpush.msra.mxu1 %v622_v23  ;;  %2970 = vmatpush.msra.mxu3 %v622_v23  ;;  %v382_v11 = vld [vmem:[%s3427_s22 + $0x120] sm:$0xff]  ;;  %v384_v16 = vld [vmem:[%s3427_s22 + $0x130] sm:$0xff]  ;;  %v385_v17 = vld [vmem:[%s3427_s22 + $0x138] sm:$0xff] }
  0x5f   : > { %650 = vmatpush.msra.mxu0 %v605_v24  ;;  %2955 = vmatpush.msra.mxu2 %v605_v24  ;;  %v506_v18 = vld [vmem:[%s3427_s22 + $0x500] sm:$0xff]  ;;  %v387_v22 = vld [vmem:[%s3427_s22 + $0x148] sm:$0xff]  ;;  %v508_v23 = vld [vmem:[%s3427_s22 + $0x510] sm:$0xff] }
  0x60   : > { %1051 = vmatpush.msra.mxu1 %v621_v25  ;;  %2971 = vmatpush.msra.mxu3 %v621_v25  ;;  %v386_v21 = vld [vmem:[%s3427_s22 + $0x140] sm:$0xff] }
  0x61   : > { %651 = vmatpush.msra.mxu0 %v604_v26  ;;  %2956 = vmatpush.msra.mxu2 %v604_v26  ;;  %v388_v26 = vld [vmem:[%s3427_s22 + $0x150] sm:$0xff] }
  0x62   : > { %1052 = vmatpush.msra.mxu1 %v620_v27  ;;  %2972 = vmatpush.msra.mxu3 %v620_v27  ;;  %v389_v27 = vld [vmem:[%s3427_s22 + $0x158] sm:$0xff] }
  0x63   : > { %652 = vmatpush.msra.mxu0 %v603_v28  ;;  %2957 = vmatpush.msra.mxu2 %v603_v28  ;;  %v510_v28 = vld [vmem:[%s3427_s22 + $0x520] sm:$0xff] }
  0x64   : > { %1053 = vmatpush.msra.mxu1 %v619_v29  ;;  %2973 = vmatpush.msra.mxu3 %v619_v29 }
  0x65   : > { %653 = vmatpush.msra.mxu0 %v602_v30  ;;  %2958 = vmatpush.msra.mxu2 %v602_v30 }
  0x66   : > { %1054 = vmatpush.msra.mxu1 %v618_v31  ;;  %654 = vmatmul.f32.vlgmr.msra.gmra.mxu0 %v346_v32  ;;  %v391_v32 = vld [vmem:[%s3427_s22 + $0x168] sm:$0xff] }
  0x67   : > { %1055 = vmatmul.f32.vlgmr.msra.gmra.mxu1 %v347_v33  ;;  %2974 = vmatpush.msra.mxu3 %v618_v31  ;;  %v390_v31 = vld [vmem:[%s3427_s22 + $0x160] sm:$0xff]  ;;  %v512_v33 = vld [vmem:[%s3427_s22 + $0x530] sm:$0xff] }
  0x68   : > { %888 = vmatmul.f32.vlgmr.msra.gmra.mxu2 %v502_v8  ;;  %v524_v8 = vld [vmem:[%s3427_s22 + $0x590] sm:$0xff] }
  0x6e   : > { %657 = vmatmul.f32.gmra.mxu0 %v348_v34 }
  0x6f   : > { %1058 = vmatmul.f32.gmra.mxu1 %v349_v35 }
  0x70   : > { %891 = vmatmul.f32.gmra.mxu2 %v504_v13  ;;  %v404_v13 = vld [vmem:[%s3427_s22 + $0x1d0] sm:$0xff] }
  0x76   : > { %660 = vmatmul.f32.gmra.mxu0 %v350_v36  ;;  %v392_v36 = vld [vmem:[%s3427_s22 + $0x170] sm:$0xff] }
  0x77   : > { %1061 = vmatmul.f32.gmra.mxu1 %v351_v37  ;;  %v393_v37 = vld [vmem:[%s3427_s22 + $0x178] sm:$0xff] }
  0x78   : > { %894 = vmatmul.f32.gmra.mxu2 %v506_v18  ;;  %v526_v18 = vld [vmem:[%s3427_s22 + $0x5a0] sm:$0xff] }
  0x7e   : > { %663 = vmatmul.f32.gmra.mxu0 %v352_v38  ;;  %v514_v38 = vld [vmem:[%s3427_s22 + $0x540] sm:$0xff] }
  0x7f   : > { %1064 = vmatmul.f32.gmra.mxu1 %v353_v39 }
  0x80   : > { %897 = vmatmul.f32.gmra.mxu2 %v508_v23  ;;  %v406_v23 = vld [vmem:[%s3427_s22 + $0x1e0] sm:$0xff] }
  0x86   : > { %666 = vmatmul.f32.gmra.mxu0 %v354_v40 }
  0x87   : > { %1067 = vmatmul.f32.gmra.mxu1 %v355_v41  ;;  %v394_v41 = vld [vmem:[%s3427_s22 + $0x180] sm:$0xff] }
  0x88   : > { %900 = vmatmul.f32.gmra.mxu2 %v510_v28  ;;  %v528_v28 = vld [vmem:[%s3427_s22 + $0x5b0] sm:$0xff] }
  0x8e   : > { %669 = vmatmul.f32.gmra.mxu0 %v356_v42  ;;  %v395_v42 = vld [vmem:[%s3427_s22 + $0x188] sm:$0xff] }
  0x8f   : > { %1070 = vmatmul.f32.gmra.mxu1 %v357_v43  ;;  %v501_v43 = vld [vmem:[%s3427_s22 + $0x4d8] sm:$0xff] }
  0x90   : > { %903 = vmatmul.f32.gmra.mxu2 %v512_v33  ;;  %1286 = vmatmul.f32.vlgmr.msra.gmra.mxu3 %v501_v43 }
  0x96   : > { %672 = vmatmul.f32.gmra.mxu0 %v358_v44  ;;  %v516_v44 = vld [vmem:[%s3427_s22 + $0x550] sm:$0xff] }
  0x97   : > { %1073 = vmatmul.f32.gmra.mxu1 %v359_v45 }
  0x98   : > { %906 = vmatmul.f32.gmra.mxu2 %v514_v38  ;;  %v515_v38 = vld [vmem:[%s3427_s22 + $0x548] sm:$0xff] }
  0x9e   : > { %675 = vmatmul.f32.gmra.mxu0 %v360_v46 }
  0x9f   : > { %1076 = vmatmul.f32.gmra.mxu1 %v361_v47  ;;  %v396_v47 = vld [vmem:[%s3427_s22 + $0x190] sm:$0xff] }
  0xa0   : > { %909 = vmatmul.f32.gmra.mxu2 %v516_v44  ;;  %v530_v44 = vld [vmem:[%s3427_s22 + $0x5c0] sm:$0xff] }
  0xa6   : > { %678 = vmatmul.f32.gmra.mxu0 %v362_v48  ;;  %v397_v48 = vld [vmem:[%s3427_s22 + $0x198] sm:$0xff] }
  0xa7   : > { %1079 = vmatmul.f32.gmra.mxu1 %v363_v49  ;;  %v503_v49 = vld [vmem:[%s3427_s22 + $0x4e8] sm:$0xff] }
  0xa8   : > { %1289 = vmatmul.f32.gmra.mxu3 %v503_v49 }
  0xae   : > { %681 = vmatmul.f32.gmra.mxu0 %v364_v50  ;;  %v518_v50 = vld [vmem:[%s3427_s22 + $0x560] sm:$0xff] }
  0xaf   : > { %1082 = vmatmul.f32.gmra.mxu1 %v365_v51  ;;  %912 = vmatmul.f32.gmra.mxu2 %v518_v50 }
  0xb6   : > { %684 = vmatmul.f32.gmra.mxu0 %v366_v52 }
  0xb7   : > { %1085 = vmatmul.f32.gmra.mxu1 %v367_v53  ;;  %v398_v53 = vld [vmem:[%s3427_s22 + $0x1a0] sm:$0xff] }
  0xbe   : > { %687 = vmatmul.f32.gmra.mxu0 %v368_v54  ;;  %v399_v54 = vld [vmem:[%s3427_s22 + $0x1a8] sm:$0xff] }
  0xbf   : > { %1088 = vmatmul.f32.gmra.mxu1 %v369_v55  ;;  %v505_v55 = vld [vmem:[%s3427_s22 + $0x4f8] sm:$0xff] }
  0xc0   : > { %1292 = vmatmul.f32.gmra.mxu3 %v505_v55  ;;  %v517_v55 = vld [vmem:[%s3427_s22 + $0x558] sm:$0xff] }
  0xc6   : > { %690 = vmatmul.f32.gmra.mxu0 %v370_v56  ;;  %v520_v56 = vld [vmem:[%s3427_s22 + $0x570] sm:$0xff] }
  0xc7   : > { %1091 = vmatmul.f32.gmra.mxu1 %v371_v57  ;;  %915 = vmatmul.f32.gmra.mxu2 %v520_v56 }
  0xce   : > { %693 = vmatmul.f32.gmra.mxu0 %v372_v58 }
  0xcf   : > { %1094 = vmatmul.f32.gmra.mxu1 %v373_v59  ;;  %v400_v59 = vld [vmem:[%s3427_s22 + $0x1b0] sm:$0xff] }
  0xd6   : > { %696 = vmatmul.f32.gmra.mxu0 %v374_v60  ;;  %v401_v60 = vld [vmem:[%s3427_s22 + $0x1b8] sm:$0xff] }
  0xd7   : > { %1097 = vmatmul.f32.gmra.mxu1 %v375_v61  ;;  %v507_v61 = vld [vmem:[%s3427_s22 + $0x508] sm:$0xff] }
  0xd8   : > { %1295 = vmatmul.f32.gmra.mxu3 %v507_v61  ;;  %v411_v61 = vld [vmem:[%s3427_s22 + $0x208] sm:$0xff] }
  0xde   : > { %699 = vmatmul.f32.gmra.mxu0 %v376_v62  ;;  %v522_v62 = vld [vmem:[%s3427_s22 + $0x580] sm:$0xff] }
  0xdf   : > { %1100 = vmatmul.f32.gmra.mxu1 %v377_v63  ;;  %918 = vmatmul.f32.gmra.mxu2 %v522_v62  ;;  %v532_v62 = vld [vmem:[%s3427_s22 + $0x5d0] sm:$0xff] }
  0xe3   : > { %v3565_v0 = vpop.f32.mrf.mxu0 }
  0xe4   : > { %v3567_v1 = vpop.f32.mrf.mxu1 }
  0xe6   : > { %702 = vmatmul.f32.gmra.mxu0 %v378_v2 }
  0xe7   : > { %1103 = vmatmul.f32.gmra.mxu1 %v379_v3  ;;  %v402_v3 = vld [vmem:[%s3427_s22 + $0x1c0] sm:$0xff]  ;;  %921 = vmatmul.f32.gmra.mxu2 %v524_v8 }
  0xeb   : > { %v3571_v4 = vpop.f32.mrf.mxu0 }
  0xec   : > { %v3573_v5 = vpop.f32.mrf.mxu1 }
  0xee   : > { %705 = vmatmul.f32.gmra.mxu0 %v380_v6  ;;  %v403_v6 = vld [vmem:[%s3427_s22 + $0x1c8] sm:$0xff] }
  0xef   : > { %1106 = vmatmul.f32.gmra.mxu1 %v381_v7  ;;  %v509_v7 = vld [vmem:[%s3427_s22 + $0x518] sm:$0xff]  ;;  %924 = vmatmul.f32.gmra.mxu2 %v526_v18 }
  0xf0   : > { %1298 = vmatmul.f32.gmra.mxu3 %v509_v7 }
  0xf3   : > { %v3578_v9 = vpop.f32.mrf.mxu0 }
  0xf4   : > { %v3580_v10 = vpop.f32.mrf.mxu1 }
  0xf6   : > { %708 = vmatmul.f32.gmra.mxu0 %v382_v11 }
  0xf7   : > { %1109 = vmatmul.f32.gmra.mxu1 %v383_v12  ;;  %927 = vmatmul.f32.gmra.mxu2 %v528_v28 }
  0xfb   : > { %v3585_v14 = vpop.f32.mrf.mxu0 }
  0xfc   : > { %v3587_v15 = vpop.f32.mrf.mxu1 }
  0xfe   : > { %711 = vmatmul.f32.gmra.mxu0 %v384_v16  ;;  %v405_v16 = vld [vmem:[%s3427_s22 + $0x1d8] sm:$0xff] }
  0xff   : > { %1112 = vmatmul.f32.gmra.mxu1 %v385_v17  ;;  %v511_v17 = vld [vmem:[%s3427_s22 + $0x528] sm:$0xff]  ;;  %930 = vmatmul.f32.gmra.mxu2 %v530_v44 }
 0x100   : > { %1301 = vmatmul.f32.gmra.mxu3 %v511_v17 }
 0x103   : > { %v3592_v19 = vpop.f32.mrf.mxu0 }
 0x104   : > { %v3594_v20 = vpop.f32.mrf.mxu1 }
 0x106   : > { %714 = vmatmul.f32.gmra.mxu0 %v386_v21 }
 0x107   : > { %1115 = vmatmul.f32.gmra.mxu1 %v387_v22  ;;  %933 = vmatmul.f32.gmra.mxu2 %v532_v62 }
 0x10b   : > { %v3599_v24 = vpop.f32.mrf.mxu0 }
 0x10c   : > { %v3601_v25 = vpop.f32.mrf.mxu1 }
 0x10e   : > { %717 = vmatmul.f32.gmra.mxu0 %v388_v26  ;;  %v407_v26 = vld [vmem:[%s3427_s22 + $0x1e8] sm:$0xff] }
 0x10f   : > { %1118 = vmatmul.f32.gmra.mxu1 %v389_v27  ;;  %v513_v27 = vld [vmem:[%s3427_s22 + $0x538] sm:$0xff] }
 0x110   : > { %1304 = vmatmul.f32.gmra.mxu3 %v513_v27 }
 0x113   : > { %v3606_v29 = vpop.f32.mrf.mxu0 }
 0x114   : > { %v3608_v30 = vpop.f32.mrf.mxu1 }
 0x116   : > { %720 = vmatmul.f32.gmra.mxu0 %v390_v31  ;;  %v3666_v31 = vld [vmem:[#allocation4] ss:$0 sm:$0xff] }
 0x117   : > { %1121 = vmatmul.f32.gmra.mxu1 %v391_v32 }
 0x118   : > { %1307 = vmatmul.f32.gmra.mxu3 %v515_v38  ;;  %v416_v38 = vld [vmem:[%s3427_s22 + $0x230] sm:$0xff] }
 0x11b   : > { %v3613_v34 = vpop.f32.mrf.mxu0 }
 0x11c   : > { %v3615_v35 = vpop.f32.mrf.mxu1 }
 0x11e   : > { %723 = vmatmul.f32.gmra.mxu0 %v392_v36  ;;  %v408_v36 = vld [vmem:[%s3427_s22 + $0x1f0] sm:$0xff] }
 0x11f   : > { %1124 = vmatmul.f32.gmra.mxu1 %v393_v37  ;;  %v409_v37 = vld [vmem:[%s3427_s22 + $0x1f8] sm:$0xff] }
 0x120   : > { %1310 = vmatmul.f32.gmra.mxu3 %v517_v55  ;;  %v525_v55 = vld [vmem:[%s3427_s22 + $0x598] sm:$0xff] }
 0x123   : > { %v3620_v39 = vpop.f32.mrf.mxu0 }
 0x124   : > { %v3622_v40 = vpop.f32.mrf.mxu1  ;;  %v680_v27 = vadd.f32 %v3666_v31, %v3620_v39 }
 0x126   : > { %726 = vmatmul.f32.gmra.mxu0 %v394_v41  ;;  %v1081_v39 = vadd.f32 %v3622_v40, %v680_v27  ;;  %v538_v40 = vld [vmem:[%s3427_s22 + $0x600] sm:$0xff] }
 0x127   : > { %1127 = vmatmul.f32.gmra.mxu1 %v395_v42 }
 0x128   : > { %v1448_v44 = vmax.f32 %v1081_v39, 0.0 }
 0x12b   : > { %v3628_v45 = vpop.f32.mrf.mxu0 }
 0x12c   : > { %v3630_v46 = vpop.f32.mrf.mxu1  ;;  %v683_v18 = vadd.f32 %v3666_v31, %v3628_v45  ;;  %v415_v45 = vld [vmem:[%s3427_s22 + $0x228] sm:$0xff] }
 0x12e   : > { %729 = vmatmul.f32.gmra.mxu0 %v396_v47  ;;  %v1084_v28 = vadd.f32 %v3630_v46, %v683_v18  ;;  %v529_v18 = vld [vmem:[%s3427_s22 + $0x5b8] sm:$0xff] }
 0x12f   : > { %1130 = vmatmul.f32.gmra.mxu1 %v397_v48 }
 0x133   : > { %v3636_v51 = vpop.f32.mrf.mxu0 }
 0x134   : > { %v3638_v52 = vpop.f32.mrf.mxu1 }
 0x136   : > { %732 = vmatmul.f32.gmra.mxu0 %v398_v53 }
 0x137   : > { %1133 = vmatmul.f32.gmra.mxu1 %v399_v54  ;;  %v410_v54 = vld [vmem:[%s3427_s22 + $0x200] sm:$0xff] }
 0x13b   : > { %v3644_v57 = vpop.f32.mrf.mxu0 }
 0x13c   : > { %v3646_v58 = vpop.f32.mrf.mxu1 }
 0x13e   : > { %735 = vmatmul.f32.gmra.mxu0 %v400_v59 }
 0x13f   : > { %1136 = vmatmul.f32.gmra.mxu1 %v401_v60 }
 0x143   : > { %v691_v63 = vpop.f32.mrf.mxu0 }
 0x144   : > { %v3652_v2 = vpop.f32.mrf.mxu1  ;;  %v692_v56 = vadd.f32 %v3666_v31, %v691_v63 }
 0x146   : > { %738 = vmatmul.f32.gmra.mxu0 %v402_v3  ;;  %v689_v3 = vadd.f32 %v3666_v31, %v3644_v57  ;;  %v413_v57 = vld [vmem:[%s3427_s22 + $0x218] sm:$0xff] }
 0x147   : > { %1139 = vmatmul.f32.gmra.mxu1 %v403_v6  ;;  %v1093_v6 = vadd.f32 %v3652_v2, %v692_v56  ;;  %v534_v2 = vld [vmem:[%s3427_s22 + $0x5e0] sm:$0xff]  ;;  %v668_v56 = vadd.f32 %v3666_v31, %v3592_v19 }
 0x148   : > { %936 = vmatmul.f32.gmra.mxu2 %v534_v2  ;;  %v422_v2 = vld [vmem:[%s3427_s22 + $0x260] sm:$0xff] }
 0x149   : > { %v1452_v17 = vmax.f32 %v1093_v6, 0.0  ;;  %v1069_v19 = vadd.f32 %v3594_v20, %v668_v56  ;;  %v420_v6 = vld [vmem:[%s3427_s22 + $0x250] sm:$0xff]  ;;  %v542_v20 = vld [vmem:[%s3427_s22 + $0x620] sm:$0xff] }
 0x14b   : > { %v694_v11 = vpop.f32.mrf.mxu0 }
 0x14c   : > { %v1095_v12 = vpop.f32.mrf.mxu1  ;;  %v695_v47 = vadd.f32 %v3666_v31, %v694_v11  ;;  %v412_v11 = vld [vmem:[%s3427_s22 + $0x210] sm:$0xff] }
 0x14e   : > { %741 = vmatmul.f32.gmra.mxu0 %v404_v13  ;;  %v1096_v59 = vadd.f32 %v1095_v12, %v695_v47  ;;  %v519_v12 = vld [vmem:[%s3427_s22 + $0x568] sm:$0xff]  ;;  %v686_v13 = vadd.f32 %v3666_v31, %v3636_v51  ;;  %v671_v47 = vadd.f32 %v3666_v31, %v3599_v24 }
 0x14f   : > { %1142 = vmatmul.f32.gmra.mxu1 %v405_v16  ;;  %v1090_v16 = vadd.f32 %v3646_v58, %v689_v3  ;;  %1313 = vmatmul.f32.gmra.mxu3 %v519_v12  ;;  %v419_v24 = vld [vmem:[%s3427_s22 + $0x248] sm:$0xff] }
 0x150   : > { %v1453_v63 = vmax.f32 %v1096_v59, 0.0  ;;  %v1087_v51 = vadd.f32 %v3638_v52, %v686_v13  ;;  %v536_v52 = vld [vmem:[%s3427_s22 + $0x5f0] sm:$0xff]  ;;  %v1072_v59 = vadd.f32 %v3601_v25, %v671_v47  ;;  %v1444_v13 = vmax.f32 %v1069_v19, 0.0  ;;  %v535_v47 = vld [vmem:[%s3427_s22 + $0x5e8] sm:$0xff] }
 0x151   : > { %939 = vmatmul.f32.gmra.mxu2 %v536_v52  ;;  %v425_v52 = vld [vmem:[%s3427_s22 + $0x278] sm:$0xff]  ;;  %v431_v19 = vld [vmem:[%s3427_s22 + $0x2a8] sm:$0xff] }
 0x152   : > { %v1445_v62 = vmax.f32 %v1072_v59, 0.0 }
 0x153   : > { %v697_v21 = vpop.f32.mrf.mxu0 }
 0x154   : > { %v1098_v22 = vpop.f32.mrf.mxu1  ;;  %v698_v41 = vadd.f32 %v3666_v31, %v697_v21  ;;  %v1451_v21 = vmax.f32 %v1090_v16, 0.0  ;;  %v659_v16 = vadd.f32 %v3666_v31, %v3571_v4  ;;  %v423_v4 = vld [vmem:[%s3427_s22 + $0x268] sm:$0xff] }
 0x156   : > { %744 = vmatmul.f32.gmra.mxu0 %v406_v23  ;;  %v1099_v48 = vadd.f32 %v1098_v22, %v698_v41  ;;  %v414_v23 = vld [vmem:[%s3427_s22 + $0x220] sm:$0xff]  ;;  %v523_v41 = vld [vmem:[%s3427_s22 + $0x588] sm:$0xff] }
 0x157   : > { %1145 = vmatmul.f32.gmra.mxu1 %v407_v26  ;;  %v521_v26 = vld [vmem:[%s3427_s22 + $0x578] sm:$0xff] }
 0x158   : > { %v1454_v60 = vmax.f32 %v1099_v48, 0.0  ;;  %1316 = vmatmul.f32.gmra.mxu3 %v521_v26 }
 0x159   : > { %942 = vmatmul.f32.gmra.mxu2 %v538_v40  ;;  %v428_v40 = vld [vmem:[%s3427_s22 + $0x290] sm:$0xff] }
 0x15b   : > { %v700_v32 = vpop.f32.mrf.mxu0 }
 0x15c   : > { %v1101_v33 = vpop.f32.mrf.mxu1  ;;  %v701_v42 = vadd.f32 %v3666_v31, %v700_v32  ;;  %v1450_v32 = vmax.f32 %v1087_v51, 0.0  ;;  %v656_v51 = vadd.f32 %v3666_v31, %v3565_v0 }
 0x15e   : > { %v1102_v43 = vadd.f32 %v1101_v33, %v701_v42  ;;  %747 = vmatmul.f32.gmra.mxu0 %v408_v36  ;;  %v677_v33 = vadd.f32 %v3666_v31, %v3613_v34  ;;  %v1449_v36 = vmax.f32 %v1084_v28, 0.0  ;;  %v674_v42 = vadd.f32 %v3666_v31, %v3606_v29  ;;  %v417_v34 = vld [vmem:[%s3427_s22 + $0x238] sm:$0xff]  ;;  %v424_v28 = vld [vmem:[%s3427_s22 + $0x270] sm:$0xff] }
 0x15f   : > { %1148 = vmatmul.f32.gmra.mxu1 %v409_v37  ;;  %v1057_v26 = vadd.f32 %v3567_v1, %v656_v51  ;;  %v546_v1 = vld [vmem:[%s3427_s22 + $0x640] sm:$0xff] }
 0x160   : > { %v1455_v49 = vmax.f32 %v1102_v43, 0.0  ;;  %v1078_v43 = vadd.f32 %v3615_v35, %v677_v33  ;;  %1319 = vmatmul.f32.gmra.mxu3 %v523_v41  ;;  %v1075_v29 = vadd.f32 %v3608_v30, %v674_v42  ;;  %v540_v30 = vld [vmem:[%s3427_s22 + $0x610] sm:$0xff]  ;;  %v427_v41 = vld [vmem:[%s3427_s22 + $0x288] sm:$0xff] }
 0x161   : > { %945 = vmatmul.f32.gmra.mxu2 %v540_v30  ;;  %v548_v42 = vld [vmem:[%s3427_s22 + $0x650] sm:$0xff]  ;;  %v430_v30 = vld [vmem:[%s3427_s22 + $0x2a0] sm:$0xff] }
 0x162   : > { %2786 = vmatpush.xpose.msk.msrb.mxu2 %vm1582_vm0, %v1455_v49  ;;  %v1447_v48 = vmax.f32 %v1078_v43, 0.0  ;;  %v3801_v43 = vpop.f32.mrf.mxu3 }
 0x163   : > { %v3676_v50 = vpop.f32.mrf.mxu0 }
 0x164   : > { %v3678_v53 = vpop.f32.mrf.mxu1 }
 0x166   : > { %750 = vmatmul.f32.gmra.mxu0 %v410_v54  ;;  %2787 = vmatpush.xpose.msk.msrb.mxu2 %vm1582_vm0, %v1454_v60  ;;  %v418_v54 = vld [vmem:[%s3427_s22 + $0x240] sm:$0xff]  ;;  %v1446_v60 = vmax.f32 %v1075_v29, 0.0  ;;  %v429_v29 = vld [vmem:[%s3427_s22 + $0x298] sm:$0xff] }
 0x167   : > { %1151 = vmatmul.f32.gmra.mxu1 %v411_v61  ;;  %v665_v61 = vadd.f32 %v3666_v31, %v3585_v14  ;;  %v421_v14 = vld [vmem:[%s3427_s22 + $0x258] sm:$0xff] }
 0x168   : > { %1322 = vmatmul.f32.gmra.mxu3 %v525_v55  ;;  %v550_v55 = vld [vmem:[%s3427_s22 + $0x660] sm:$0xff] }
 0x169   : > { %v1066_v12 = vadd.f32 %v3587_v15, %v665_v61  ;;  %948 = vmatmul.f32.gmra.mxu2 %v542_v20  ;;  %v537_v61 = vld [vmem:[%s3427_s22 + $0x5f8] sm:$0xff]  ;;  %v432_v20 = vld [vmem:[%s3427_s22 + $0x2b0] sm:$0xff] }
 0x16a   : > { %2788 = vmatpush.xpose.msk.msrb.mxu2 %vm1582_vm0, %v1453_v63  ;;  %v527_v63 = vld [vmem:[%s3427_s22 + $0x5a8] sm:$0xff]  ;;  %v1290_v56 = vpop.f32.mrf.mxu3 }
 0x16b   : > { %v3690_v7 = vpop.f32.mrf.mxu0 }
 0x16c   : > { %v3692_v8 = vpop.f32.mrf.mxu1 }
 0x16e   : > { %753 = vmatmul.f32.gmra.mxu0 %v412_v11  ;;  %2789 = vmatpush.xpose.msk.msrb.mxu2 %vm1582_vm0, %v1452_v17  ;;  %v662_v11 = vadd.f32 %v3666_v31, %v3578_v9  ;;  %v1443_v17 = vmax.f32 %v1066_v12, 0.0 }
 0x16f   : > { %1154 = vmatmul.f32.gmra.mxu1 %v413_v57 }
 0x170   : > { %1325 = vmatmul.f32.gmra.mxu3 %v527_v63  ;;  %v1063_v9 = vadd.f32 %v3580_v10, %v662_v11  ;;  %v544_v10 = vld [vmem:[%s3427_s22 + $0x630] sm:$0xff] }
 0x171   : > { %951 = vmatmul.f32.gmra.mxu2 %v544_v10  ;;  %v552_v63 = vld [vmem:[%s3427_s22 + $0x670] sm:$0xff]  ;;  %v434_v10 = vld [vmem:[%s3427_s22 + $0x2c0] sm:$0xff] }
 0x172   : > { %2790 = vmatpush.xpose.msk.msrb.mxu2 %vm1582_vm0, %v1451_v21  ;;  %v1060_v21 = vadd.f32 %v3573_v5, %v659_v16  ;;  %v1293_v11 = vpop.f32.mrf.mxu3  ;;  %v539_v16 = vld [vmem:[%s3427_s22 + $0x608] sm:$0xff] }
 0x173   : > { %v3706_v58 = vpop.f32.mrf.mxu0 }
 0x174   : > { %v3708_v22 = vpop.f32.mrf.mxu1  ;;  %v1441_v27 = vmax.f32 %v1060_v21, 0.0 }
 0x176   : > { %756 = vmatmul.f32.gmra.mxu0 %v414_v23  ;;  %2791 = vmatpush.xpose.msk.msrb.mxu2 %vm1582_vm0, %v1450_v32  ;;  %v1442_v23 = vmax.f32 %v1063_v9, 0.0  ;;  %v531_v32 = vld [vmem:[%s3427_s22 + $0x5c8] sm:$0xff]  ;;  %v433_v9 = vld [vmem:[%s3427_s22 + $0x2b8] sm:$0xff] }
 0x177   : > { %1157 = vmatmul.f32.gmra.mxu1 %v415_v45  ;;  %v1440_v45 = vmax.f32 %v1057_v26, 0.0  ;;  %v541_v26 = vld [vmem:[%s3427_s22 + $0x618] sm:$0xff] }
 0x178   : > { %1328 = vmatmul.f32.gmra.mxu3 %v529_v18  ;;  %v554_v18 = vld [vmem:[%s3427_s22 + $0x680] sm:$0xff] }
 0x179   : > { %954 = vmatmul.f32.gmra.mxu2 %v546_v1 }
 0x17a   : > { %2792 = vmatpush.xpose.msk.msrb.mxu2 %vm1582_vm0, %v1449_v36  ;;  %v426_v36 = vld [vmem:[%s3427_s22 + $0x280] sm:$0xff]  ;;  %v1296_v51 = vpop.f32.mrf.mxu3 }
 0x17b   : > { %v3722_v46 = vpop.f32.mrf.mxu0 }
 0x17c   : > { %v3724_v37 = vpop.f32.mrf.mxu1 }
 0x17e   : > { %759 = vmatmul.f32.gmra.mxu0 %v416_v38  ;;  %2793 = vmatpush.xpose.msk.msrb.mxu2 %vm1582_vm0, %v1448_v44  ;;  %v533_v38 = vld [vmem:[%s3427_s22 + $0x5d8] sm:$0xff] }
 0x17f   : > { %1160 = vmatmul.f32.gmra.mxu1 %v417_v34 }
 0x180   : > { %1331 = vmatmul.f32.gmra.mxu3 %v531_v32 }
 0x181   : > { %957 = vmatmul.f32.gmra.mxu2 %v548_v42  ;;  %v543_v42 = vld [vmem:[%s3427_s22 + $0x628] sm:$0xff] }
 0x182   : > { %2794 = vmatpush.xpose.msk.msrb.mxu2 %vm1582_vm0, %v1447_v48  ;;  %v889_v48 = vpop.f32.mrf.mxu2 }
 0x183   : > { %v3738_v35 = vpop.f32.mrf.mxu0 }
 0x184   : > { %v3740_v49 = vpop.f32.mrf.mxu1 }
 0x186   : > { %762 = vmatmul.f32.gmra.mxu0 %v418_v54  ;;  %2795 = vmatpush.xpose.msk.msrb.mxu2 %vm1582_vm0, %v1446_v60  ;;  %v890_v54 = vadd.f32 %v3666_v31, %v889_v48  ;;  %v558_v48 = vld [vmem:[%s3427_s22 + $0x6a0] sm:$0xff] }
 0x187   : > { %1163 = vmatmul.f32.gmra.mxu1 %v419_v24 }
 0x188   : > { %1334 = vmatmul.f32.gmra.mxu3 %v533_v38  ;;  %v3812_v59 = vadd.f32 %v1290_v56, %v890_v54 }
 0x189   : > { %960 = vmatmul.f32.gmra.mxu2 %v550_v55 }
 0x18a   : > { %2796 = vmatpush.xpose.msk.msrb.mxu2 %vm1582_vm0, %v1445_v62  ;;  %v892_v62 = vpop.f32.mrf.mxu2 }
 0x18b   : > { %v3754_v25 = vpop.f32.mrf.mxu0 }
 0x18c   : > { %v3756_v3 = vpop.f32.mrf.mxu1 }
 0x18e   : > { %765 = vmatmul.f32.gmra.mxu0 %v420_v6  ;;  %2797 = vmatpush.xpose.msk.msrb.mxu2 %vm1582_vm0, %v1444_v13  ;;  %v893_v6 = vadd.f32 %v3666_v31, %v892_v62  ;;  %v439_v62 = vld [vmem:[%s3427_s22 + $0x2e8] sm:$0xff] }
 0x18f   : > { %1166 = vmatmul.f32.gmra.mxu1 %v421_v14 }
 0x190   : > { %1337 = vmatmul.f32.gmra.mxu3 %v535_v47  ;;  %v3823_v12 = vadd.f32 %v1293_v11, %v893_v6  ;;  %v560_v11 = vld [vmem:[%s3427_s22 + $0x6b0] sm:$0xff] }
 0x191   : > { %963 = vmatmul.f32.gmra.mxu2 %v552_v63 }
 0x192   : > { %2798 = vmatpush.xpose.msk.msrb.mxu2 %vm1582_vm0, %v1443_v17  ;;  %v895_v17 = vpop.f32.mrf.mxu2 }
 0x193   : > { %v3770_v15 = vpop.f32.mrf.mxu0 }
 0x194   : > { %v3772_v57 = vpop.f32.mrf.mxu1 }
 0x196   : > { %768 = vmatmul.f32.gmra.mxu0 %v422_v2  ;;  %2799 = vmatpush.xpose.msk.msrb.mxu2 %vm1582_vm0, %v1442_v23  ;;  %v896_v2 = vadd.f32 %v3666_v31, %v895_v17 }
 0x197   : > { %1169 = vmatmul.f32.gmra.mxu1 %v423_v4 }
 0x198   : > { %1340 = vmatmul.f32.gmra.mxu3 %v537_v61  ;;  %v3834_v21 = vadd.f32 %v1296_v51, %v896_v2  ;;  %v438_v61 = vld [vmem:[%s3427_s22 + $0x2e0] sm:$0xff]  ;;  %v440_v2 = vld [vmem:[%s3427_s22 + $0x2f0] sm:$0xff] }
 0x199   : > { %966 = vmatmul.f32.gmra.mxu2 %v554_v18  ;;  %v547_v18 = vld [vmem:[%s3427_s22 + $0x648] sm:$0xff] }
 0x19a   : > { %2800 = vmatpush.xpose.msk.msrb.mxu2 %vm1582_vm0, %v1441_v27  ;;  %4777 = vst [vmem:[#allocation9_spill] sm:$0xff] %v3834_v21  ;;  %v435_v27 = vld [vmem:[%s3427_s22 + $0x2c8] sm:$0xff]  ;;  %v474_v21 = vld [vmem:[%s3427_s22 + $0x400] sm:$0xff] }
 0x19b   : > { %v3784_v0 = vpop.f32.mrf.mxu0 }
 0x19c   : > { %v3786_v5 = vpop.f32.mrf.mxu1 }
 0x19e   : > { %771 = vmatmul.f32.gmra.mxu0 %v424_v28  ;;  %2801 = vmatpush.xpose.msk.msrb.mxu2 %vm1582_vm0, %v1440_v45  ;;  %v898_v28 = vpop.f32.mrf.mxu2  ;;  %v556_v45 = vld [vmem:[%s3427_s22 + $0x690] sm:$0xff] }
 0x19f   : > { %1172 = vmatmul.f32.gmra.mxu1 %v425_v52  ;;  %v899_v32 = vadd.f32 %v3666_v31, %v898_v28  ;;  %v1299_v52 = vpop.f32.mrf.mxu3 }
 0x1a0   : > { %1343 = vmatmul.f32.gmra.mxu3 %v539_v16 }
 0x1a1   : > { %969 = vmatmul.f32.gmra.mxu2 %v556_v45  ;;  %v3845_v1 = vadd.f32 %v1299_v52, %v899_v32  ;;  %v562_v45 = vld [vmem:[%s3427_s22 + $0x6c0] sm:$0xff] }
 0x1a3   : > { %v3793_v33 = vpop.f32.mrf.mxu0 }
 0x1a4   : > { %v3795_v39 = vpop.f32.mrf.mxu1 }
 0x1a6   : > { %774 = vmatmul.f32.gmra.mxu0 %v426_v36  ;;  %v901_v47 = vpop.f32.mrf.mxu2 }
 0x1a7   : > { %1175 = vmatmul.f32.gmra.mxu1 %v427_v41  ;;  %v436_v41 = vld [vmem:[%s3427_s22 + $0x2d0] sm:$0xff]  ;;  %v1302_v54 = vpop.f32.mrf.mxu3 }
 0x1a8   : > { %1346 = vmatmul.f32.gmra.mxu3 %v541_v26  ;;  %v441_v26 = vld [vmem:[%s3427_s22 + $0x2f8] sm:$0xff] }
 0x1a9   : > { %972 = vmatmul.f32.gmra.mxu2 %v558_v48  ;;  %v442_v48 = vld [vmem:[%s3427_s22 + $0x300] sm:$0xff] }
 0x1ab   : > { %v3803_v44 = vpop.f32.mrf.mxu0 }
 0x1ac   : > { %v3805_v34 = vpop.f32.mrf.mxu1 }
 0x1ae   : > { %777 = vmatmul.f32.gmra.mxu0 %v428_v40  ;;  %v437_v40 = vld [vmem:[%s3427_s22 + $0x2d8] sm:$0xff]  ;;  %v904_v6 = vpop.f32.mrf.mxu2 }
 0x1af   : > { %1178 = vmatmul.f32.gmra.mxu1 %v429_v29  ;;  %v902_v29 = vadd.f32 %v3666_v31, %v901_v47  ;;  %v905_v63 = vadd.f32 %v3666_v31, %v904_v6  ;;  %v443_v6 = vld [vmem:[%s3427_s22 + $0x308] sm:$0xff] }
 0x1b0   : > { %1349 = vmatmul.f32.gmra.mxu3 %v543_v42 }
 0x1b1   : > { %v3852_v55 = vadd.f32 %v1302_v54, %v902_v29  ;;  %975 = vmatmul.f32.gmra.mxu2 %v560_v11  ;;  %v549_v54 = vld [vmem:[%s3427_s22 + $0x658] sm:$0xff] }
 0x1b3   : > { %v3814_v60 = vpop.f32.mrf.mxu0 }
 0x1b4   : > { %v3816_v24 = vpop.f32.mrf.mxu1 }
 0x1b6   : > { %780 = vmatmul.f32.gmra.mxu0 %v430_v30 }
 0x1b7   : > { %1181 = vmatmul.f32.gmra.mxu1 %v431_v19  ;;  %v545_v19 = vld [vmem:[%s3427_s22 + $0x638] sm:$0xff] }
 0x1b8   : > { %1352 = vmatmul.f32.gmra.mxu3 %v545_v19 }
 0x1bb   : > { %v3825_v13 = vpop.f32.mrf.mxu0 }
 0x1bc   : > { %v3827_v14 = vpop.f32.mrf.mxu1 }
 0x1be   : > { %783 = vmatmul.f32.gmra.mxu0 %v432_v20  ;;  %v1305_v20 = vpop.f32.mrf.mxu3 }
 0x1bf   : > { %1184 = vmatmul.f32.gmra.mxu1 %v433_v9  ;;  %v3859_v16 = vadd.f32 %v1305_v20, %v905_v63  ;;  %v564_v63 = vld [vmem:[%s3427_s22 + $0x6d0] sm:$0xff] }
 0x1c0   : > { %1355 = vmatmul.f32.gmra.mxu3 %v547_v18  ;;  %v551_v18 = vld [vmem:[%s3427_s22 + $0x668] sm:$0xff] }
 0x1c3   : > { %v3836_v23 = vpop.f32.mrf.mxu0 }
 0x1c4   : > { %v3838_v4 = vpop.f32.mrf.mxu1 }
 0x1c6   : > { %786 = vmatmul.f32.gmra.mxu0 %v434_v10  ;;  %v1308_v52 = vpop.f32.mrf.mxu3 }
 0x1c7   : > { %1187 = vmatmul.f32.gmra.mxu1 %v435_v27  ;;  %v907_v27 = vpop.f32.mrf.mxu2  ;;  %978 = vmatmul.f32.gmra.mxu2 %v562_v45 }
 0x1c8   : > { %v908_v28 = vadd.f32 %v3666_v31, %v907_v27  ;;  %1358 = vmatmul.f32.gmra.mxu3 %v549_v54  ;;  %v728_v54 = vadd.f32 %v3666_v31, %v3793_v33 }
 0x1ca   : > { %v3869_v47 = vadd.f32 %v1308_v52, %v908_v28 }
 0x1cb   : > { %v742_v36 = vpop.f32.mrf.mxu0 }
 0x1cc   : > { %v1143_v38 = vpop.f32.mrf.mxu1 }
 0x1ce   : > { %789 = vmatmul.f32.gmra.mxu0 %v436_v41  ;;  %v743_v41 = vadd.f32 %v3666_v31, %v742_v36  ;;  %v1311_v11 = vpop.f32.mrf.mxu3 }
 0x1cf   : > { %1190 = vmatmul.f32.gmra.mxu1 %v437_v40  ;;  %v910_v36 = vpop.f32.mrf.mxu2  ;;  %981 = vmatmul.f32.gmra.mxu2 %v564_v63 }
 0x1d0   : > { %1361 = vmatmul.f32.gmra.mxu3 %v551_v18 }
 0x1d3   : > { %v745_v56 = vpop.f32.mrf.mxu0 }
 0x1d4   : > { %v1146_v30 = vpop.f32.mrf.mxu1  ;;  %v746_v51 = vadd.f32 %v3666_v31, %v745_v56  ;;  %v740_v56 = vadd.f32 %v3666_v31, %v3836_v23  ;;  %v737_v23 = vadd.f32 %v3666_v31, %v3825_v13  ;;  %v445_v13 = vld [vmem:[%s3427_s22 + $0x318] sm:$0xff] }
 0x1d6   : > { %792 = vmatmul.f32.gmra.mxu0 %v438_v61  ;;  %v1147_v42 = vadd.f32 %v1146_v30, %v746_v51  ;;  %v1144_v61 = vadd.f32 %v1143_v38, %v743_v41  ;;  %v911_v30 = vadd.f32 %v3666_v31, %v910_v36  ;;  %v1141_v38 = vadd.f32 %v3838_v4, %v740_v56  ;;  %v568_v36 = vld [vmem:[%s3427_s22 + $0x6f0] sm:$0xff] }
 0x1d7   : > { %1193 = vmatmul.f32.gmra.mxu1 %v439_v62  ;;  %v734_v51 = vadd.f32 %v3666_v31, %v3814_v60  ;;  %v913_v4 = vpop.f32.mrf.mxu2  ;;  %v1314_v60 = vpop.f32.mrf.mxu3 }
 0x1d8   : > { %v1470_v19 = vmax.f32 %v1147_v42, 0.0  ;;  %v1469_v20 = vmax.f32 %v1144_v61, 0.0  ;;  %v914_v28 = vadd.f32 %v3666_v31, %v913_v4 }
 0x1d9   : > { %v1135_v45 = vadd.f32 %v3816_v24, %v734_v51 }
 0x1da   : > { %v3906_v41 = vadd.f32 %v1314_v60, %v914_v28 }
 0x1db   : > { %v748_v9 = vpop.f32.mrf.mxu0  ;;  %v1466_v61 = vmax.f32 %v1135_v45, 0.0  ;;  %v557_v45 = vld [vmem:[%s3427_s22 + $0x698] sm:$0xff] }
 0x1dc   : > { %v1149_v17 = vpop.f32.mrf.mxu1  ;;  %v749_v10 = vadd.f32 %v3666_v31, %v748_v9  ;;  %v3887_v9 = vadd.f32 %v1311_v11, %v911_v30  ;;  %v1129_v30 = vadd.f32 %v3795_v39, %v728_v54 }
 0x1de   : > { %v1150_v32 = vadd.f32 %v1149_v17, %v749_v10  ;;  %795 = vmatmul.f32.gmra.mxu0 %v440_v2  ;;  %v444_v2 = vld [vmem:[%s3427_s22 + $0x310] sm:$0xff]  ;;  %v1138_v10 = vadd.f32 %v3827_v14, %v737_v23  ;;  %v731_v14 = vadd.f32 %v3666_v31, %v3803_v44  ;;  %v447_v44 = vld [vmem:[%s3427_s22 + $0x328] sm:$0xff]  ;;  %v1464_v51 = vmax.f32 %v1129_v30, 0.0 }
 0x1df   : > { %1196 = vmatmul.f32.gmra.mxu1 %v441_v26  ;;  %v1468_v26 = vmax.f32 %v1141_v38, 0.0  ;;  %v916_v24 = vpop.f32.mrf.mxu2  ;;  %v1317_v33 = vpop.f32.mrf.mxu3  ;;  %v448_v38 = vld [vmem:[%s3427_s22 + $0x330] sm:$0xff]  ;;  %v710_v30 = vadd.f32 %v3666_v31, %v3706_v58 }
 0x1e0   : > { %v1471_v40 = vmax.f32 %v1150_v32, 0.0  ;;  %v566_v32 = vld [vmem:[%s3427_s22 + $0x6e0] sm:$0xff]  ;;  %v1467_v52 = vmax.f32 %v1138_v10, 0.0  ;;  %v1132_v56 = vadd.f32 %v3805_v34, %v731_v14  ;;  %v725_v34 = vadd.f32 %v3666_v31, %v3784_v0  ;;  %v449_v0 = vld [vmem:[%s3427_s22 + $0x338] sm:$0xff] }
 0x1e1   : > { %984 = vmatmul.f32.gmra.mxu2 %v566_v32  ;;  %v450_v14 = vld [vmem:[%s3427_s22 + $0x340] sm:$0xff] }
 0x1e2   : > { %2804 = vmatpush.xpose.msk.msrb.mxu3 %vm1582_vm0, %v1471_v40  ;;  %v446_v40 = vld [vmem:[%s3427_s22 + $0x320] sm:$0xff]  ;;  %v1465_v63 = vmax.f32 %v1132_v56, 0.0  ;;  %v1126_v18 = vadd.f32 %v3786_v5, %v725_v34  ;;  %v719_v5 = vadd.f32 %v3666_v31, %v3754_v25  ;;  %v451_v25 = vld [vmem:[%s3427_s22 + $0x348] sm:$0xff] }
 0x1e3   : > { %v3872_v29 = vpop.f32.mrf.mxu0  ;;  %v559_v34 = vld [vmem:[%s3427_s22 + $0x6a8] sm:$0xff] }
 0x1e4   : > { %v3878_v62 = vpop.f32.mrf.mxu1  ;;  %v1463_v28 = vmax.f32 %v1126_v18, 0.0  ;;  %v574_v18 = vld [vmem:[%s3427_s22 + $0x720] sm:$0xff] }
 0x1e6   : > { %798 = vmatmul.f32.gmra.mxu0 %v442_v48  ;;  %2805 = vmatpush.xpose.msk.msrb.mxu3 %vm1582_vm0, %v1470_v19  ;;  %v553_v48 = vld [vmem:[%s3427_s22 + $0x678] sm:$0xff] }
 0x1e7   : > { %1199 = vmatmul.f32.gmra.mxu1 %v443_v6  ;;  %1364 = vmatmul.f32.gmra.mxu3 %v553_v48  ;;  %v917_v6 = vadd.f32 %v3666_v31, %v916_v24  ;;  %v919_v39 = vpop.f32.mrf.mxu2 }
 0x1e9   : > { %987 = vmatmul.f32.gmra.mxu2 %v568_v36  ;;  %v3925_v11 = vadd.f32 %v1317_v33, %v917_v6  ;;  %v452_v33 = vld [vmem:[%s3427_s22 + $0x350] sm:$0xff] }
 0x1ea   : > { %2806 = vmatpush.xpose.msk.msrb.mxu3 %vm1582_vm0, %v1469_v20  ;;  %v555_v20 = vld [vmem:[%s3427_s22 + $0x688] sm:$0xff] }
 0x1eb   : > { %v3890_v17 = vpop.f32.mrf.mxu0 }
 0x1ec   : > { %v3897_v27 = vpop.f32.mrf.mxu1 }
 0x1ee   : > { %801 = vmatmul.f32.gmra.mxu0 %v444_v2  ;;  %2807 = vmatpush.xpose.msk.msrb.mxu3 %vm1582_vm0, %v1468_v26  ;;  %v722_v2 = vadd.f32 %v3666_v31, %v3770_v15  ;;  %v920_v26 = vadd.f32 %v3666_v31, %v919_v39  ;;  %v1320_v15 = vpop.f32.mrf.mxu3 }
 0x1ef   : > { %1202 = vmatmul.f32.gmra.mxu1 %v445_v13  ;;  %1367 = vmatmul.f32.gmra.mxu3 %v555_v20  ;;  %v570_v13 = vld [vmem:[%s3427_s22 + $0x700] sm:$0xff] }
 0x1f0   : > { %v1123_v4 = vadd.f32 %v3772_v57, %v722_v2  ;;  %v3944_v32 = vadd.f32 %v1320_v15, %v920_v26  ;;  %v922_v57 = vpop.f32.mrf.mxu2  ;;  %v561_v15 = vld [vmem:[%s3427_s22 + $0x6b8] sm:$0xff] }
 0x1f1   : > { %990 = vmatmul.f32.gmra.mxu2 %v570_v13  ;;  %v923_v56 = vadd.f32 %v3666_v31, %v922_v57  ;;  %v454_v13 = vld [vmem:[%s3427_s22 + $0x360] sm:$0xff]  ;;  %v456_v57 = vld [vmem:[%s3427_s22 + $0x370] sm:$0xff] }
 0x1f2   : > { %2808 = vmatpush.xpose.msk.msrb.mxu3 %vm1582_vm0, %v1467_v52  ;;  %v716_v52 = vadd.f32 %v3666_v31, %v3738_v35  ;;  %v1462_v48 = vmax.f32 %v1123_v4, 0.0 }
 0x1f3   : > { %v3909_v42 = vpop.f32.mrf.mxu0 }
 0x1f4   : > { %v3916_v19 = vpop.f32.mrf.mxu1 }
 0x1f6   : > { %804 = vmatmul.f32.gmra.mxu0 %v446_v40  ;;  %2809 = vmatpush.xpose.msk.msrb.mxu3 %vm1582_vm0, %v1466_v61  ;;  %v1120_v40 = vadd.f32 %v3756_v3, %v719_v5  ;;  %v572_v61 = vld [vmem:[%s3427_s22 + $0x710] sm:$0xff]  ;;  %v1323_v35 = vpop.f32.mrf.mxu3  ;;  %v713_v3 = vadd.f32 %v3666_v31, %v3722_v46  ;;  %v453_v46 = vld [vmem:[%s3427_s22 + $0x358] sm:$0xff]  ;;  %v704_v5 = vadd.f32 %v3666_v31, %v3676_v50 }
 0x1f7   : > { %1205 = vmatmul.f32.gmra.mxu1 %v447_v44  ;;  %1370 = vmatmul.f32.gmra.mxu3 %v557_v45  ;;  %v1117_v44 = vadd.f32 %v3740_v49, %v716_v52  ;;  %v3963_v6 = vadd.f32 %v1323_v35, %v923_v56  ;;  %v576_v52 = vld [vmem:[%s3427_s22 + $0x730] sm:$0xff]  ;;  %v563_v56 = vld [vmem:[%s3427_s22 + $0x6c8] sm:$0xff] }
 0x1f8   : > { %v1461_v24 = vmax.f32 %v1120_v40, 0.0  ;;  %v925_v49 = vpop.f32.mrf.mxu2 }
 0x1f9   : > { %993 = vmatmul.f32.gmra.mxu2 %v572_v61  ;;  %v926_v2 = vadd.f32 %v3666_v31, %v925_v49  ;;  %v459_v49 = vld [vmem:[%s3427_s22 + $0x388] sm:$0xff] }
 0x1fa   : > { %2810 = vmatpush.xpose.msk.msrb.mxu3 %vm1582_vm0, %v1465_v63  ;;  %v1114_v63 = vadd.f32 %v3724_v37, %v713_v3  ;;  %v707_v37 = vadd.f32 %v3666_v31, %v3690_v7  ;;  %v455_v7 = vld [vmem:[%s3427_s22 + $0x368] sm:$0xff]  ;;  %v457_v3 = vld [vmem:[%s3427_s22 + $0x378] sm:$0xff] }
 0x1fb   : > { %v3928_v23 = vpop.f32.mrf.mxu0 }
 0x1fc   : > { %v3935_v10 = vpop.f32.mrf.mxu1  ;;  %v1108_v4 = vadd.f32 %v3692_v8, %v707_v37  ;;  %v1105_v8 = vadd.f32 %v3678_v53, %v704_v5 }
 0x1fe   : > { %807 = vmatmul.f32.gmra.mxu0 %v448_v38  ;;  %2811 = vmatpush.xpose.msk.msrb.mxu3 %vm1582_vm0, %v1464_v51  ;;  %v1460_v38 = vmax.f32 %v1117_v44, 0.0  ;;  %v1326_v58 = vpop.f32.mrf.mxu3  ;;  %v1111_v51 = vadd.f32 %v3708_v22, %v710_v30  ;;  %v1457_v40 = vmax.f32 %v1108_v4, 0.0  ;;  %v1456_v61 = vmax.f32 %v1105_v8, 0.0  ;;  %v461_v4 = vld [vmem:[%s3427_s22 + $0x398] sm:$0xff]  ;;  %v462_v8 = vld [vmem:[%s3427_s22 + $0x3a0] sm:$0xff] }
 0x1ff   : > { %1208 = vmatmul.f32.gmra.mxu1 %v449_v0  ;;  %1373 = vmatmul.f32.gmra.mxu3 %v559_v34  ;;  %v1459_v0 = vmax.f32 %v1114_v63, 0.0  ;;  %v3982_v39 = vadd.f32 %v1326_v58, %v926_v2  ;;  %v458_v63 = vld [vmem:[%s3427_s22 + $0x380] sm:$0xff]  ;;  %v580_v58 = vld [vmem:[%s3427_s22 + $0x750] sm:$0xff] }
 0x200   : > { %v928_v22 = vpop.f32.mrf.mxu2 }
 0x201   : > { %996 = vmatmul.f32.gmra.mxu2 %v574_v18  ;;  %v929_v45 = vadd.f32 %v3666_v31, %v928_v22  ;;  %v582_v22 = vld [vmem:[%s3427_s22 + $0x760] sm:$0xff] }
 0x202   : > { %2812 = vmatpush.xpose.msk.msrb.mxu3 %vm1582_vm0, %v1463_v28  ;;  %v1458_v28 = vmax.f32 %v1111_v51, 0.0 }
 0x203   : > { %v3947_v60 = vpop.f32.mrf.mxu0 }
 0x204   : > { %v3954_v54 = vpop.f32.mrf.mxu1 }
 0x206   : > { %810 = vmatmul.f32.gmra.mxu0 %v450_v14  ;;  %2813 = vmatpush.xpose.msk.msrb.mxu3 %vm1582_vm0, %v1462_v48  ;;  %v1329_v50 = vpop.f32.mrf.mxu3 }
 0x207   : > { %1211 = vmatmul.f32.gmra.mxu1 %v451_v25  ;;  %1376 = vmatmul.f32.gmra.mxu3 %v561_v15  ;;  %v3999_v48 = vadd.f32 %v1329_v50, %v929_v45  ;;  %v567_v15 = vld [vmem:[%s3427_s22 + $0x6e8] sm:$0xff] }
 0x208   : > { %v931_v44 = vpop.f32.mrf.mxu2 }
 0x209   : > { %999 = vmatmul.f32.gmra.mxu2 %v576_v52  ;;  %v932_v53 = vadd.f32 %v3666_v31, %v931_v44  ;;  %v584_v44 = vld [vmem:[%s3427_s22 + $0x770] sm:$0xff] }
 0x20a   : > { %2814 = vmatpush.xpose.msk.msrb.mxu3 %vm1582_vm0, %v1461_v24  ;;  %v578_v24 = vld [vmem:[%s3427_s22 + $0x740] sm:$0xff] }
 0x20b   : > { %v3966_v36 = vpop.f32.mrf.mxu0 }
 0x20c   : > { %v3973_v20 = vpop.f32.mrf.mxu1 }
 0x20e   : > { %813 = vmatmul.f32.gmra.mxu0 %v452_v33  ;;  %2815 = vmatpush.xpose.msk.msrb.mxu3 %vm1582_vm0, %v1460_v38  ;;  %v1332_v33 = vpop.f32.mrf.mxu3  ;;  %v565_v38 = vld [vmem:[%s3427_s22 + $0x6d8] sm:$0xff] }
 0x20f   : > { %1214 = vmatmul.f32.gmra.mxu1 %v453_v46  ;;  %1379 = vmatmul.f32.gmra.mxu3 %v563_v56  ;;  %v4012_v34 = vadd.f32 %v1332_v33, %v932_v53  ;;  %v463_v56 = vld [vmem:[%s3427_s22 + $0x3a8] sm:$0xff] }
 0x210   : > { %v934_v2 = vpop.f32.mrf.mxu2 }
 0x211   : > { %1002 = vmatmul.f32.gmra.mxu2 %v578_v24  ;;  %v935_v18 = vadd.f32 %v3666_v31, %v934_v2  ;;  %v465_v2 = vld [vmem:[%s3427_s22 + $0x3b8] sm:$0xff] }
 0x212   : > { %2816 = vmatpush.xpose.msk.msrb.mxu3 %vm1582_vm0, %v1459_v0 }
 0x213   : > { %v3985_v26 = vpop.f32.mrf.mxu0 }
 0x214   : > { %v3992_v14 = vpop.f32.mrf.mxu1 }
 0x216   : > { %816 = vmatmul.f32.gmra.mxu0 %v454_v13  ;;  %2817 = vmatpush.xpose.msk.msrb.mxu3 %vm1582_vm0, %v1458_v28  ;;  %v1335_v37 = vpop.f32.mrf.mxu3  ;;  %v460_v13 = vld [vmem:[%s3427_s22 + $0x390] sm:$0xff] }
 0x217   : > { %1217 = vmatmul.f32.gmra.mxu1 %v455_v7  ;;  %1382 = vmatmul.f32.gmra.mxu3 %v565_v38  ;;  %v4023_v51 = vadd.f32 %v1335_v37, %v935_v18  ;;  %v571_v38 = vld [vmem:[%s3427_s22 + $0x708] sm:$0xff]  ;;  %v586_v37 = vld [vmem:[%s3427_s22 + $0x780] sm:$0xff] }
 0x218   : > { %v937_v28 = vpop.f32.mrf.mxu2 }
 0x219   : > { %1005 = vmatmul.f32.gmra.mxu2 %v580_v58  ;;  %v938_v7 = vadd.f32 %v3666_v31, %v937_v28  ;;  %v466_v28 = vld [vmem:[%s3427_s22 + $0x3c0] sm:$0xff] }
 0x21a   : > { %2818 = vmatpush.xpose.msk.msrb.mxu3 %vm1582_vm0, %v1457_v40  ;;  %v569_v40 = vld [vmem:[%s3427_s22 + $0x6f8] sm:$0xff] }
 0x21b   : > { %v4002_v25 = vpop.f32.mrf.mxu0 }
 0x21c   : > { %v4006_v35 = vpop.f32.mrf.mxu1 }
 0x21e   : > { %819 = vmatmul.f32.gmra.mxu0 %v456_v57  ;;  %2819 = vmatpush.xpose.msk.msrb.mxu3 %vm1582_vm0, %v1456_v61  ;;  %v1338_v45 = vpop.f32.mrf.mxu3 }
 0x21f   : > { %1220 = vmatmul.f32.gmra.mxu1 %v457_v3  ;;  %1385 = vmatmul.f32.gmra.mxu3 %v567_v15  ;;  %v4034_v52 = vadd.f32 %v1338_v45, %v938_v7  ;;  %v573_v7 = vld [vmem:[%s3427_s22 + $0x718] sm:$0xff]  ;;  %v467_v45 = vld [vmem:[%s3427_s22 + $0x3c8] sm:$0xff] }
 0x220   : > { %v940_v61 = vpop.f32.mrf.mxu2 }
 0x221   : > { %1008 = vmatmul.f32.gmra.mxu2 %v582_v22  ;;  %v941_v3 = vadd.f32 %v3666_v31, %v940_v61 }
 0x223   : > { %v4014_v30 = vpop.f32.mrf.mxu0 }
 0x224   : > { %v4018_v46 = vpop.f32.mrf.mxu1 }
 0x226   : > { %822 = vmatmul.f32.gmra.mxu0 %v458_v63  ;;  %v1341_v53 = vpop.f32.mrf.mxu3  ;;  %v464_v63 = vld [vmem:[%s3427_s22 + $0x3b0] sm:$0xff] }
 0x227   : > { %1223 = vmatmul.f32.gmra.mxu1 %v459_v49  ;;  %1388 = vmatmul.f32.gmra.mxu3 %v569_v40  ;;  %v4045_v24 = vadd.f32 %v1341_v53, %v941_v3  ;;  %v468_v53 = vld [vmem:[%s3427_s22 + $0x3d0] sm:$0xff] }
 0x228   : > { %v943_v18 = vpop.f32.mrf.mxu2 }
 0x229   : > { %1011 = vmatmul.f32.gmra.mxu2 %v584_v44  ;;  %v944_v58 = vadd.f32 %v3666_v31, %v943_v18 }
 0x22b   : > { %v4025_v0 = vpop.f32.mrf.mxu0 }
 0x22c   : > { %v4029_v5 = vpop.f32.mrf.mxu1 }
 0x22e   : > { %825 = vmatmul.f32.gmra.mxu0 %v460_v13  ;;  %v1344_v13 = vpop.f32.mrf.mxu3 }
 0x22f   : > { %1226 = vmatmul.f32.gmra.mxu1 %v461_v4  ;;  %1391 = vmatmul.f32.gmra.mxu3 %v571_v38  ;;  %v4056_v15 = vadd.f32 %v1344_v13, %v944_v58  ;;  %v4072_v58 = vld [vmem:[#allocation4] ss:$0 sm:$0xff] }
 0x231   : > { %1014 = vmatmul.f32.gmra.mxu2 %v586_v37  ;;  %4778 = vst [vmem:[#allocation10_spill] sm:$0xff] %v4056_v15  ;;  %v590_v37 = vld [vmem:[%s3427_s22 + $0x7a0] sm:$0xff] }
 0x233   : > { %v4036_v50 = vpop.f32.mrf.mxu0 }
 0x234   : > { %v4040_v57 = vpop.f32.mrf.mxu1 }
 0x236   : > { %828 = vmatmul.f32.gmra.mxu0 %v462_v8  ;;  %v946_v8 = vpop.f32.mrf.mxu2  ;;  %v1347_v61 = vpop.f32.mrf.mxu3 }
 0x237   : > { %1229 = vmatmul.f32.gmra.mxu1 %v463_v56  ;;  %1394 = vmatmul.f32.gmra.mxu3 %v573_v7  ;;  %v947_v40 = vadd.f32 %v3666_v31, %v946_v8  ;;  %v588_v56 = vld [vmem:[%s3427_s22 + $0x790] sm:$0xff]  ;;  %v577_v8 = vld [vmem:[%s3427_s22 + $0x738] sm:$0xff] }
 0x239   : > { %1017 = vmatmul.f32.gmra.mxu2 %v588_v56  ;;  %v4067_v3 = vadd.f32 %v1347_v61, %v947_v40  ;;  %v471_v56 = vld [vmem:[%s3427_s22 + $0x3e8] sm:$0xff] }
 0x23b   : > { %v4047_v33 = vpop.f32.mrf.mxu0  ;;  %4779 = vst [vmem:[#allocation11_spill] sm:$0xff] %v4067_v3 }
 0x23c   : > { %v4051_v49 = vpop.f32.mrf.mxu1 }
 0x23e   : > { %831 = vmatmul.f32.gmra.mxu0 %v464_v63  ;;  %v575_v63 = vld [vmem:[%s3427_s22 + $0x728] sm:$0xff]  ;;  %v949_v18 = vpop.f32.mrf.mxu2  ;;  %v1350_v13 = vpop.f32.mrf.mxu3 }
 0x23f   : > { %1232 = vmatmul.f32.gmra.mxu1 %v465_v2  ;;  %v469_v2 = vld [vmem:[%s3427_s22 + $0x3d8] sm:$0xff]  ;;  %1397 = vmatmul.f32.gmra.mxu3 %v575_v63  ;;  %v950_v31 = vadd.f32 %v4072_v58, %v949_v18 }
 0x241   : > { %1020 = vmatmul.f32.gmra.mxu2 %v590_v37  ;;  %v472_v37 = vld [vmem:[%s3427_s22 + $0x3f0] sm:$0xff] }
 0x243   : > { %v4058_v4 = vpop.f32.mrf.mxu0 }
 0x244   : > { %v4062_v22 = vpop.f32.mrf.mxu1 }
 0x246   : > { %834 = vmatmul.f32.gmra.mxu0 %v466_v28  ;;  %v4076_v28 = vadd.f32 %v1350_v13, %v950_v31  ;;  %v952_v61 = vpop.f32.mrf.mxu2  ;;  %v579_v13 = vld [vmem:[%s3427_s22 + $0x748] sm:$0xff] }
 0x247   : > { %1235 = vmatmul.f32.gmra.mxu1 %v467_v45  ;;  %v470_v45 = vld [vmem:[%s3427_s22 + $0x3e0] sm:$0xff]  ;;  %1400 = vmatmul.f32.gmra.mxu3 %v577_v8  ;;  %v953_v63 = vadd.f32 %v4072_v58, %v952_v61  ;;  %v473_v8 = vld [vmem:[%s3427_s22 + $0x3f8] sm:$0xff] }
 0x248   : > { %4780 = vst [vmem:[#allocation12_spill] sm:$0xff] %v4076_v28 }
 0x24b   : > { %v790_v44 = vpop.f32.mrf.mxu0 }
 0x24c   : > { %v1191_v38 = vpop.f32.mrf.mxu1 }
 0x24e   : > { %837 = vmatmul.f32.gmra.mxu0 %v468_v53  ;;  %v592_v53 = vld [vmem:[%s3427_s22 + $0x7b0] sm:$0xff] }
 0x24f   : > { %1238 = vmatmul.f32.gmra.mxu1 %v469_v2  ;;  %1023 = vmatmul.f32.gmra.mxu2 %v592_v53  ;;  %v1353_v2 = vpop.f32.mrf.mxu3  ;;  %v594_v53 = vld [vmem:[%s3427_s22 + $0x7c0] sm:$0xff] }
 0x250   : > { %v4083_v18 = vadd.f32 %v1353_v2, %v953_v63  ;;  %1403 = vmatmul.f32.gmra.mxu3 %v579_v13  ;;  %v791_v2 = vadd.f32 %v4072_v58, %v790_v44 }
 0x252   : > { %4781 = vst [vmem:[#allocation13_spill] sm:$0xff] %v4083_v18 }
 0x253   : > { %v793_v7 = vpop.f32.mrf.mxu0 }
 0x254   : > { %v1194_v40 = vpop.f32.mrf.mxu1  ;;  %v794_v15 = vadd.f32 %v4072_v58, %v793_v7 }
 0x256   : > { %840 = vmatmul.f32.gmra.mxu0 %v470_v45  ;;  %v955_v45 = vpop.f32.mrf.mxu2  ;;  %v1195_v7 = vadd.f32 %v1194_v40, %v794_v15  ;;  %v596_v40 = vld [vmem:[%s3427_s22 + $0x7d0] sm:$0xff] }
 0x257   : > { %1241 = vmatmul.f32.gmra.mxu1 %v471_v56  ;;  %v956_v56 = vadd.f32 %v4072_v58, %v955_v45  ;;  %1026 = vmatmul.f32.gmra.mxu2 %v594_v53  ;;  %v1356_v63 = vpop.f32.mrf.mxu3  ;;  %v581_v45 = vld [vmem:[%s3427_s22 + $0x758] sm:$0xff]  ;;  %v475_v53 = vld [vmem:[%s3427_s22 + $0x408] sm:$0xff] }
 0x258   : > { %1406 = vmatmul.f32.gmra.mxu3 %v581_v45 }
 0x25b   : > { %v796_v31 = vpop.f32.mrf.mxu0 }
 0x25c   : > { %v797_v3 = vadd.f32 %v4072_v58, %v796_v31  ;;  %v1197_v28 = vpop.f32.mrf.mxu1  ;;  %v4093_v31 = vadd.f32 %v1356_v63, %v956_v56 }
 0x25e   : > { %v1198_v61 = vadd.f32 %v1197_v28, %v797_v3  ;;  %843 = vmatmul.f32.gmra.mxu0 %v472_v37  ;;  %4782 = vst [vmem:[#allocation14_spill] sm:$0xff] %v4093_v31  ;;  %v788_v3 = vadd.f32 %v4072_v58, %v4058_v4  ;;  %v1192_v28 = vadd.f32 %v1191_v38, %v791_v2  ;;  %v1486_v37 = vmax.f32 %v1195_v7, 0.0  ;;  %v958_v15 = vpop.f32.mrf.mxu2  ;;  %v583_v2 = vld [vmem:[%s3427_s22 + $0x768] sm:$0xff]  ;;  %v498_v31 = vld [vmem:[%s3427_s22 + $0x4c0] sm:$0xff] }
 0x25f   : > { %1244 = vmatmul.f32.gmra.mxu1 %v473_v8  ;;  %v959_v44 = vadd.f32 %v4072_v58, %v958_v15  ;;  %1029 = vmatmul.f32.gmra.mxu2 %v596_v40  ;;  %v785_v4 = vadd.f32 %v4072_v58, %v4047_v33  ;;  %v782_v7 = vadd.f32 %v4072_v58, %v4036_v50  ;;  %v477_v33 = vld [vmem:[%s3427_s22 + $0x418] sm:$0xff] }
 0x260   : > { %v1487_v18 = vmax.f32 %v1198_v61, 0.0  ;;  %v1189_v38 = vadd.f32 %v4062_v22, %v788_v3  ;;  %v1485_v56 = vmax.f32 %v1192_v28, 0.0  ;;  %1409 = vmatmul.f32.gmra.mxu3 %v583_v2  ;;  %v598_v28 = vld [vmem:[%s3427_s22 + $0x7e0] sm:$0xff] }
 0x261   : > { %v1186_v45 = vadd.f32 %v4051_v49, %v785_v4  ;;  %v779_v49 = vadd.f32 %v4072_v58, %v4025_v0  ;;  %v1183_v15 = vadd.f32 %v4040_v57, %v782_v7  ;;  %v478_v4 = vld [vmem:[%s3427_s22 + $0x420] sm:$0xff]  ;;  %v479_v0 = vld [vmem:[%s3427_s22 + $0x428] sm:$0xff] }
 0x262   : > { %2822 = vmatpush.xpose.msk.msra.mxu2 %vm1582_vm0, %v1487_v18  ;;  %v1359_v18 = vpop.f32.mrf.mxu3 }
 0x263   : > { %v4096_v13 = vpop.f32.mrf.mxu0  ;;  %v4111_v61 = vadd.f32 %v1359_v18, %v959_v44  ;;  %v1483_v44 = vmax.f32 %v1186_v45, 0.0  ;;  %v1482_v2 = vmax.f32 %v1183_v15, 0.0  ;;  %v600_v45 = vld [vmem:[%s3427_s22 + $0x7f0] sm:$0xff]  ;;  %v770_v15 = vadd.f32 %v4072_v58, %v3985_v26 }
 0x264   : > { %v4102_v8 = vpop.f32.mrf.mxu1 }
 0x265   : > { %4783 = vst [vmem:[#allocation15_spill] sm:$0xff] %v4111_v61 }
 0x266   : > { %846 = vmatmul.f32.gmra.mxu0 %v474_v21  ;;  %2823 = vmatpush.xpose.msk.msra.mxu2 %vm1582_vm0, %v1486_v37  ;;  %v476_v21 = vld [vmem:[%s3427_s22 + $0x410] sm:$0xff]  ;;  %v1484_v37 = vmax.f32 %v1189_v38, 0.0  ;;  %v961_v22 = vpop.f32.mrf.mxu2  ;;  %v585_v38 = vld [vmem:[%s3427_s22 + $0x778] sm:$0xff] }
 0x267   : > { %1247 = vmatmul.f32.gmra.mxu1 %v475_v53  ;;  %v962_v3 = vadd.f32 %v4072_v58, %v961_v22  ;;  %1032 = vmatmul.f32.gmra.mxu2 %v598_v28 }
 0x268   : > { %1412 = vmatmul.f32.gmra.mxu3 %v585_v38 }
 0x26a   : > { %2824 = vmatpush.xpose.msk.msra.mxu2 %vm1582_vm0, %v1485_v56  ;;  %v1362_v50 = vpop.f32.mrf.mxu3  ;;  %v776_v56 = vadd.f32 %v4072_v58, %v4014_v30 }
 0x26b   : > { %v4114_v63 = vpop.f32.mrf.mxu0  ;;  %v4130_v40 = vadd.f32 %v1362_v50, %v962_v3  ;;  %v480_v50 = vld [vmem:[%s3427_s22 + $0x430] sm:$0xff] }
 0x26c   : > { %v4121_v53 = vpop.f32.mrf.mxu1 }
 0x26d   : > { %4784 = vst [vmem:[#allocation16_spill] sm:$0xff] %v4130_v40  ;;  %v499_v40 = vld [vmem:[%s3427_s22 + $0x4c8] sm:$0xff] }
 0x26e   : > { %849 = vmatmul.f32.gmra.mxu0 %v476_v21  ;;  %2825 = vmatpush.xpose.msk.msra.mxu2 %vm1582_vm0, %v1484_v37  ;;  %v1180_v21 = vadd.f32 %v4029_v5, %v779_v49  ;;  %v964_v57 = vpop.f32.mrf.mxu2  ;;  %v773_v5 = vadd.f32 %v4072_v58, %v4002_v25  ;;  %v587_v49 = vld [vmem:[%s3427_s22 + $0x788] sm:$0xff]  ;;  %v481_v25 = vld [vmem:[%s3427_s22 + $0x438] sm:$0xff] }
 0x26f   : > { %1250 = vmatmul.f32.gmra.mxu1 %v477_v33  ;;  %v965_v7 = vadd.f32 %v4072_v58, %v964_v57  ;;  %1035 = vmatmul.f32.gmra.mxu2 %v600_v45  ;;  %v1177_v33 = vadd.f32 %v4018_v46, %v776_v56  ;;  %v482_v45 = vld [vmem:[%s3427_s22 + $0x440] sm:$0xff] }
 0x270   : > { %v1481_v22 = vmax.f32 %v1180_v21, 0.0  ;;  %1415 = vmatmul.f32.gmra.mxu3 %v587_v49  ;;  %v4167_v21 = vld [vmem:[%s4764_s3] sm:$0xff] }
 0x272   : > { %2826 = vmatpush.xpose.msk.msra.mxu2 %vm1582_vm0, %v1483_v44  ;;  %v1365_v30 = vpop.f32.mrf.mxu3  ;;  %v1174_v44 = vadd.f32 %v4006_v35, %v773_v5  ;;  %v767_v35 = vadd.f32 %v4072_v58, %v3966_v36  ;;  %v764_v5 = vadd.f32 %v4072_v58, %v3947_v60  ;;  %v761_v60 = vadd.f32 %v4072_v58, %v3928_v23  ;;  %v485_v23 = vld [vmem:[%s3427_s22 + $0x458] sm:$0xff] }
 0x273   : > { %v4133_v18 = vpop.f32.mrf.mxu0  ;;  %v4149_v3 = vadd.f32 %v1365_v30, %v965_v7  ;;  %v589_v30 = vld [vmem:[%s3427_s22 + $0x798] sm:$0xff] }
 0x274   : > { %v4140_v37 = vpop.f32.mrf.mxu1 }
 0x275   : > { %4785 = vst [vmem:[#allocation17_spill] sm:$0xff] %v4149_v3 }
 0x276   : > { %852 = vmatmul.f32.gmra.mxu0 %v478_v4  ;;  %2827 = vmatpush.xpose.msk.msra.mxu2 %vm1582_vm0, %v1482_v2  ;;  %v1480_v4 = vmax.f32 %v1177_v33, 0.0  ;;  %v967_v46 = vpop.f32.mrf.mxu2  ;;  %v1171_v2 = vadd.f32 %v3992_v14, %v770_v15  ;;  %v1168_v33 = vadd.f32 %v3973_v20, %v767_v35  ;;  %v483_v14 = vld [vmem:[%s3427_s22 + $0x448] sm:$0xff]  ;;  %v1165_v20 = vadd.f32 %v3954_v54, %v764_v5  ;;  %v593_v5 = vld [vmem:[%s3427_s22 + $0x7b8] sm:$0xff] }
 0x277   : > { %1253 = vmatmul.f32.gmra.mxu1 %v479_v0  ;;  %v968_v56 = vadd.f32 %v4072_v58, %v967_v46  ;;  %2802 = vmatmul.msk.f32.vlgmr.msrb.gmra.mxu2 %vm1582_vm0, %v4167_v21  ;;  %v1479_v0 = vmax.f32 %v1174_v44, 0.0  ;;  %v758_v46 = vadd.f32 %v4072_v58, %v3909_v42  ;;  %v755_v42 = vadd.f32 %v4072_v58, %v3890_v17  ;;  %v487_v17 = vld [vmem:[%s3427_s22 + $0x468] sm:$0xff] }
 0x278   : > { %1418 = vmatmul.f32.gmra.mxu3 %v589_v30  ;;  %v1477_v15 = vmax.f32 %v1168_v33, 0.0  ;;  %v486_v30 = vld [vmem:[%s3427_s22 + $0x460] sm:$0xff]  ;;  %v752_v33 = vadd.f32 %v4072_v58, %v3872_v29 }
 0x27a   : > { %2828 = vmatpush.xpose.msk.msra.mxu2 %vm1582_vm0, %v1481_v22  ;;  %v1368_v26 = vpop.f32.mrf.mxu3  ;;  %v1478_v22 = vmax.f32 %v1171_v2, 0.0 }
 0x27b   : > { %v4152_v28 = vpop.f32.mrf.mxu0  ;;  %v4174_v57 = vadd.f32 %v1368_v26, %v968_v56  ;;  %v1162_v56 = vadd.f32 %v3935_v10, %v761_v60  ;;  %v1476_v26 = vmax.f32 %v1165_v20, 0.0  ;;  %v1159_v10 = vadd.f32 %v3916_v19, %v758_v46  ;;  %v488_v46 = vld [vmem:[%s3427_s22 + $0x470] sm:$0xff] }
 0x27c   : > { %v4159_v38 = vpop.f32.mrf.mxu1 }
 0x27d   : > { %4786 = vst [vmem:[#allocation18_spill] sm:$0xff] %v4174_v57 }
 0x27e   : > { %855 = vmatmul.f32.gmra.mxu0 %v480_v50  ;;  %2829 = vmatpush.xpose.msk.msra.mxu2 %vm1582_vm0, %v1480_v4  ;;  %v4187_v50 = vpop.f32.mrf.mxu2  ;;  %v484_v4 = vld [vmem:[%s3427_s22 + $0x450] sm:$0xff] }
 0x27f   : > { %1256 = vmatmul.f32.gmra.mxu1 %v481_v25  ;;  %4787 = vst [vmem:[#allocation19_spill] sm:$0xff] %v4187_v50  ;;  %v591_v25 = vld [vmem:[%s3427_s22 + $0x7a8] sm:$0xff] }
 0x280   : > { %1421 = vmatmul.f32.gmra.mxu3 %v591_v25 }
 0x282   : > { %2830 = vmatpush.xpose.msk.msra.mxu2 %vm1582_vm0, %v1479_v0  ;;  %v4190_v49 = vpop.f32.mrf.mxu3  ;;  %v1475_v0 = vmax.f32 %v1162_v56, 0.0  ;;  %v595_v56 = vld [vmem:[%s3427_s22 + $0x7c8] sm:$0xff] }
 0x283   : > { %v4177_v7 = vpop.f32.mrf.mxu0  ;;  %4788 = vst [vmem:[#allocation20_spill] sm:$0xff] %v4190_v49 }
 0x284   : > { %v4184_v36 = vpop.f32.mrf.mxu1 }
 0x286   : > { %858 = vmatmul.f32.gmra.mxu0 %v482_v45  ;;  %2831 = vmatpush.xpose.msk.msra.mxu2 %vm1582_vm0, %v1478_v22  ;;  %v4206_v54 = vpop.f32.mrf.mxu2  ;;  %v1156_v22 = vadd.f32 %v3897_v27, %v755_v42  ;;  %v1153_v27 = vadd.f32 %v3878_v62, %v752_v33 }
 0x287   : > { %1259 = vmatmul.f32.gmra.mxu1 %v483_v14  ;;  %4789 = vst [vmem:[#allocation21_spill] sm:$0xff] %v4206_v54  ;;  %v1474_v14 = vmax.f32 %v1159_v10, 0.0  ;;  %v489_v10 = vld [vmem:[%s3427_s22 + $0x478] sm:$0xff] }
 0x288   : > { %1424 = vmatmul.f32.gmra.mxu3 %v593_v5  ;;  %v1518_v5 = vmax.f32 %v3812_v59, 0.0 }
 0x28a   : > { %2832 = vmatpush.xpose.msk.msra.mxu2 %vm1582_vm0, %v1477_v15  ;;  %v4209_v2 = vpop.f32.mrf.mxu3 }
 0x28b   : > { %v4196_v44 = vpop.f32.mrf.mxu0  ;;  %4790 = vst [vmem:[#allocation22_spill] sm:$0xff] %v4209_v2 }
 0x28c   : > { %v4203_v35 = vpop.f32.mrf.mxu1 }
 0x28e   : > { %861 = vmatmul.f32.gmra.mxu0 %v484_v4  ;;  %2833 = vmatpush.xpose.msk.msra.mxu2 %vm1582_vm0, %v1476_v26  ;;  %v4222_v19 = vpop.f32.mrf.mxu2  ;;  %v1473_v4 = vmax.f32 %v1156_v22, 0.0  ;;  %v1472_v26 = vmax.f32 %v1153_v27, 0.0  ;;  %v490_v22 = vld [vmem:[%s3427_s22 + $0x480] sm:$0xff] }
 0x28f   : > { %1262 = vmatmul.f32.gmra.mxu1 %v485_v23  ;;  %4791 = vst [vmem:[#allocation23_spill] sm:$0xff] %v4222_v19 }
 0x290   : > { %1427 = vmatmul.f32.gmra.mxu3 %v595_v56 }
 0x292   : > { %2834 = vmatpush.xpose.msk.msra.mxu2 %vm1582_vm0, %v1475_v0  ;;  %v4227_v29 = vpop.f32.mrf.mxu3 }
 0x293   : > { %v817_v45 = vpop.f32.mrf.mxu0  ;;  %4792 = vst [vmem:[#allocation24_spill] sm:$0xff] %v4227_v29 }
 0x294   : > { %v818_v60 = vadd.f32 %v4072_v58, %v817_v45  ;;  %v1218_v20 = vpop.f32.mrf.mxu1  ;;  %v1519_v45 = vmax.f32 %v3823_v12, 0.0  ;;  %v597_v12 = vld [vmem:[%s3427_s22 + $0x7d8] sm:$0xff] }
 0x296   : > { %v4224_v15 = vadd.f32 %v1218_v20, %v818_v60  ;;  %864 = vmatmul.f32.gmra.mxu0 %v486_v30  ;;  %2835 = vmatpush.xpose.msk.msra.mxu2 %vm1582_vm0, %v1474_v14  ;;  %v4235_v0 = vpop.f32.mrf.mxu2  ;;  %v491_v20 = vld [vmem:[%s3427_s22 + $0x488] sm:$0xff] }
 0x297   : > { %1265 = vmatmul.f32.gmra.mxu1 %v487_v17  ;;  %4793 = vst [vmem:[#allocation25_spill] sm:$0xff] %v4235_v0 }
 0x298   : > { %1430 = vmatmul.f32.gmra.mxu3 %v597_v12 }
 0x29a   : > { %2836 = vmatpush.xpose.msk.msra.mxu2 %vm1582_vm0, %v1473_v4  ;;  %v4242_v30 = vpop.f32.mrf.mxu3 }
 0x29b   : > { %v820_v25 = vpop.f32.mrf.mxu0  ;;  %4794 = vst [vmem:[#allocation26_spill] sm:$0xff] %v4242_v30 }
 0x29c   : > { %v821_v23 = vadd.f32 %v4072_v58, %v820_v25  ;;  %v1221_v42 = vpop.f32.mrf.mxu1  ;;  %v492_v25 = vld [vmem:[%s3427_s22 + $0x490] sm:$0xff] }
 0x29e   : > { %v4238_v62 = vadd.f32 %v1221_v42, %v821_v23  ;;  %867 = vmatmul.f32.gmra.mxu0 %v488_v46  ;;  %2837 = vmatpush.xpose.msk.msra.mxu2 %vm1582_vm0, %v1472_v26  ;;  %v4250_v17 = vpop.f32.mrf.mxu2  ;;  %v599_v46 = vld [vmem:[%s3427_s22 + $0x7e8] sm:$0xff]  ;;  %v493_v23 = vld [vmem:[%s3427_s22 + $0x498] sm:$0xff] }
 0x29f   : > { %1268 = vmatmul.f32.gmra.mxu1 %v489_v10  ;;  %4795 = vst [vmem:[#allocation27_spill] sm:$0xff] %v4250_v17 }
 0x2a0   : > { %1433 = vmatmul.f32.gmra.mxu3 %v599_v46 }
 0x2a2   : > { %2858 = vmatpush.xpose.msk.msrb.mxu2 %vm1582_vm0, %v1519_v45  ;;  %v4254_v59 = vpop.f32.mrf.mxu3 }
 0x2a3   : > { %v823_v33 = vpop.f32.mrf.mxu0  ;;  %4796 = vst [vmem:[#allocation28_spill] sm:$0xff] %v4254_v59 }
 0x2a4   : > { %v824_v14 = vadd.f32 %v4072_v58, %v823_v33  ;;  %v1224_v60 = vpop.f32.mrf.mxu1  ;;  %v494_v33 = vld [vmem:[%s3427_s22 + $0x4a0] sm:$0xff] }
 0x2a6   : > { %2859 = vmatpush.xpose.msk.msrb.mxu2 %vm1582_vm0, %v1518_v5  ;;  %v4252_v27 = vadd.f32 %v1224_v60, %v824_v14  ;;  %870 = vmatmul.f32.gmra.mxu0 %v490_v22  ;;  %v4260_v42 = vpop.f32.mrf.mxu2  ;;  %v601_v22 = vld [vmem:[%s3427_s22 + $0x7f8] sm:$0xff]  ;;  %v495_v14 = vld [vmem:[%s3427_s22 + $0x4a8] sm:$0xff] }
 0x2a7   : > { %1271 = vmatmul.f32.gmra.mxu1 %v491_v20 }
 0x2a8   : > { %1436 = vmatmul.f32.gmra.mxu3 %v601_v22 }
 0x2aa   : > { %v4264_v45 = vpop.f32.mrf.mxu3 }
 0x2ab   : > { %v826_v4 = vpop.f32.mrf.mxu0  ;;  %4797 = vst [vmem:[#allocation29_spill] sm:$0xff] %v4264_v45 }
 0x2ac   : > { %v827_v56 = vadd.f32 %v4072_v58, %v826_v4  ;;  %v1227_v26 = vpop.f32.mrf.mxu1 }
 0x2ae   : > { %v4262_v10 = vadd.f32 %v1227_v26, %v827_v56  ;;  %873 = vmatmul.f32.gmra.mxu0 %v492_v25  ;;  %v4273_v60 = vpop.f32.mrf.mxu2  ;;  %v496_v25 = vld [vmem:[%s3427_s22 + $0x4b0] sm:$0xff]  ;;  %v497_v56 = vld [vmem:[%s3427_s22 + $0x4b8] sm:$0xff] }
 0x2af   : > { %1274 = vmatmul.f32.gmra.mxu1 %v493_v23 }
 0x2b0   : > { %2820 = vmatmul.msk.f32.vlgmr.msrb.gmra.mxu3 %vm1582_vm0, %v4167_v21 }
 0x2b2   : > { %v4275_v20 = vpop.f32.mrf.mxu3 }
 0x2b3   : > { %v4266_v5 = vpop.f32.mrf.mxu0 }
 0x2b4   : > { %v4270_v12 = vpop.f32.mrf.mxu1 }
 0x2b6   : > { %876 = vmatmul.f32.gmra.mxu0 %v494_v33  ;;  %v991_v26 = vpop.f32.mrf.mxu2 }
 0x2b7   : > { %1277 = vmatmul.f32.gmra.mxu1 %v495_v14  ;;  %v992_v23 = vadd.f32 %v4072_v58, %v991_v26  ;;  %v500_v26 = vld [vmem:[%s3427_s22 + $0x4d0] sm:$0xff] }
 0x2ba   : > { %v1392_v22 = vpop.f32.mrf.mxu3 }
 0x2bb   : > { %v832_v4 = vpop.f32.mrf.mxu0  ;;  %v4284_v33 = vadd.f32 %v1392_v22, %v992_v23 }
 0x2bc   : > { %v4278_v46 = vpop.f32.mrf.mxu1 }
 0x2bd   : > { %4798 = vst [vmem:[#allocation30_spill] sm:$0xff] %v4284_v33 }
 0x2be   : > { %879 = vmatmul.f32.gmra.mxu0 %v496_v25  ;;  %v994_v3 = vpop.f32.mrf.mxu2 }
 0x2bf   : > { %1280 = vmatmul.f32.gmra.mxu1 %v497_v56  ;;  %v995_v57 = vadd.f32 %v4072_v58, %v994_v3 }
 0x2c2   : > { %v1395_v49 = vpop.f32.mrf.mxu3 }
 0x2c3   : > { %v835_v14 = vpop.f32.mrf.mxu0  ;;  %v4289_v2 = vadd.f32 %v1395_v49, %v995_v57 }
 0x2c4   : > { %v1236_v61 = vpop.f32.mrf.mxu1 }
 0x2c5   : > { %4799 = vst [vmem:[#allocation31_spill] sm:$0xff] %v4289_v2 }
 0x2c6   : > { %882 = vmatmul.f32.gmra.mxu0 %v498_v31  ;;  %v997_v25 = vpop.f32.mrf.mxu2 }
 0x2c7   : > { %1283 = vmatmul.f32.gmra.mxu1 %v499_v40  ;;  %v998_v56 = vadd.f32 %v4072_v58, %v997_v25 }
 0x2ca   : > { %v1398_v23 = vpop.f32.mrf.mxu3 }
 0x2cb   : > { %v838_v50 = vpop.f32.mrf.mxu0  ;;  %v4293_v22 = vadd.f32 %v1398_v23, %v998_v56 }
 0x2cc   : > { %v1239_v29 = vpop.f32.mrf.mxu1  ;;  %v839_v23 = vadd.f32 %v4072_v58, %v838_v50 }
 0x2cd   : > { %4800 = vst [vmem:[#allocation32_spill] sm:$0xff] %v4293_v22 }
 0x2ce   : > { %885 = vmatmul.f32.gmra.mxu0 %v500_v26  ;;  %v1000_v30 = vpop.f32.mrf.mxu2 }
 0x2cf   : > { %v1001_v3 = vadd.f32 %v4072_v58, %v1000_v30 }
 0x2d2   : > { %v1401_v31 = vpop.f32.mrf.mxu3 }
 0x2d3   : > { %v841_v33 = vpop.f32.mrf.mxu0  ;;  %v4296_v40 = vadd.f32 %v1401_v31, %v1001_v3  ;;  %v836_v3 = vadd.f32 %v4072_v58, %v835_v14  ;;  %v830_v14 = vadd.f32 %v4072_v58, %v4266_v5 }
 0x2d4   : > { %v1242_v54 = vpop.f32.mrf.mxu1  ;;  %v842_v49 = vadd.f32 %v4072_v58, %v841_v33  ;;  %v1240_v33 = vadd.f32 %v1239_v29, %v839_v23 }
 0x2d5   : > { %4801 = vst [vmem:[#allocation33_spill] sm:$0xff] %v4296_v40  ;;  %v1231_v23 = vadd.f32 %v4270_v12, %v830_v14  ;;  %v1497_v12 = vmax.f32 %v4262_v10, 0.0  ;;  %v815_v10 = vadd.f32 %v4072_v58, %v4196_v44 }
 0x2d6   : > { %v1003_v59 = vpop.f32.mrf.mxu2  ;;  %v1243_v22 = vadd.f32 %v1242_v54, %v842_v49 }
 0x2d7   : > { %v1004_v26 = vadd.f32 %v4072_v58, %v1003_v59  ;;  %v1237_v59 = vadd.f32 %v1236_v61, %v836_v3 }
 0x2d8   : > { %v1502_v31 = vmax.f32 %v1243_v22, 0.0 }
 0x2da   : > { %v1404_v56 = vpop.f32.mrf.mxu3 }
 0x2db   : > { %v844_v57 = vpop.f32.mrf.mxu0  ;;  %v4302_v45 = vadd.f32 %v1404_v56, %v1004_v26 }
 0x2dc   : > { %v845_v2 = vadd.f32 %v4072_v58, %v844_v57  ;;  %v1245_v19 = vpop.f32.mrf.mxu1 }
 0x2de   : > { %v1246_v25 = vadd.f32 %v1245_v19, %v845_v2  ;;  %v1006_v17 = vpop.f32.mrf.mxu2  ;;  %v833_v19 = vadd.f32 %v4072_v58, %v832_v4 }
 0x2df   : > { %v1007_v2 = vadd.f32 %v4072_v58, %v1006_v17  ;;  %v1500_v17 = vmax.f32 %v1237_v59, 0.0 }
 0x2e0   : > { %v1503_v0 = vmax.f32 %v1246_v25, 0.0  ;;  %v1234_v22 = vadd.f32 %v4278_v46, %v833_v19  ;;  %v1498_v46 = vmax.f32 %v1231_v23, 0.0  ;;  %v812_v23 = vadd.f32 %v4072_v58, %v4177_v7 }
 0x2e2   : > { %2840 = vmatpush.xpose.msk.msra.mxu3 %vm1582_vm0, %v1503_v0  ;;  %v1407_v54 = vpop.f32.mrf.mxu3  ;;  %v1501_v0 = vmax.f32 %v1240_v33, 0.0  ;;  %v1213_v7 = vadd.f32 %v4184_v36, %v812_v23  ;;  %v4373_v36 = vld [vmem:[%s4764_s3 + $0x8] sm:$0x3] }
 0x2e3   : > { %v847_v30 = vpop.f32.mrf.mxu0  ;;  %v4312_v49 = vadd.f32 %v1407_v54, %v1007_v2  ;;  %2803 = vmatmul.msk.f32.gmra.mxu2 %vm1582_vm0, %v4373_v36  ;;  %2821 = vmatmul.msk.f32.gmra.mxu3 %vm1582_vm0, %v4373_v36 }
 0x2e4   : > { %v848_v57 = vadd.f32 %v4072_v58, %v847_v30  ;;  %v1248_v40 = vpop.f32.mrf.mxu1  ;;  %v1499_v30 = vmax.f32 %v1234_v22, 0.0 }
 0x2e6   : > { %2841 = vmatpush.xpose.msk.msra.mxu3 %vm1582_vm0, %v1502_v31  ;;  %v4309_v50 = vadd.f32 %v1248_v40, %v848_v57  ;;  %v1009_v25 = vpop.f32.mrf.mxu2 }
 0x2e7   : > { %v1010_v56 = vadd.f32 %v4072_v58, %v1009_v25 }
 0x2ea   : > { %2842 = vmatpush.xpose.msk.msra.mxu3 %vm1582_vm0, %v1501_v0  ;;  %v1410_v4 = vpop.f32.mrf.mxu3 }
 0x2eb   : > { %v850_v29 = vpop.f32.mrf.mxu0  ;;  %v4324_v3 = vadd.f32 %v1410_v4, %v1010_v56  ;;  %v1495_v56 = vmax.f32 %v4238_v62, 0.0  ;;  %2838 = vmatmul.msk.f32.vlgmr.msra.gmra.mxu2 %vm1582_vm0, %v4167_v21 }
 0x2ec   : > { %v851_v26 = vadd.f32 %v4072_v58, %v850_v29  ;;  %v1251_v40 = vpop.f32.mrf.mxu1  ;;  %v1496_v29 = vmax.f32 %v4252_v27, 0.0 }
 0x2ee   : > { %2843 = vmatpush.xpose.msk.msra.mxu3 %vm1582_vm0, %v1500_v17  ;;  %v4321_v61 = vadd.f32 %v1251_v40, %v851_v26  ;;  %v1012_v57 = vpop.f32.mrf.mxu2 }
 0x2ef   : > { %v1013_v2 = vadd.f32 %v4072_v58, %v1012_v57 }
 0x2f2   : > { %2844 = vmatpush.xpose.msk.msra.mxu3 %vm1582_vm0, %v1499_v30  ;;  %v1413_v19 = vpop.f32.mrf.mxu3  ;;  %v1216_v30 = vadd.f32 %v4203_v35, %v815_v10 }
 0x2f3   : > { %v853_v5 = vpop.f32.mrf.mxu0  ;;  %v4333_v59 = vadd.f32 %v1413_v19, %v1013_v2  ;;  %v809_v2 = vadd.f32 %v4072_v58, %v4152_v28  ;;  %2839 = vmatmul.msk.f32.gmra.mxu2 %vm1582_vm0, %v4373_v36 }
 0x2f4   : > { %v854_v33 = vadd.f32 %v4072_v58, %v853_v5  ;;  %v1254_v31 = vpop.f32.mrf.mxu1  ;;  %v1494_v5 = vmax.f32 %v4224_v15, 0.0  ;;  %v1493_v19 = vmax.f32 %v1216_v30, 0.0 }
 0x2f6   : > { %2845 = vmatpush.xpose.msk.msra.mxu3 %vm1582_vm0, %v1498_v46  ;;  %v4330_v54 = vadd.f32 %v1254_v31, %v854_v33  ;;  %v1015_v17 = vpop.f32.mrf.mxu2 }
 0x2f7   : > { %v1016_v26 = vadd.f32 %v4072_v58, %v1015_v17 }
 0x2fa   : > { %2846 = vmatpush.xpose.msk.msra.mxu3 %vm1582_vm0, %v1497_v12  ;;  %v1416_v25 = vpop.f32.mrf.mxu3  ;;  %v806_v12 = vadd.f32 %v4072_v58, %v4133_v18  ;;  %v803_v18 = vadd.f32 %v4072_v58, %v4114_v63  ;;  %v3268_v63 = vmov 0  }
 0x2fb   : > { %v856_v0 = vpop.f32.mrf.mxu0  ;;  %v4345_v4 = vadd.f32 %v1416_v25, %v1016_v26  ;;  %v800_v25 = vadd.f32 %v4072_v58, %v4096_v13  ;;  %3035 = vset.pattern.permute.xlu0 %v3268_v63  ;;  %3036 = vset.pattern.permute.xlu1 %v3268_v63 }
 0x2fc   : > { %v857_v14 = vadd.f32 %v4072_v58, %v856_v0  ;;  %v1257_v22 = vpop.f32.mrf.mxu1  ;;  %v1210_v0 = vadd.f32 %v4159_v38, %v809_v2  ;;  %v1207_v38 = vadd.f32 %v4140_v37, %v806_v12  ;;  %v1204_v10 = vadd.f32 %v4121_v53, %v803_v18  ;;  %v1570_v37 = vld [vmem:[%s4765_s4] sm:$0xff] }
 0x2fd   : > { %1574 = vperm.xlu0 %3035, %v1570_v37   ;;  %v1534_v2 = vmax.f32 %v4034_v52, 0.0  ;;  %v1532_v12 = vmax.f32 %v4012_v34, 0.0  ;;  %v1525_v37 = vmax.f32 %v3887_v9, 0.0 }
 0x2fe   : > { %2847 = vmatpush.xpose.msk.msra.mxu3 %vm1582_vm0, %v1496_v29  ;;  %v4340_v40 = vadd.f32 %v1257_v22, %v857_v14  ;;  %v1018_v31 = vpop.f32.mrf.mxu2  ;;  %v1492_v29 = vmax.f32 %v1213_v7, 0.0  ;;  %v1491_v17 = vmax.f32 %v1210_v0, 0.0  ;;  %v1489_v13 = vmax.f32 %v1204_v10, 0.0 }
 0x2ff   : > { %v1019_v44 = vadd.f32 %v4072_v58, %v1018_v31 }
 0x302   : > { %2848 = vmatpush.xpose.msk.msra.mxu3 %vm1582_vm0, %v1495_v56  ;;  %v1419_v57 = vpop.f32.mrf.mxu3  ;;  %v1490_v56 = vmax.f32 %v1207_v38, 0.0  ;;  %v1529_v38 = vmax.f32 %v3963_v6, 0.0  ;;  %v1526_v6 = vmax.f32 %v3906_v41, 0.0  ;;  %v2463_v41 = vld [vmem:[%s4767_s6] sm:$0x3] }
 0x303   : > { %v859_v27 = vpop.f32.mrf.mxu0  ;;  %v4360_v35 = vadd.f32 %v1419_v57, %v1019_v44  ;;  %v1535_v44 = vmax.f32 %v4045_v24, 0.0  ;;  %v1571_v57 = vld [vmem:[%s4765_s4 + $0x8] sm:$0x3] }
 0x304   : > { %v860_v46 = vadd.f32 %v4072_v58, %v859_v27  ;;  %v1260_v33 = vpop.f32.mrf.mxu1 }
 0x305   : > { %1579 = vperm.xlu0 %3035, %v1571_v57   ;;  %v1523_v57 = vmax.f32 %v3859_v16, 0.0 }
 0x306   : > { %2849 = vmatpush.xpose.msk.msra.mxu3 %vm1582_vm0, %v1494_v5  ;;  %v4355_v62 = vadd.f32 %v1260_v33, %v860_v46  ;;  %v1201_v5 = vadd.f32 %v4102_v8, %v800_v25  ;;  %v4397_v53 = vpop.f32.mrf.mxu2  ;;  %v4444_v25 = vld [vmem:[#allocation6] sm:$0x3] }
 0x307   : > { %2352 = vperm.xlu1 %3036, %v4444_v25  }
 0x308   : > { %v1488_v33 = vmax.f32 %v1201_v5, 0.0 }
 0x30a   : > { %2850 = vmatpush.xpose.msk.msra.mxu3 %vm1582_vm0, %v1493_v19  ;;  %v4406_v8 = vpop.f32.mrf.mxu3  ;;  %v1533_v19 = vmax.f32 %v4023_v51, 0.0 }
 0x30b   : > { %v862_v15 = vpop.f32.mrf.mxu0 }
 0x30c   : > { %v863_v14 = vadd.f32 %v4072_v58, %v862_v15  ;;  %v1263_v22 = vpop.f32.mrf.mxu1 }
 0x30d   : > { %2466 = vperm.xlu0 %3035, %v2463_v41  }
 0x30e   : > { %2851 = vmatpush.xpose.msk.msra.mxu3 %vm1582_vm0, %v1492_v29  ;;  %v4368_v28 = vadd.f32 %v1263_v22, %v863_v14  ;;  %v4419_v7 = vpop.f32.mrf.mxu2  ;;  %v1531_v29 = vmax.f32 %v3999_v48, 0.0  ;;  %v1530_v22 = vmax.f32 %v3982_v39, 0.0  ;;  %v1528_v48 = vmax.f32 %v3944_v32, 0.0 }
 0x30f   : > { %v1527_v39 = vmax.f32 %v3925_v11, 0.0  ;;  %v3269_v32 = vmov 1   ;;  %v1524_v11 = vmax.f32 %v3869_v47, 0.0 }
 0x310   : > { %3037 = vset.pattern.permute.xlu1 %v3269_v32  ;;  %v3270_v32 = vmov 2  }
 0x311   : > { %2380 = vperm.xlu1 %3037, %v4444_v25   ;;  %3038 = vset.pattern.permute.xlu2 %v3270_v32 }
 0x312   : > { %2852 = vmatpush.xpose.msk.msra.mxu3 %vm1582_vm0, %v1491_v17  ;;  %v4426_v0 = vpop.f32.mrf.mxu3  ;;  %2408 = vperm.xlu2 %3038, %v4444_v25  }
 0x313   : > { %v865_v26 = vpop.f32.mrf.mxu0 }
 0x314   : > { %v866_v27 = vadd.f32 %v4072_v58, %v865_v26  ;;  %v1266_v23 = vpop.f32.mrf.mxu1 }
 0x316   : > { %2853 = vmatpush.xpose.msk.msra.mxu3 %vm1582_vm0, %v1490_v56  ;;  %v4388_v30 = vadd.f32 %v1266_v23, %v866_v27  ;;  %v4432_v14 = vpop.f32.mrf.mxu2 }
 0x31a   : > { %2854 = vmatpush.xpose.msk.msra.mxu3 %vm1582_vm0, %v1489_v13  ;;  %v4439_v34 = vpop.f32.mrf.mxu3 }
 0x31b   : > { %v4399_v46 = vpop.f32.mrf.mxu0 }
 0x31c   : > { %v4401_v31 = vpop.f32.mrf.mxu1 }
 0x31e   : > { %2855 = vmatpush.xpose.msk.msra.mxu3 %vm1582_vm0, %v1488_v33  ;;  %v1030_v17 = vpop.f32.mrf.mxu2 }
 0x321   : > { %2856 = vmatmul.msk.f32.vlgmr.msra.gmra.mxu3 %vm1582_vm0, %v4167_v21 }
 0x322   : > { %2876 = vmatpush.xpose.msk.msrb.mxu3 %vm1582_vm0, %v1535_v44  ;;  %v1431_v56 = vpop.f32.mrf.mxu3 }
 0x323   : > { %v4416_v24 = vpop.f32.mrf.mxu0 }
 0x324   : > { %v4422_v15 = vpop.f32.mrf.mxu1 }
 0x326   : > { %2877 = vmatpush.xpose.msk.msrb.mxu3 %vm1582_vm0, %v1534_v2  ;;  %v1033_v27 = vpop.f32.mrf.mxu2 }
 0x329   : > { %2857 = vmatmul.msk.f32.gmra.mxu3 %vm1582_vm0, %v4373_v36 }
 0x32a   : > { %2878 = vmatpush.xpose.msk.msrb.mxu3 %vm1582_vm0, %v1533_v19  ;;  %v1434_v5 = vpop.f32.mrf.mxu3 }
 0x32b   : > { %v874_v52 = vpop.f32.mrf.mxu0 }
 0x32c   : > { %v4435_v51 = vpop.f32.mrf.mxu1 }
 0x32e   : > { %2879 = vmatpush.xpose.msk.msrb.mxu3 %vm1582_vm0, %v1532_v12  ;;  %v1036_v2 = vpop.f32.mrf.mxu2 }
 0x332   : > { %2880 = vmatpush.xpose.msk.msrb.mxu3 %vm1582_vm0, %v1531_v29 }
 0x333   : > { %v877_v18 = vpop.f32.mrf.mxu0 }
 0x334   : > { %v1278_v26 = vpop.f32.mrf.mxu1  ;;  %v878_v16 = vadd.f32 %v4072_v58, %v877_v18 }
 0x336   : > { %2881 = vmatpush.xpose.msk.msrb.mxu3 %vm1582_vm0, %v1530_v22  ;;  %v1037_v22 = vadd.f32 %v4072_v58, %v1036_v2  ;;  %v1990_v32 = vpop.f32.mrf.mxu2 }
 0x33a   : > { %2882 = vmatpush.xpose.msk.msrb.mxu3 %vm1582_vm0, %v1529_v38  ;;  %v1522_v38 = vmax.f32 %v3852_v55, 0.0  ;;  %v875_v55 = vadd.f32 %v4072_v58, %v874_v52  ;;  %v1028_v52 = vadd.f32 %v4072_v58, %v4432_v14 }
 0x33b   : > { %v880_v10 = vpop.f32.mrf.mxu0 }
 0x33c   : > { %v1281_v23 = vpop.f32.mrf.mxu1  ;;  %v881_v47 = vadd.f32 %v4072_v58, %v880_v10  ;;  %v1521_v10 = vmax.f32 %v3845_v1, 0.0  ;;  %v872_v1 = vadd.f32 %v4072_v58, %v4416_v24  ;;  %v869_v24 = vadd.f32 %v4072_v58, %v4399_v46 }
 0x33e   : > { %2883 = vmatpush.xpose.msk.msrb.mxu3 %vm1582_vm0, %v1528_v48  ;;  %v1437_v48 = vpop.f32.mrf.mxu3  ;;  %v1273_v14 = vadd.f32 %v4422_v15, %v872_v1  ;;  %v1270_v2 = vadd.f32 %v4401_v31, %v869_v24  ;;  %v1022_v15 = vadd.f32 %v4072_v58, %v4397_v53  ;;  %v1509_v53 = vmax.f32 %v4368_v28, 0.0  ;;  %v4810_v1 = vld [vmem:[#allocation32_spill] sm:$0xff] }
 0x33f   : > { %v1559_v28 = vmax.f32 %v4333_v59, 0.0 }
 0x340   : > { %v1512_v46 = vmax.f32 %v1273_v14, 0.0  ;;  %v4813_v14 = vld [vmem:[#allocation31_spill] sm:$0xff] }
 0x342   : > { %2884 = vmatpush.xpose.msk.msrb.mxu3 %vm1582_vm0, %v1527_v39  ;;  %v1034_v39 = vadd.f32 %v4072_v58, %v1033_v27  ;;  %v1279_v27 = vadd.f32 %v1278_v26, %v878_v16 }
 0x343   : > { %v883_v63 = vpop.f32.mrf.mxu0 }
 0x344   : > { %v884_v33 = vadd.f32 %v4072_v58, %v883_v63  ;;  %v1284_v9 = vpop.f32.mrf.mxu1  ;;  %v1438_v63 = vadd.f32 %v1437_v48, %v1037_v22  ;;  %v1435_v18 = vadd.f32 %v1434_v5, %v1034_v39  ;;  %v3271_v5 = vmov 3   ;;  %v4804_v48 = vld [vmem:[#allocation29_spill] sm:$0xff] }
 0x345   : > { %3039 = vset.pattern.permute.xlu2 %v3271_v5  ;;  %v1558_v22 = vmax.f32 %v4324_v3, 0.0 }
 0x346   : > { %2885 = vmatpush.xpose.msk.msrb.mxu3 %vm1582_vm0, %v1526_v6  ;;  %v1285_v12 = vadd.f32 %v1284_v9, %v884_v33  ;;  %v1514_v33 = vmax.f32 %v1279_v27, 0.0  ;;  %v1566_v26 = vmax.f32 %v1435_v18, 0.0  ;;  %2436 = vperm.xlu2 %3039, %v4444_v25   ;;  %v1511_v25 = vmax.f32 %v1270_v2, 0.0 }
 0x348   : > { %v1516_v6 = vmax.f32 %v1285_v12, 0.0  ;;  %v1560_v12 = vmax.f32 %v4345_v4, 0.0  ;;  %v1505_v4 = vmax.f32 %v4321_v61, 0.0  ;;  %v1556_v61 = vmax.f32 %v4302_v45, 0.0 }
 0x34a   : > { %2886 = vmatpush.xpose.msk.msrb.mxu3 %vm1582_vm0, %v1525_v37  ;;  %v1031_v37 = vadd.f32 %v4072_v58, %v1030_v17  ;;  %v1276_v17 = vadd.f32 %v4435_v51, %v875_v55  ;;  %v1429_v51 = vadd.f32 %v4439_v34, %v1028_v52  ;;  %v2013_v55 = vpop.f32.mrf.mxu3  ;;  %v1554_v52 = vmax.f32 %v4810_v1, 0.0  ;;  %v4821_v1 = vld [vmem:[#allocation17_spill] sm:$0xff] }
 0x34b   : > { %v886_v13 = vpop.f32.mrf.mxu0 }
 0x34c   : > { %v887_v44 = vadd.f32 %v4072_v58, %v886_v13  ;;  %v4802_v13 = vld [vmem:[#allocation9_spill] sm:$0xff] }
 0x34d   : > { %v1520_v41 = vmax.f32 %v4802_v13, 0.0 }
 0x34e   : > { %2887 = vmatpush.xpose.msk.msrb.mxu3 %vm1582_vm0, %v1524_v11  ;;  %v1288_v19 = vadd.f32 %v3801_v43, %v887_v44  ;;  %v1282_v43 = vadd.f32 %v1281_v23, %v881_v47  ;;  %v1567_v23 = vmax.f32 %v1438_v63, 0.0  ;;  %v1432_v44 = vadd.f32 %v1431_v56, %v1031_v37  ;;  %v4808_v37 = vld [vmem:[#allocation23_spill] sm:$0xff] }
 0x34f   : > { %v1025_v56 = vadd.f32 %v4072_v58, %v4419_v7  ;;  %v1423_v7 = vadd.f32 %v4406_v8, %v1022_v15  ;;  %v1510_v47 = vmax.f32 %v4388_v30, 0.0  ;;  %v1508_v8 = vmax.f32 %v4355_v62, 0.0 }
 0x350   : > { %v1517_v29 = vmax.f32 %v1288_v19, 0.0  ;;  %v1515_v11 = vmax.f32 %v1282_v43, 0.0  ;;  %v1565_v9 = vmax.f32 %v1432_v44, 0.0  ;;  %v1564_v19 = vmax.f32 %v1429_v51, 0.0 }
 0x351   : > { %v1426_v34 = vadd.f32 %v4426_v0, %v1025_v56  ;;  %v1562_v58 = vmax.f32 %v1423_v7, 0.0  ;;  %v1561_v0 = vmax.f32 %v4360_v35, 0.0  ;;  %v1507_v30 = vmax.f32 %v4340_v40, 0.0 }
 0x352   : > { %2888 = vmatpush.xpose.msk.msrb.mxu3 %vm1582_vm0, %v1523_v57  ;;  %2860 = vmatpush.xpose.msk.msrb.mxu2 %vm1582_vm0, %v1517_v29  ;;  %v1513_v57 = vmax.f32 %v1276_v17, 0.0  ;;  %v1506_v35 = vmax.f32 %v4330_v54, 0.0  ;;  %v3122_v29 = vld [vmem:[#allocation4] ss:$0 sm:$0xff]  ;;  %v1504_v54 = vmax.f32 %v4309_v50, 0.0 }
 0x353   : > { %v1563_v31 = vmax.f32 %v1426_v34, 0.0  ;;  %v989_v62 = vadd.f32 %v3122_v29, %v4273_v60  ;;  %v986_v40 = vadd.f32 %v3122_v29, %v4260_v42  ;;  %v4803_v60 = vld [vmem:[#allocation27_spill] sm:$0xff]  ;;  %v4805_v42 = vld [vmem:[#allocation25_spill] sm:$0xff]  ;;  %v977_v27 = vadd.f32 %v3122_v29, %v4808_v37 }
 0x354   : > { %v983_v3 = vadd.f32 %v3122_v29, %v4803_v60 }
 0x355   : > { %v1390_v59 = vadd.f32 %v4275_v20, %v989_v62  ;;  %v1387_v39 = vadd.f32 %v4804_v48, %v986_v40  ;;  %v980_v20 = vadd.f32 %v3122_v29, %v4805_v42 }
 0x356   : > { %2889 = vmatpush.xpose.msk.msrb.mxu3 %vm1582_vm0, %v1522_v38  ;;  %2861 = vmatpush.xpose.msk.msrb.mxu2 %vm1582_vm0, %v1516_v6  ;;  %v1557_v38 = vmax.f32 %v4312_v49, 0.0  ;;  %v4806_v49 = vld [vmem:[#allocation28_spill] sm:$0xff]  ;;  %v4807_v6 = vld [vmem:[#allocation33_spill] sm:$0xff] }
 0x357   : > { %v1551_v16 = vmax.f32 %v1390_v59, 0.0  ;;  %v1384_v43 = vadd.f32 %v4806_v49, %v983_v3  ;;  %v1550_v50 = vmax.f32 %v1387_v39, 0.0  ;;  %v1555_v63 = vmax.f32 %v4807_v6, 0.0 }
 0x35a   : > { %2890 = vmatpush.xpose.msk.msrb.mxu3 %vm1582_vm0, %v1521_v10  ;;  %2862 = vmatpush.xpose.msk.msrb.mxu2 %vm1582_vm0, %v1515_v11  ;;  %v4809_v11 = vld [vmem:[#allocation26_spill] sm:$0xff] }
 0x35b   : > { %v1381_v18 = vadd.f32 %v4809_v11, %v980_v20 }
 0x35d   : > { %v1548_v5 = vmax.f32 %v1381_v18, 0.0 }
 0x35e   : > { %2891 = vmatpush.xpose.msk.msrb.mxu3 %vm1582_vm0, %v1520_v41  ;;  %2863 = vmatpush.xpose.msk.msrb.mxu2 %vm1582_vm0, %v1514_v33  ;;  %v4811_v33 = vld [vmem:[#allocation21_spill] sm:$0xff] }
 0x35f   : > { %v974_v44 = vadd.f32 %v3122_v29, %v4811_v33 }
 0x361   : > { %2892 = vmatmul.msk.f32.vlgmr.msrb.gmra.mxu3 %vm1582_vm0, %v4167_v21 }
 0x362   : > { %2912 = vmatpush.xpose.msk.msra.mxu3 %vm1582_vm0, %v1567_v23  ;;  %2864 = vmatpush.xpose.msk.msrb.mxu2 %vm1582_vm0, %v1513_v57  ;;  %v1549_v23 = vmax.f32 %v1384_v43, 0.0  ;;  %v1553_v57 = vmax.f32 %v4813_v14, 0.0 }
 0x366   : > { %2913 = vmatpush.xpose.msk.msra.mxu3 %vm1582_vm0, %v1566_v26  ;;  %2865 = vmatpush.xpose.msk.msrb.mxu2 %vm1582_vm0, %v1512_v46  ;;  %v4812_v26 = vld [vmem:[#allocation24_spill] sm:$0xff]  ;;  %v2016_v2 = vpop.f32.mrf.mxu3  ;;  %v4814_v46 = vld [vmem:[#allocation19_spill] sm:$0xff] }
 0x367   : > { %v1378_v24 = vadd.f32 %v4812_v26, %v977_v27 }
 0x369   : > { %2893 = vmatmul.msk.f32.gmra.mxu3 %vm1582_vm0, %v4373_v36 }
 0x36a   : > { %2914 = vmatpush.xpose.msk.msra.mxu3 %vm1582_vm0, %v1565_v9  ;;  %2866 = vmatpush.xpose.msk.msrb.mxu2 %vm1582_vm0, %v1511_v25  ;;  %v1993_v9 = vpop.f32.mrf.mxu2  ;;  %v4815_v25 = vld [vmem:[#allocation22_spill] sm:$0xff] }
 0x36b   : > { %v1375_v7 = vadd.f32 %v4815_v25, %v974_v44  ;;  %v4823_v25 = vld [vmem:[#allocation15_spill] sm:$0xff] }
 0x36d   : > { %v1546_v62 = vmax.f32 %v1375_v7, 0.0  ;;  %v1541_v7 = vmax.f32 %v4823_v25, 0.0 }
 0x36e   : > { %2915 = vmatpush.xpose.msk.msra.mxu3 %vm1582_vm0, %v1564_v19  ;;  %2867 = vmatpush.xpose.msk.msrb.mxu2 %vm1582_vm0, %v1510_v47  ;;  %v971_v19 = vadd.f32 %v3122_v29, %v4814_v46 }
 0x36f   : > { %v4549_v10 = vpop.permute.xlu0 %1574 }
 0x370   : > { %v1991_v45 = vadd.f32 %v1990_v32, %v4549_v10  ;;  %v4557_v41 = vadd.f32 %v2013_v55, %v4549_v10 }
 0x372   : > { %2916 = vmatpush.xpose.msk.msra.mxu3 %vm1582_vm0, %v1563_v31  ;;  %2868 = vmatpush.xpose.msk.msrb.mxu2 %vm1582_vm0, %v1509_v53  ;;  %v2930_v13 = vmul.f32 -1.442695, %v1991_v45  ;;  %v2931_v17 = vmul.f32 -1.442695, %v4557_v41  ;;  %v1547_v31 = vmax.f32 %v1378_v24, 0.0 }
 0x374   : > { %3041 = vpow2.f32 %v2930_v13 }
 0x375   : > { %3043 = vpow2.f32 %v2931_v17 }
 0x376   : > { %2917 = vmatpush.xpose.msk.msra.mxu3 %vm1582_vm0, %v1562_v58  ;;  %2869 = vmatpush.xpose.msk.msrb.mxu2 %vm1582_vm0, %v1508_v8  ;;  %v4816_v58 = vld [vmem:[#allocation30_spill] sm:$0xff] }
 0x377   : > { %v4568_v51 = vpop.permute.xlu0 %1579  ;;  %v1552_v53 = vmax.f32 %v4816_v58, 0.0 }
 0x378   : > { %v4572_v56 = vadd.f32 %v1993_v9, %v4568_v51  ;;  %v2017_v15 = vadd.f32 %v2016_v2, %v4568_v51 }
 0x37a   : > { %2918 = vmatpush.xpose.msk.msra.mxu3 %vm1582_vm0, %v1561_v0  ;;  %2870 = vmatpush.xpose.msk.msrb.mxu2 %vm1582_vm0, %v1507_v30  ;;  %v3042_v34 = vpop.eup %3041  ;;  %v2478_v47 = vsel %vm2477_vm1, %v4572_v56, -inf }
 0x37b   : > { %v2189_v0 = vadd.f32 1.0, %v3042_v34  ;;  %v2479_v8 = vrot.slane %v2478_v47, 4  ;;  %v3044_v30 = vpop.eup %3043 }
 0x37d   : > { %3045 = vrcp.f32 %v2189_v0  ;;  %v2208_v3 = vand.u32 2147483648, %v2189_v0  ;;  %vm2202_vm2 = vweird.f32 %v2189_v0 }
 0x37e   : > { %2919 = vmatpush.xpose.msk.msra.mxu3 %vm1582_vm0, %v1560_v12  ;;  %2871 = vmatpush.xpose.msk.msrb.mxu2 %vm1582_vm0, %v1506_v35  ;;  %v2485_v12 = vsel %vm2477_vm1, %v2017_v15, -inf  ;;  %v4817_v35 = vld [vmem:[#allocation20_spill] sm:$0xff] }
 0x37f   : > { %v1372_v29 = vadd.f32 %v4817_v35, %v971_v19  ;;  %v2209_v6 = vor.u32 1.1754944e-38, %v2208_v3 }
 0x382   : > { %2920 = vmatpush.xpose.msk.msra.mxu3 %vm1582_vm0, %v1559_v28  ;;  %2872 = vmatpush.xpose.msk.msrb.mxu2 %vm1582_vm0, %v1505_v4  ;;  %v2486_v28 = vrot.slane %v2485_v12, 4  ;;  %v2480_v4 = vmax.f32 %v2478_v47, %v2479_v8 }
 0x383   : > { %v3046_v60 = vpop.eup %3045 }
 0x384   : > { %v2487_v40 = vmax.f32 %v2485_v12, %v2486_v28  ;;  %v2481_v59 = vrot.slane %v2480_v4, 2  ;;  %vm2203_vm3 = vweird.f32 %v3046_v60 }
 0x385   : > { %vm4593_vm5 = vmor %vm2202_vm2, %vm2203_vm3 }
 0x386   : > { %2921 = vmatpush.xpose.msk.msra.mxu3 %vm1582_vm0, %v1558_v22  ;;  %2873 = vmatpush.xpose.msk.msrb.mxu2 %vm1582_vm0, %v1504_v54  ;;  %v2190_v22 = vadd.f32 1.0, %v3044_v30  ;;  %v1545_v54 = vmax.f32 %v1372_v29, 0.0  ;;  %v2482_v48 = vmax.f32 %v2480_v4, %v2481_v59  ;;  %v4824_v29 = vld [vmem:[#allocation14_spill] sm:$0xff]  ;;  %v4622_v59 = vpop.permute.xlu2 %2408 }
 0x388   : > { %3047 = vrcp.f32 %v2190_v22  ;;  %v2483_v20 = vrot.slane %v2482_v48, 1  ;;  %vm2217_vm4 = vweird.f32 %v2190_v22  ;;  %v2221_v27 = vand.u32 2147483647, %v2190_v22 }
 0x389   : > { %2874 = vmatmul.msk.f32.vlgmr.msrb.gmra.mxu2 %vm1582_vm0, %v4167_v21  ;;  %3049 = vtanh.f32 %v1991_v45  ;;  %v2223_v45 = vand.u32 2147483648, %v2190_v22 }
 0x38a   : > { %2922 = vmatpush.xpose.msk.msra.mxu3 %vm1582_vm0, %v1557_v38  ;;  %2894 = vmatpush.xpose.msk.msra.mxu2 %vm1582_vm0, %v1551_v16  ;;  %v2488_v38 = vrot.slane %v2487_v40, 2  ;;  %v2198_v16 = vmul.f32 %v3046_v60, %v2189_v0  ;;  %v2484_v32 = vmax.f32 %v2482_v48, %v2483_v20  ;;  %3051 = vtanh.f32 %v4557_v41 }
 0x38b   : > { %v2224_v14 = vor.u32 1.1754944e-38, %v2223_v45  ;;  %vm2222_vm9 = vcmp.eq.f32.partialorder %v2221_v27, 8.507059e+37 }
 0x38c   : > { %v2489_v39 = vmax.f32 %v2487_v40, %v2488_v38 }
 0x38e   : > { %2923 = vmatpush.xpose.msk.msra.mxu3 %vm1582_vm0, %v1556_v61  ;;  %2895 = vmatpush.xpose.msk.msra.mxu2 %vm1582_vm0, %v1550_v50  ;;  %v4818_v61 = vld [vmem:[#allocation18_spill] sm:$0xff]  ;;  %v2490_v49 = vrot.slane %v2489_v39, 1  ;;  %v3048_v43 = vpop.eup %3047  ;;  %v2199_v50 = vsub.f32 1.0, %v2198_v16  ;;  %v4825_v16 = vld [vmem:[#allocation13_spill] sm:$0xff] }
 0x38f   : > { %v1544_v42 = vmax.f32 %v4818_v61, 0.0  ;;  %vm2218_vm6 = vweird.f32 %v3048_v43  ;;  %v3050_v33 = vpop.eup %3049  ;;  %v1539_v61 = vmax.f32 %v4825_v16, 0.0 }
 0x390   : > { %v2491_v55 = vmax.f32 %v2489_v39, %v2490_v49  ;;  %v2200_v37 = vmul.f32 %v3046_v60, %v2199_v50  ;;  %vm2219_vm8 = vmor %vm2217_vm4, %vm2218_vm6  ;;  %v3052_v19 = vpop.eup %3051 }
 0x391   : > { %2875 = vmatmul.msk.f32.gmra.mxu2 %vm1582_vm0, %v4373_v36 }
 0x392   : > { %2924 = vmatpush.xpose.msk.msra.mxu3 %vm1582_vm0, %v1555_v63  ;;  %2896 = vmatpush.xpose.msk.msra.mxu2 %vm1582_vm0, %v1549_v23  ;;  %v2213_v63 = vmul.f32 %v3048_v43, %v2190_v22  ;;  %v2534_v23 = vsub.f32 %v4572_v56, %v2484_v32  ;;  %v2535_v13 = vsub.f32 %v2017_v15, %v2491_v55  ;;  %v4822_v56 = vld [vmem:[#allocation16_spill] sm:$0xff] }
 0x393   : > { %v2201_v17 = vadd.f32 %v3046_v60, %v2200_v37  ;;  %v1542_v2 = vmax.f32 %v4822_v56, 0.0 }
 0x394   : > { %v2214_v18 = vsub.f32 1.0, %v2213_v63  ;;  %v2542_v26 = vmul.f32 1.442695, %v2534_v23  ;;  %v2544_v24 = vmul.f32 1.442695, %v2535_v13  ;;  %v4827_v23 = vld [vmem:[#allocation12_spill] sm:$0xff] }
 0x395   : > { %v1538_v13 = vmax.f32 %v4827_v23, 0.0 }
 0x396   : > { %2925 = vmatpush.xpose.msk.msra.mxu3 %vm1582_vm0, %v1554_v52  ;;  %2897 = vmatpush.xpose.msk.msra.mxu2 %vm1582_vm0, %v1548_v5  ;;  %v1543_v52 = vmax.f32 %v4821_v1, 0.0  ;;  %v2215_v44 = vmul.f32 %v3048_v43, %v2214_v18  ;;  %v2205_v5 = vsel %vm4593_vm5, %v3046_v60, %v2201_v17  ;;  %3053 = vpow2.f32 %v2542_v26 }
 0x397   : > { %3055 = vpow2.f32 %v2544_v24 }
 0x398   : > { %v2216_v9 = vadd.f32 %v3048_v43, %v2215_v44 }
 0x39a   : > { %2926 = vmatpush.xpose.msk.msra.mxu3 %vm1582_vm0, %v1553_v57  ;;  %2898 = vmatpush.xpose.msk.msra.mxu2 %vm1582_vm0, %v1547_v31  ;;  %v2220_v41 = vsel %vm2219_vm8, %v3048_v43, %v2216_v9 }
 0x39b   : > { %v2225_v15 = vsel %vm2222_vm9, %v2224_v14, %v2220_v41  ;;  %v4828_v41 = vld [vmem:[#allocation11_spill] sm:$0xff] }
 0x39c   : > { %v2326_v34 = vrot.slane %v2225_v15, 4  ;;  %v4607_v47 = vpop.eup %3053 }
 0x39d   : > { %v4611_v8 = vpop.eup %3055  ;;  %v2558_v12 = vsel %vm2477_vm1, %v4607_v47, 0.0 }
 0x39e   : > { %2927 = vmatpush.xpose.msk.msra.mxu3 %vm1582_vm0, %v1552_v53  ;;  %2899 = vmatpush.xpose.msk.msra.mxu2 %vm1582_vm0, %v1546_v62  ;;  %v2342_v58 = vmul.f32 %v3052_v19, %v2326_v34  ;;  %v4609_v53 = vpop.permute.xlu1 %2352  ;;  %v2559_v28 = vrot.slane %v2558_v12, 4  ;;  %v2565_v35 = vsel %vm2477_vm1, %v4611_v8, 0.0  ;;  %v1540_v62 = vmax.f32 %v4824_v29, 0.0  ;;  %v4649_v34 = vpop.permute.xlu0 %2466 }
 0x39f   : > { %v2566_v40 = vrot.slane %v2565_v35, 4  ;;  %v1537_v19 = vmax.f32 %v4828_v41, 0.0 }
 0x3a0   : > { %v2356_v4 = vperm.slane %v2342_v58, 0  ;;  %v2384_v48 = vperm.slane %v2342_v58, 1  ;;  %v2440_v32 = vperm.slane %v2342_v58, 3  ;;  %v4639_v44 = vpop.permute.xlu2 %2436 }
 0x3a1   : > { %2928 = vmatmul.msk.f32.vlgmr.msra.gmra.mxu3 %vm1582_vm0, %v4167_v21  ;;  %v2206_v21 = vand.u32 2147483647, %v2189_v0  ;;  %v2036_v0 = vpop.f32.mrf.mxu2  ;;  %v2567_v60 = vadd.f32 %v2566_v40, %v2565_v35 }
 0x3a2   : > { %2900 = vmatpush.xpose.msk.msra.mxu2 %vm1582_vm0, %v1545_v54  ;;  %v4617_v30 = vadd.f32 %v2036_v0, %v4549_v10  ;;  %v2560_v54 = vadd.f32 %v2559_v28, %v2558_v12  ;;  %v2364_v50 = vmul.f32 %v2356_v4, %v4609_v53  ;;  %v2448_v14 = vmul.f32 %v2440_v32, %v4639_v44  ;;  %v4829_v0 = vld [vmem:[#allocation10_spill] sm:$0xff] }
 0x3a3   : > { %vm2207_vm7 = vcmp.eq.f32.partialorder %v2206_v21, 8.507059e+37  ;;  %v2568_v49 = vrot.slane %v2567_v60, 2  ;;  %v1536_v12 = vmax.f32 %v4829_v0, 0.0 }
 0x3a4   : > { %v2210_v57 = vsel %vm2207_vm7, %v2209_v6, %v2205_v5  ;;  %v2932_v39 = vmul.f32 -1.442695, %v4617_v30  ;;  %v2561_v20 = vrot.slane %v2560_v54, 2  ;;  %v2059_v9 = vpop.f32.mrf.mxu3 }
 0x3a5   : > { %v2325_v46 = vrot.slane %v2210_v57, 4  ;;  %v2569_v55 = vadd.f32 %v2568_v49, %v2567_v60 }
 0x3a6   : > { %2901 = vmatpush.xpose.msk.msra.mxu2 %vm1582_vm0, %v1544_v42  ;;  %v2412_v42 = vperm.slane %v2342_v58, 2  ;;  %3057 = vpow2.f32 %v2932_v39  ;;  %v2562_v21 = vadd.f32 %v2561_v20, %v2560_v54  ;;  %v4629_v6 = vpop.permute.xlu1 %2380 }
 0x3a7   : > { %v2341_v31 = vmul.f32 %v3050_v33, %v2325_v46  ;;  %v2392_v45 = vmul.f32 %v2384_v48, %v4629_v6  ;;  %v2570_v1 = vrot.slane %v2569_v55, 1  ;;  %v4645_v46 = vadd.f32 %v2059_v9, %v4549_v10 }
 0x3a8   : > { %v2563_v11 = vrot.slane %v2562_v21, 1  ;;  %v2420_v18 = vmul.f32 %v2412_v42, %v4622_v59 }
 0x3a9   : > { %2929 = vmatmul.msk.f32.gmra.mxu3 %vm1582_vm0, %v4373_v36  ;;  %v2355_v22 = vperm.slane %v2341_v31, 0  ;;  %v2411_v38 = vperm.slane %v2341_v31, 2  ;;  %v2383_v3 = vperm.slane %v2341_v31, 1  ;;  %v2439_v63 = vperm.slane %v2341_v31, 3 }
 0x3aa   : > { %2902 = vmatpush.xpose.msk.msra.mxu2 %vm1582_vm0, %v1543_v52  ;;  %v2400_v17 = vadd.f32 %v2392_v45, %v2364_v50  ;;  %v2564_v33 = vadd.f32 %v2563_v11, %v2562_v21  ;;  %v2571_v24 = vadd.f32 %v2570_v1, %v2569_v55  ;;  %v2933_v31 = vmul.f32 -1.442695, %v4645_v46 }
 0x3ab   : > { %v2363_v43 = vmul.f32 %v2355_v22, %v4609_v53  ;;  %v2419_v37 = vmul.f32 %v2411_v38, %v4622_v59  ;;  %v2391_v27 = vmul.f32 %v2383_v3, %v4629_v6  ;;  %v2447_v5 = vmul.f32 %v2439_v63, %v4639_v44 }
 0x3ac   : > { %v3058_v26 = vpop.eup %3057  ;;  %3059 = vrcp.f32 %v2564_v33  ;;  %v2428_v56 = vadd.f32 %v2420_v18, %v2400_v17 }
 0x3ad   : > { %v2399_v52 = vadd.f32 %v2391_v27, %v2363_v43  ;;  %3061 = vrcp.f32 %v2571_v24  ;;  %v2062_v27 = vpop.f32.mrf.mxu3 }
 0x3ae   : > { %2903 = vmatpush.xpose.msk.msra.mxu2 %vm1582_vm0, %v1542_v2  ;;  %v2191_v2 = vadd.f32 1.0, %v3058_v26  ;;  %v2456_v25 = vadd.f32 %v2448_v14, %v2428_v56  ;;  %v2063_v18 = vadd.f32 %v2062_v27, %v4568_v51 }
 0x3af   : > { %v2427_v57 = vadd.f32 %v2419_v37, %v2399_v52 }
 0x3b0   : > { %3063 = vrcp.f32 %v2191_v2  ;;  %v2470_v58 = vadd.f32 %v4649_v34, %v2456_v25  ;;  %vm2232_vm11 = vweird.f32 %v2191_v2  ;;  %v2238_v49 = vand.u32 2147483648, %v2191_v2 }
 0x3b1   : > { %v2455_v15 = vadd.f32 %v2447_v5, %v2427_v57  ;;  %3065 = vpow2.f32 %v2933_v31  ;;  %v2236_v50 = vand.u32 2147483647, %v2191_v2  ;;  %v2499_v52 = vsel %vm2477_vm1, %v2063_v18, -inf }
 0x3b2   : > { %2904 = vmatpush.xpose.msk.msra.mxu2 %vm1582_vm0, %v1541_v7  ;;  %v3060_v35 = vpop.eup %3059  ;;  %v2639_v29 = vrot.slane %v2470_v58, 6  ;;  %v2239_v32 = vor.u32 1.1754944e-38, %v2238_v49  ;;  %v2500_v24 = vrot.slane %v2499_v52, 4 }
 0x3b3   : > { %v2469_v7 = vadd.f32 %v4649_v34, %v2455_v15  ;;  %v2622_v22 = vmul.f32 %v3060_v35, %v4607_v47  ;;  %v3123_v47 = vld [vmem:[%s4764_s3] sm:$0xff]  ;;  %vm2237_vm14 = vcmp.eq.f32.partialorder %v2236_v50, 8.507059e+37 }
 0x3b5   : > { %v2638_v28 = vrot.slane %v2469_v7, 6 }
 0x3b6   : > { %2905 = vmatpush.xpose.msk.msra.mxu2 %vm1582_vm0, %v1540_v62  ;;  %v3062_v62 = vpop.eup %3061 }
 0x3b7   : > { %v3064_v4 = vpop.eup %3063  ;;  %v2623_v40 = vmul.f32 %v3062_v62, %v4611_v8  ;;  %v2654_v38 = vsel %vm2477_vm1, %v2622_v22, %v2638_v28 }
 0x3b8   : > { %v2228_v54 = vmul.f32 %v3064_v4, %v2191_v2  ;;  %v2663_v8 = vsel %vm2662_vm10, %v2654_v38, 0.0  ;;  %v3066_v3 = vpop.eup %3065  ;;  %vm2233_vm12 = vweird.f32 %v3064_v4 }
 0x3b9   : > { %v2655_v60 = vsel %vm2477_vm1, %v2623_v40, %v2639_v29  ;;  %2671 = vst [vmem:[%s4662_s21] sm:$0xff] %v2663_v8  ;;  %v2192_v16 = vadd.f32 1.0, %v3066_v3  ;;  %vm2234_vm13 = vmor %vm2232_vm11, %vm2233_vm12 }
 0x3ba   : > { %2906 = vmatpush.xpose.msk.msra.mxu2 %vm1582_vm0, %v1539_v61  ;;  %v2664_v48 = vsel %vm2662_vm10, %v2655_v60, 0.0  ;;  %v2229_v39 = vsub.f32 1.0, %v2228_v54  ;;  %v2039_v61 = vpop.f32.mrf.mxu2 }
 0x3bb   : > { %2672 = vst [vmem:[%s4662_s21 + $0x8] sm:$0xff] %v2664_v48  ;;  %v2040_v20 = vadd.f32 %v2039_v61, %v4568_v51  ;;  %3067 = vrcp.f32 %v2192_v16  ;;  %vm2247_vm15 = vweird.f32 %v2192_v16  ;;  %v2251_v17 = vand.u32 2147483647, %v2192_v16 }
 0x3bc   : > { %v2230_v42 = vmul.f32 %v3064_v4, %v2229_v39  ;;  %3069 = vtanh.f32 %v4617_v30  ;;  %v2253_v33 = vand.u32 2147483648, %v2192_v16  ;;  %v2501_v30 = vmax.f32 %v2499_v52, %v2500_v24 }
 0x3bd   : > { %v2492_v21 = vsel %vm2477_vm1, %v2040_v20, -inf  ;;  %vm2252_vm3 = vcmp.eq.f32.partialorder %v2251_v17, 8.507059e+37  ;;  %3071 = vtanh.f32 %v4645_v46 }
 0x3be   : > { %2907 = vmatpush.xpose.msk.msra.mxu2 %vm1582_vm0, %v1538_v13  ;;  %v2231_v43 = vadd.f32 %v3064_v4, %v2230_v42  ;;  %v2493_v63 = vrot.slane %v2492_v21, 4  ;;  %v2254_v56 = vor.u32 1.1754944e-38, %v2253_v33 }
 0x3c0   : > { %v2494_v55 = vmax.f32 %v2492_v21, %v2493_v63  ;;  %v2235_v37 = vsel %vm2234_vm13, %v3064_v4, %v2231_v43 }
 0x3c1   : > { %v3068_v45 = vpop.eup %3067  ;;  %v2240_v13 = vsel %vm2237_vm14, %v2239_v32, %v2235_v37 }
 0x3c2   : > { %2908 = vmatpush.xpose.msk.msra.mxu2 %vm1582_vm0, %v1537_v19  ;;  %v2495_v11 = vrot.slane %v2494_v55, 2  ;;  %v2243_v23 = vmul.f32 %v3068_v45, %v2192_v16  ;;  %v2327_v5 = vrot.slane %v2240_v13, 4  ;;  %v3070_v14 = vpop.eup %3069  ;;  %v2502_v19 = vrot.slane %v2501_v30, 2 }
 0x3c3   : > { %v3072_v62 = vpop.eup %3071 }
 0x3c4   : > { %v2496_v1 = vmax.f32 %v2494_v55, %v2495_v11  ;;  %v2343_v15 = vmul.f32 %v3070_v14, %v2327_v5  ;;  %v2503_v31 = vmax.f32 %v2501_v30, %v2502_v19 }
 0x3c6   : > { %2909 = vmatpush.xpose.msk.msra.mxu2 %vm1582_vm0, %v1536_v12  ;;  %v2497_v26 = vrot.slane %v2496_v1, 1  ;;  %v2504_v0 = vrot.slane %v2503_v31, 1  ;;  %v2357_v12 = vperm.slane %v2343_v15, 0  ;;  %v2385_v28 = vperm.slane %v2343_v15, 1 }
 0x3c7   : > { %v2413_v40 = vperm.slane %v2343_v15, 2  ;;  %v2441_v8 = vperm.slane %v2343_v15, 3 }
 0x3c8   : > { %v2498_v9 = vmax.f32 %v2496_v1, %v2497_v26  ;;  %v2505_v29 = vmax.f32 %v2503_v31, %v2504_v0  ;;  %v2365_v22 = vmul.f32 %v2357_v12, %v4609_v53  ;;  %v2393_v4 = vmul.f32 %v2385_v28, %v4629_v6 }
 0x3c9   : > { %2910 = vmatmul.msk.f32.vlgmr.msra.gmra.mxu2 %vm1582_vm0, %v3123_v47  ;;  %v2421_v16 = vmul.f32 %v2413_v40, %v4622_v59  ;;  %v2449_v63 = vmul.f32 %v2441_v8, %v4639_v44 }
 0x3ca   : > { %v2536_v41 = vsub.f32 %v2040_v20, %v2498_v9  ;;  %v2537_v38 = vsub.f32 %v2063_v18, %v2505_v29  ;;  %v2401_v39 = vadd.f32 %v2393_v4, %v2365_v22 }
 0x3cc   : > { %v2546_v7 = vmul.f32 1.442695, %v2536_v41  ;;  %v2548_v60 = vmul.f32 1.442695, %v2537_v38  ;;  %v2429_v21 = vadd.f32 %v2421_v16, %v2401_v39 }
 0x3ce   : > { %3073 = vpow2.f32 %v2546_v7 }
 0x3cf   : > { %3075 = vpow2.f32 %v2548_v60 }
 0x3d1   : > { %2911 = vmatmul.msk.f32.gmra.mxu2 %vm1582_vm0, %v4373_v36  ;;  %v2244_v36 = vsub.f32 1.0, %v2243_v23  ;;  %vm2248_vm0 = vweird.f32 %v3068_v45  ;;  %v2457_v23 = vadd.f32 %v2449_v63, %v2429_v21 }
 0x3d2   : > { %vm2249_vm2 = vmor %vm2247_vm15, %vm2248_vm0 }
 0x3d3   : > { %v2245_v57 = vmul.f32 %v3068_v45, %v2244_v36 }
 0x3d4   : > { %v3074_v54 = vpop.eup %3073 }
 0x3d5   : > { %v2246_v2 = vadd.f32 %v3068_v45, %v2245_v57  ;;  %v2572_v46 = vsel %vm2477_vm1, %v3074_v54, 0.0  ;;  %v2471_v57 = vadd.f32 %v4649_v34, %v2457_v23 }
 0x3d6   : > { %v2573_v3 = vrot.slane %v2572_v46, 4 }
 0x3d7   : > { %v2250_v25 = vsel %vm2249_vm2, %v3068_v45, %v2246_v2  ;;  %v3076_v45 = vpop.eup %3075  ;;  %v2640_v15 = vrot.slane %v2471_v57, 6 }
 0x3d8   : > { %v2255_v58 = vsel %vm2252_vm3, %v2254_v56, %v2250_v25  ;;  %v2574_v49 = vadd.f32 %v2573_v3, %v2572_v46  ;;  %v2579_v18 = vsel %vm2477_vm1, %v3076_v45, 0.0 }
 0x3d9   : > { %v2328_v35 = vrot.slane %v2255_v58, 4  ;;  %v2580_v13 = vrot.slane %v2579_v18, 4 }
 0x3da   : > { %v2575_v50 = vrot.slane %v2574_v49, 2 }
 0x3db   : > { %v2344_v47 = vmul.f32 %v3072_v62, %v2328_v35  ;;  %v2581_v26 = vadd.f32 %v2580_v13, %v2579_v18 }
 0x3dc   : > { %v2576_v27 = vadd.f32 %v2575_v50, %v2574_v49 }
 0x3dd   : > { %v2358_v42 = vperm.slane %v2344_v47, 0  ;;  %v2386_v20 = vperm.slane %v2344_v47, 1  ;;  %v2414_v37 = vperm.slane %v2344_v47, 2  ;;  %v2442_v17 = vperm.slane %v2344_v47, 3 }
 0x3de   : > { %v2577_v11 = vrot.slane %v2576_v27, 1  ;;  %v2582_v9 = vrot.slane %v2581_v26, 2 }
 0x3df   : > { %v2366_v32 = vmul.f32 %v2358_v42, %v4609_v53  ;;  %v2394_v55 = vmul.f32 %v2386_v20, %v4629_v6  ;;  %v2422_v52 = vmul.f32 %v2414_v37, %v4622_v59  ;;  %v2450_v56 = vmul.f32 %v2442_v17, %v4639_v44 }
 0x3e0   : > { %v2578_v33 = vadd.f32 %v2577_v11, %v2576_v27  ;;  %v2583_v2 = vadd.f32 %v2582_v9, %v2581_v26 }
 0x3e1   : > { %v2402_v1 = vadd.f32 %v2394_v55, %v2366_v32 }
 0x3e2   : > { %v2584_v25 = vrot.slane %v2583_v2, 1 }
 0x3e3   : > { %v2430_v30 = vadd.f32 %v2422_v52, %v2402_v1 }
 0x3e4   : > { %v2105_v48 = vpop.f32.mrf.mxu3  ;;  %v2585_v12 = vadd.f32 %v2584_v25, %v2583_v2 }
 0x3e5   : > { %v2106_v61 = vadd.f32 %v2105_v48, %v4549_v10  ;;  %v2458_v31 = vadd.f32 %v2450_v56, %v2430_v30 }
 0x3e7   : > { %v2935_v43 = vmul.f32 -1.442695, %v2106_v61  ;;  %v2472_v4 = vadd.f32 %v4649_v34, %v2458_v31 }
 0x3e9   : > { %3077 = vpow2.f32 %v2935_v43  ;;  %v2641_v8 = vrot.slane %v2472_v4, 6 }
 0x3ea   : > { %3079 = vrcp.f32 %v2578_v33 }
 0x3ec   : > { %v2108_v24 = vpop.f32.mrf.mxu3 }
 0x3ed   : > { %v2109_v14 = vadd.f32 %v2108_v24, %v4568_v51 }
 0x3ef   : > { %v3078_v36 = vpop.eup %3077  ;;  %v2513_v41 = vsel %vm2477_vm1, %v2109_v14, -inf }
 0x3f0   : > { %v2194_v5 = vadd.f32 1.0, %v3078_v36  ;;  %v2514_v19 = vrot.slane %v2513_v41, 4  ;;  %v3080_v7 = vpop.eup %3079 }
 0x3f1   : > { %v2624_v0 = vmul.f32 %v3080_v7, %v3074_v54 }
 0x3f2   : > { %3081 = vrcp.f32 %v2194_v5  ;;  %v2515_v58 = vmax.f32 %v2513_v41, %v2514_v19  ;;  %v2283_v40 = vand.u32 2147483648, %v2194_v5  ;;  %vm2277_vm4 = vweird.f32 %v2194_v5 }
 0x3f3   : > { %v2656_v29 = vsel %vm2477_vm1, %v2624_v0, %v2640_v15  ;;  %3083 = vrcp.f32 %v2585_v12  ;;  %v2281_v46 = vand.u32 2147483647, %v2194_v5 }
 0x3f4   : > { %v2516_v35 = vrot.slane %v2515_v58, 2  ;;  %v2665_v22 = vsel %vm2662_vm10, %v2656_v29, 0.0  ;;  %3085 = vtanh.f32 %v2106_v61  ;;  %v2284_v3 = vor.u32 1.1754944e-38, %v2283_v40 }
 0x3f5   : > { %2673 = vst [vmem:[%s4662_s21 + $0x10] sm:$0xff] %v2665_v22  ;;  %vm2282_vm7 = vcmp.eq.f32.partialorder %v2281_v46, 8.507059e+37 }
 0x3f6   : > { %v2517_v38 = vmax.f32 %v2515_v58, %v2516_v35 }
 0x3f8   : > { %v3082_v28 = vpop.eup %3081  ;;  %v2518_v54 = vrot.slane %v2517_v38, 1 }
 0x3f9   : > { %v2273_v62 = vmul.f32 %v3082_v28, %v2194_v5  ;;  %vm2278_vm5 = vweird.f32 %v3082_v28  ;;  %v3084_v39 = vpop.eup %3083 }
 0x3fa   : > { %vm2279_vm6 = vmor %vm2277_vm4, %vm2278_vm5  ;;  %v2519_v48 = vmax.f32 %v2517_v38, %v2518_v54  ;;  %v2625_v42 = vmul.f32 %v3084_v39, %v3076_v45  ;;  %v3086_v43 = vpop.eup %3085 }
 0x3fb   : > { %v2274_v47 = vsub.f32 1.0, %v2273_v62 }
 0x3fc   : > { %v2539_v20 = vsub.f32 %v2109_v14, %v2519_v48  ;;  %v2657_v50 = vsel %vm2477_vm1, %v2625_v42, %v2641_v8 }
 0x3fd   : > { %v2275_v60 = vmul.f32 %v3082_v28, %v2274_v47  ;;  %v2666_v61 = vsel %vm2662_vm10, %v2657_v50, 0.0 }
 0x3fe   : > { %v2552_v63 = vmul.f32 1.442695, %v2539_v20  ;;  %2674 = vst [vmem:[%s4662_s21 + $0x18] sm:$0xff] %v2666_v61 }
 0x3ff   : > { %v2276_v16 = vadd.f32 %v3082_v28, %v2275_v60 }
 0x400   : > { %3087 = vpow2.f32 %v2552_v63 }
 0x401   : > { %v2280_v49 = vsel %vm2279_vm6, %v3082_v28, %v2276_v16 }
 0x402   : > { %v2285_v21 = vsel %vm2282_vm7, %v2284_v3, %v2280_v49 }
 0x403   : > { %v2330_v32 = vrot.slane %v2285_v21, 4 }
 0x405   : > { %v2346_v55 = vmul.f32 %v3086_v43, %v2330_v32 }
 0x406   : > { %v3088_v23 = vpop.eup %3087 }
 0x407   : > { %v2360_v37 = vperm.slane %v2346_v55, 0  ;;  %v2388_v27 = vperm.slane %v2346_v55, 1  ;;  %v2416_v45 = vperm.slane %v2346_v55, 2  ;;  %v2593_v13 = vsel %vm2477_vm1, %v3088_v23, 0.0 }
 0x408   : > { %v2594_v1 = vrot.slane %v2593_v13, 4  ;;  %v2444_v36 = vperm.slane %v2346_v55, 3 }
 0x409   : > { %v2368_v11 = vmul.f32 %v2360_v37, %v4609_v53  ;;  %v2396_v18 = vmul.f32 %v2388_v27, %v4629_v6  ;;  %v2424_v33 = vmul.f32 %v2416_v45, %v4622_v59 }
 0x40a   : > { %v2595_v24 = vadd.f32 %v2594_v1, %v2593_v13  ;;  %v2452_v9 = vmul.f32 %v2444_v36, %v4639_v44 }
 0x40b   : > { %v2404_v17 = vadd.f32 %v2396_v18, %v2368_v11 }
 0x40c   : > { %v2082_v52 = vpop.f32.mrf.mxu2  ;;  %v2596_v14 = vrot.slane %v2595_v24, 2 }
 0x40d   : > { %v2083_v26 = vadd.f32 %v2082_v52, %v4549_v10  ;;  %v2432_v57 = vadd.f32 %v2424_v33, %v2404_v17 }
 0x40e   : > { %v2597_v30 = vadd.f32 %v2596_v14, %v2595_v24 }
 0x40f   : > { %v2934_v5 = vmul.f32 -1.442695, %v2083_v26  ;;  %v2460_v41 = vadd.f32 %v2452_v9, %v2432_v57 }
 0x410   : > { %v2598_v56 = vrot.slane %v2597_v30, 1 }
 0x411   : > { %3089 = vpow2.f32 %v2934_v5  ;;  %v2474_v0 = vadd.f32 %v4649_v34, %v2460_v41 }
 0x412   : > { %v2599_v15 = vadd.f32 %v2598_v56, %v2597_v30 }
 0x413   : > { %v2643_v28 = vrot.slane %v2474_v0, 6 }
 0x414   : > { %v2085_v2 = vpop.f32.mrf.mxu2  ;;  %3091 = vrcp.f32 %v2599_v15 }
 0x415   : > { %v2086_v19 = vadd.f32 %v2085_v2, %v4568_v51 }
 0x417   : > { %v3090_v25 = vpop.eup %3089  ;;  %v2506_v7 = vsel %vm2477_vm1, %v2086_v19, -inf }
 0x418   : > { %v2193_v31 = vadd.f32 1.0, %v3090_v25  ;;  %v2507_v58 = vrot.slane %v2506_v7, 4 }
 0x41a   : > { %3093 = vrcp.f32 %v2193_v31  ;;  %v2508_v12 = vmax.f32 %v2506_v7, %v2507_v58  ;;  %v3092_v29 = vpop.eup %3091  ;;  %v2268_v60 = vand.u32 2147483648, %v2193_v31  ;;  %vm2262_vm8 = vweird.f32 %v2193_v31 }
 0x41b   : > { %v2627_v22 = vmul.f32 %v3092_v29, %v3088_v23  ;;  %3095 = vtanh.f32 %v2083_v26  ;;  %v2266_v39 = vand.u32 2147483647, %v2193_v31 }
 0x41c   : > { %v2509_v35 = vrot.slane %v2508_v12, 2  ;;  %v2269_v20 = vor.u32 1.1754944e-38, %v2268_v60 }
 0x41d   : > { %v2659_v47 = vsel %vm2477_vm1, %v2627_v22, %v2643_v28  ;;  %vm2267_vm12 = vcmp.eq.f32.partialorder %v2266_v39, 8.507059e+37 }
 0x41e   : > { %v2510_v40 = vmax.f32 %v2508_v12, %v2509_v35  ;;  %v2668_v54 = vsel %vm2662_vm10, %v2659_v47, 0.0 }
 0x41f   : > { %2676 = vst [vmem:[%s4662_s21 + $0x28] sm:$0xff] %v2668_v54 }
 0x420   : > { %v3094_v38 = vpop.eup %3093  ;;  %v2511_v3 = vrot.slane %v2510_v40, 1 }
 0x421   : > { %v2258_v46 = vmul.f32 %v3094_v38, %v2193_v31  ;;  %vm2263_vm9 = vweird.f32 %v3094_v38  ;;  %v3096_v50 = vpop.eup %3095 }
 0x422   : > { %v2512_v16 = vmax.f32 %v2510_v40, %v2511_v3  ;;  %vm2264_vm11 = vmor %vm2262_vm8, %vm2263_vm9 }
 0x423   : > { %v2259_v48 = vsub.f32 1.0, %v2258_v46 }
 0x424   : > { %v2151_v62 = vpop.f32.mrf.mxu3  ;;  %v2538_v49 = vsub.f32 %v2086_v19, %v2512_v16 }
 0x425   : > { %v2152_v4 = vadd.f32 %v2151_v62, %v4549_v10  ;;  %v2260_v42 = vmul.f32 %v3094_v38, %v2259_v48 }
 0x426   : > { %v2550_v61 = vmul.f32 1.442695, %v2538_v49 }
 0x427   : > { %v2937_v8 = vmul.f32 -1.442695, %v2152_v4  ;;  %v2261_v21 = vadd.f32 %v3094_v38, %v2260_v42 }
 0x429   : > { %3097 = vpow2.f32 %v2937_v8  ;;  %v2265_v32 = vsel %vm2264_vm11, %v3094_v38, %v2261_v21 }
 0x42a   : > { %v2270_v27 = vsel %vm2267_vm12, %v2269_v20, %v2265_v32  ;;  %3099 = vpow2.f32 %v2550_v61 }
 0x42b   : > { %v2329_v18 = vrot.slane %v2270_v27, 4 }
 0x42c   : > { %v2154_v43 = vpop.f32.mrf.mxu3 }
 0x42d   : > { %v2155_v63 = vadd.f32 %v2154_v43, %v4568_v51  ;;  %v2345_v13 = vmul.f32 %v3096_v50, %v2329_v18 }
 0x42f   : > { %v2527_v55 = vsel %vm2477_vm1, %v2155_v63, -inf  ;;  %v3098_v37 = vpop.eup %3097  ;;  %v2359_v52 = vperm.slane %v2345_v13, 0  ;;  %v2387_v17 = vperm.slane %v2345_v13, 1  ;;  %v2415_v36 = vperm.slane %v2345_v13, 2 }
 0x430   : > { %v2528_v11 = vrot.slane %v2527_v55, 4  ;;  %v2196_v45 = vadd.f32 1.0, %v3098_v37  ;;  %v3100_v33 = vpop.eup %3099  ;;  %v2443_v30 = vperm.slane %v2345_v13, 3 }
 0x431   : > { %v2367_v24 = vmul.f32 %v2359_v52, %v4609_v53  ;;  %v2395_v5 = vmul.f32 %v2387_v17, %v4629_v6  ;;  %v2586_v14 = vsel %vm2477_vm1, %v3100_v33, 0.0  ;;  %v2423_v41 = vmul.f32 %v2415_v36, %v4622_v59 }
 0x432   : > { %v2529_v23 = vmax.f32 %v2527_v55, %v2528_v11  ;;  %3101 = vrcp.f32 %v2196_v45  ;;  %v2587_v56 = vrot.slane %v2586_v14, 4  ;;  %vm2307_vm13 = vweird.f32 %v2196_v45 }
 0x433   : > { %v2403_v2 = vadd.f32 %v2395_v5, %v2367_v24  ;;  %v2313_v25 = vand.u32 2147483648, %v2196_v45  ;;  %v2311_v58 = vand.u32 2147483647, %v2196_v45  ;;  %3103 = vtanh.f32 %v2152_v4 }
 0x434   : > { %v2530_v1 = vrot.slane %v2529_v23, 2  ;;  %v2588_v7 = vadd.f32 %v2587_v56, %v2586_v14  ;;  %v2451_v35 = vmul.f32 %v2443_v30, %v4639_v44 }
 0x435   : > { %v2431_v28 = vadd.f32 %v2423_v41, %v2403_v2  ;;  %v2314_v22 = vor.u32 1.1754944e-38, %v2313_v25  ;;  %vm2312_vm0 = vcmp.eq.f32.partialorder %v2311_v58, 8.507059e+37 }
 0x436   : > { %v2531_v26 = vmax.f32 %v2529_v23, %v2530_v1  ;;  %v2589_v12 = vrot.slane %v2588_v7, 2 }
 0x437   : > { %v2459_v46 = vadd.f32 %v2451_v35, %v2431_v28 }
 0x438   : > { %v2532_v57 = vrot.slane %v2531_v26, 1  ;;  %v3102_v9 = vpop.eup %3101  ;;  %v2590_v40 = vadd.f32 %v2589_v12, %v2588_v7 }
 0x439   : > { %v2303_v19 = vmul.f32 %v3102_v9, %v2196_v45  ;;  %vm2308_vm14 = vweird.f32 %v3102_v9  ;;  %v3104_v60 = vpop.eup %3103  ;;  %v2473_v16 = vadd.f32 %v4649_v34, %v2459_v46 }
 0x43a   : > { %v2533_v15 = vmax.f32 %v2531_v26, %v2532_v57  ;;  %vm2309_vm15 = vmor %vm2307_vm13, %vm2308_vm14  ;;  %v2591_v47 = vrot.slane %v2590_v40, 1 }
 0x43b   : > { %v2304_v31 = vsub.f32 1.0, %v2303_v19  ;;  %v2642_v61 = vrot.slane %v2473_v16, 6 }
 0x43c   : > { %v2541_v0 = vsub.f32 %v2155_v63, %v2533_v15  ;;  %v2592_v3 = vadd.f32 %v2591_v47, %v2590_v40 }
 0x43d   : > { %v2305_v29 = vmul.f32 %v3102_v9, %v2304_v31 }
 0x43e   : > { %v2556_v62 = vmul.f32 1.442695, %v2541_v0 }
 0x43f   : > { %v2306_v38 = vadd.f32 %v3102_v9, %v2305_v29 }
 0x440   : > { %3105 = vpow2.f32 %v2556_v62 }
 0x441   : > { %v2310_v54 = vsel %vm2309_vm15, %v3102_v9, %v2306_v38  ;;  %3107 = vrcp.f32 %v2592_v3 }
 0x442   : > { %v2315_v8 = vsel %vm2312_vm0, %v2314_v22, %v2310_v54 }
 0x443   : > { %v2332_v48 = vrot.slane %v2315_v8, 4 }
 0x445   : > { %v2348_v39 = vmul.f32 %v3104_v60, %v2332_v48 }
 0x446   : > { %v3106_v4 = vpop.eup %3105 }
 0x447   : > { %v2607_v42 = vsel %vm2477_vm1, %v3106_v4, 0.0  ;;  %v2362_v20 = vperm.slane %v2348_v39, 0  ;;  %v2390_v49 = vperm.slane %v2348_v39, 1  ;;  %v2418_v43 = vperm.slane %v2348_v39, 2  ;;  %v3108_v32 = vpop.eup %3107 }
 0x448   : > { %v2608_v50 = vrot.slane %v2607_v42, 4  ;;  %v2446_v11 = vperm.slane %v2348_v39, 3  ;;  %v2626_v18 = vmul.f32 %v3108_v32, %v3100_v33 }
 0x449   : > { %v2370_v21 = vmul.f32 %v2362_v20, %v4609_v53  ;;  %v2398_v63 = vmul.f32 %v2390_v49, %v4629_v6  ;;  %v2426_v27 = vmul.f32 %v2418_v43, %v4622_v59 }
 0x44a   : > { %v2609_v55 = vadd.f32 %v2608_v50, %v2607_v42  ;;  %v2658_v23 = vsel %vm2477_vm1, %v2626_v18, %v2642_v61  ;;  %v2454_v36 = vmul.f32 %v2446_v11, %v4639_v44 }
 0x44b   : > { %v2406_v37 = vadd.f32 %v2398_v63, %v2370_v21  ;;  %v2667_v13 = vsel %vm2662_vm10, %v2658_v23, 0.0 }
 0x44c   : > { %v2610_v45 = vrot.slane %v2609_v55, 2  ;;  %v2128_v52 = vpop.f32.mrf.mxu2  ;;  %2675 = vst [vmem:[%s4662_s21 + $0x20] sm:$0xff] %v2667_v13 }
 0x44d   : > { %v2434_v17 = vadd.f32 %v2426_v27, %v2406_v37  ;;  %v2129_v26 = vadd.f32 %v2128_v52, %v4549_v10 }
 0x44e   : > { %v2611_v1 = vadd.f32 %v2610_v45, %v2609_v55 }
 0x44f   : > { %v2936_v5 = vmul.f32 -1.442695, %v2129_v26  ;;  %v2462_v57 = vadd.f32 %v2454_v36, %v2434_v17 }
 0x450   : > { %v2612_v24 = vrot.slane %v2611_v1, 1 }
 0x451   : > { %3109 = vpow2.f32 %v2936_v5  ;;  %v2476_v9 = vadd.f32 %v4649_v34, %v2462_v57 }
 0x452   : > { %v2613_v14 = vadd.f32 %v2612_v24, %v2611_v1 }
 0x453   : > { %v2645_v10 = vrot.slane %v2476_v9, 6 }
 0x454   : > { %3111 = vrcp.f32 %v2613_v14  ;;  %v2131_v33 = vpop.f32.mrf.mxu2 }
 0x455   : > { %v2132_v30 = vadd.f32 %v2131_v33, %v4568_v51 }
 0x457   : > { %v3110_v56 = vpop.eup %3109  ;;  %v2520_v2 = vsel %vm2477_vm1, %v2132_v30, -inf }
 0x458   : > { %v2195_v19 = vadd.f32 1.0, %v3110_v56  ;;  %v2521_v15 = vrot.slane %v2520_v2, 4 }
 0x45a   : > { %v3112_v41 = vpop.eup %3111  ;;  %3113 = vrcp.f32 %v2195_v19  ;;  %v2522_v31 = vmax.f32 %v2520_v2, %v2521_v15  ;;  %v2298_v22 = vand.u32 2147483648, %v2195_v19  ;;  %v2296_v38 = vand.u32 2147483647, %v2195_v19 }
 0x45b   : > { %v2629_v25 = vmul.f32 %v3112_v41, %v3106_v4  ;;  %3115 = vtanh.f32 %v2129_v26  ;;  %vm2292_vm3 = vweird.f32 %v2195_v19 }
 0x45c   : > { %v2523_v0 = vrot.slane %v2522_v31, 2  ;;  %v2299_v60 = vor.u32 1.1754944e-38, %v2298_v22  ;;  %vm2297_vm5 = vcmp.eq.f32.partialorder %v2296_v38, 8.507059e+37 }
 0x45d   : > { %v2661_v7 = vsel %vm2477_vm1, %v2629_v25, %v2645_v10 }
 0x45e   : > { %v2670_v58 = vsel %vm2662_vm10, %v2661_v7, 0.0  ;;  %v2524_v12 = vmax.f32 %v2522_v31, %v2523_v0 }
 0x45f   : > { %2678 = vst [vmem:[%s4662_s21 + $0x38] sm:$0xff] %v2670_v58 }
 0x460   : > { %v3114_v28 = vpop.eup %3113  ;;  %v2525_v51 = vrot.slane %v2524_v12, 1 }
 0x461   : > { %v2288_v35 = vmul.f32 %v3114_v28, %v2195_v19  ;;  %vm2293_vm2 = vweird.f32 %v3114_v28  ;;  %v3116_v4 = vpop.eup %3115 }
 0x462   : > { %v2526_v62 = vmax.f32 %v2524_v12, %v2525_v51  ;;  %vm2294_vm4 = vmor %vm2292_vm3, %vm2293_vm2 }
 0x463   : > { %v2289_v29 = vsub.f32 1.0, %v2288_v35 }
 0x464   : > { %v2540_v47 = vsub.f32 %v2132_v30, %v2526_v62 }
 0x465   : > { %v2290_v40 = vmul.f32 %v3114_v28, %v2289_v29 }
 0x466   : > { %v2554_v54 = vmul.f32 1.442695, %v2540_v47 }
 0x467   : > { %v2291_v46 = vadd.f32 %v3114_v28, %v2290_v40 }
 0x468   : > { %3117 = vpow2.f32 %v2554_v54 }
 0x469   : > { %v2295_v8 = vsel %vm2294_vm4, %v3114_v28, %v2291_v46 }
 0x46a   : > { %v2300_v3 = vsel %vm2297_vm5, %v2299_v60, %v2295_v8 }
 0x46b   : > { %v2331_v48 = vrot.slane %v2300_v3, 4 }
 0x46d   : > { %v2347_v39 = vmul.f32 %v3116_v4, %v2331_v48 }
 0x46e   : > { %v3118_v16 = vpop.eup %3117 }
 0x46f   : > { %v2361_v42 = vperm.slane %v2347_v39, 0  ;;  %v2389_v20 = vperm.slane %v2347_v39, 1  ;;  %v2600_v49 = vsel %vm2477_vm1, %v3118_v16, 0.0  ;;  %v2417_v63 = vperm.slane %v2347_v39, 2 }
 0x470   : > { %v2601_v21 = vrot.slane %v2600_v49, 4  ;;  %v2445_v27 = vperm.slane %v2347_v39, 3 }
 0x471   : > { %v2369_v43 = vmul.f32 %v2361_v42, %v4609_v53  ;;  %v2397_v50 = vmul.f32 %v2389_v20, %v4629_v6  ;;  %v2425_v37 = vmul.f32 %v2417_v63, %v4622_v59 }
 0x472   : > { %v2602_v61 = vadd.f32 %v2601_v21, %v2600_v49  ;;  %v2453_v23 = vmul.f32 %v2445_v27, %v4639_v44 }
 0x473   : > { %v2405_v32 = vadd.f32 %v2397_v50, %v2369_v43 }
 0x474   : > { %v2603_v55 = vrot.slane %v2602_v61, 2 }
 0x475   : > { %v2433_v18 = vadd.f32 %v2425_v37, %v2405_v32 }
 0x476   : > { %v2604_v11 = vadd.f32 %v2603_v55, %v2602_v61 }
 0x477   : > { %v2461_v1 = vadd.f32 %v2453_v23, %v2433_v18 }
 0x478   : > { %v2605_v45 = vrot.slane %v2604_v11, 1 }
 0x479   : > { %v2475_v53 = vadd.f32 %v4649_v34, %v2461_v1 }
 0x47a   : > { %v2606_v13 = vadd.f32 %v2605_v45, %v2604_v11 }
 0x47b   : > { %v2644_v17 = vrot.slane %v2475_v53, 6 }
 0x47c   : > { %3119 = vrcp.f32 %v2606_v13 }
 0x482   : > { %v3120_v6 = vpop.eup %3119 }
 0x483   : > { %v2628_v52 = vmul.f32 %v3120_v6, %v3118_v16 }
 0x485   : > { %v2660_v36 = vsel %vm2477_vm1, %v2628_v52, %v2644_v17 }
 0x486   : > { %v2669_v26 = vsel %vm2662_vm10, %v2660_v36, 0.0 }
 0x487   : > { %2677 = vst [vmem:[%s4662_s21 + $0x30] sm:$0xff] %v2669_v26 }
 0x488 PF: > { %p18_p8 = scmp.ge.s32.totalorder %s3332_s29, 5   ;;  %s4830_s24 = smov %s3253_s25 }
 0x489   : > { %s4831_s25 = smov %s3257_s26  ;;  %s4832_s26 = smov %s3342_s9 }
 0x48a   : > { %s4833_s27 = smov %s3332_s29  ;;  %20 = sbr.rel (!%p18_p8) target bundleno = 4 (0x4), region = 96 }
 0x48f   :  { %2701 = vsyncpa [#allocation3], 1 }
 0x490   :  { %2703 = vsyncpa [#allocation3 + $0x1], 1 }
 0x491   :  { %2704 = vsyncpa [#allocation5], 1 }

</bundles_post_ra>
